<compile_context>
chip_gen: v5e
topology: v5e:2x2
jax: 0.10.0
libtpu: 0.0.40
codegen_flags: <defaults>
</compile_context>

<pallas_src>
import jax
import jax.numpy as jnp
from jax.experimental import pallas as pl
from jax.experimental.pallas import tpu as pltpu

INPUTS_COUNT = 768
OUTPUTS_COUNT = 10

H0 = 1024          # l0 width
HG = 256           # l0B (gate) width
H01 = H0 + HG      # fused l0|l0B width = 1280 (multiple of 128)
H2 = 256           # l2 width
OUT_PAD = 128      # lane-dense padded output width


def crazy_kernel(x_ref,
                 w01_ref, b01_ref,     # fused l0|l0B: (768, 1280) bf16, (1, 1280) f32
                 w2_ref, b2_ref,       # l2: (1024, 256) bf16, (1, 256) f32
                 w4_ref, b4_ref,       # l4 padded: (256, 128) bf16, (1, 128) f32
                 o_ref):
    x = x_ref[...].astype(jnp.bfloat16)                               # (TM, 768)

    # Fused l0 | l0B: one MXU pass over x, split at lane-aligned column 1024.
    y = jnp.dot(x, w01_ref[...], preferred_element_type=jnp.float32)  # (TM, 1280) f32
    y = y + b01_ref[...]
    h = jnp.maximum(y[:, :H0], 0.0)                                   # (TM, 1024) ReLU
    g = jax.nn.sigmoid(y[:, H0:])                                     # (TM, 256) gate

    # l2 -> ReLU
    h2 = jnp.dot(h.astype(jnp.bfloat16), w2_ref[...],
                 preferred_element_type=jnp.float32) + b2_ref[...]    # (TM, 256)
    h2 = jnp.maximum(h2, 0.0)

    # gate and final (lane-dense padded) projection l4
    gated = h2 * (g - 0.5)                                            # (TM, 256) f32
    out = jnp.dot(gated.astype(jnp.bfloat16), w4_ref[...],
                  preferred_element_type=jnp.float32) + b4_ref[...]   # (TM, 128)
    o_ref[...] = out.astype(o_ref.dtype)


def crazy_model(x, params, *, tm=None):
    """x: (B, 768) float32. params: output of prepare_params()."""
    B = x.shape[0]
    TM = tm if tm is not None else (128 if B >= 128 else B)

    w01, b01 = params["w01"], params["b01"]
    w2, b2 = params["w2"], params["b2"]
    w4p, b4p = params["w4p"], params["b4p"]

    def const_spec(shape):
        return pl.BlockSpec(shape, lambda i: tuple(0 for _ in shape))

    flops = 2 * B * (INPUTS_COUNT * H01 + H0 * H2 + H2 * OUT_PAD)
    bytes_accessed = (
        2 * (w01.size + w2.size + w4p.size)          # bf16 weights
        + 4 * (b01.size + b2.size + b4p.size)        # f32 biases
        + 4 * x.size + 4 * B * OUT_PAD               # activations in/out
    )
    cost = pl.CostEstimate(flops=flops,
                           transcendentals=B * HG,   # sigmoid
                           bytes_accessed=bytes_accessed)

    out = pl.pallas_call(
        crazy_kernel,
        out_shape=jax.ShapeDtypeStruct((B, OUT_PAD), jnp.float32),
        grid=(pl.cdiv(B, TM),),
        in_specs=[
            pl.BlockSpec((TM, INPUTS_COUNT), lambda i: (i, 0)),   # x: tiled over batch
            const_spec(w01.shape), const_spec(b01.shape),         # weights: resident
            const_spec(w2.shape), const_spec(b2.shape),
            const_spec(w4p.shape), const_spec(b4p.shape),
        ],
        out_specs=pl.BlockSpec((TM, OUT_PAD), lambda i: (i, 0)),
        compiler_params=pltpu.CompilerParams(
            dimension_semantics=("parallel",),
            vmem_limit_bytes=16 << 20),
        cost_estimate=cost,
    )(x, w01, b01, w2, b2, w4p, b4p)

    return out[:, :OUTPUTS_COUNT]


def init_params(key):
    """Deterministic init mimicking torch.nn.Linear default (U(-1/sqrt(fan_in), +))."""
    def linear(key, fan_in, fan_out):
        kw, kb = jax.random.split(key)
        bound = 1.0 / jnp.sqrt(fan_in)
        w = jax.random.uniform(kw, (fan_in, fan_out), jnp.float32, -bound, bound)
        b = jax.random.uniform(kb, (1, fan_out), jnp.float32, -bound, bound)
        return w, b

    k0, k0b, k2, k4 = jax.random.split(key, 4)
    w0, b0 = linear(k0, INPUTS_COUNT, H0)
    w0b, b0b = linear(k0b, INPUTS_COUNT, HG)
    w2, b2 = linear(k2, H0, H2)
    w4, b4 = linear(k4, H2, OUTPUTS_COUNT)
    return {"w0": w0, "b0": b0, "w0b": w0b, "b0b": b0b,
            "w2": w2, "b2": b2, "w4": w4, "b4": b4}


def prepare_params(raw):
    """Fuse l0|l0B, pad l4 to 128 lanes, cast weights to bf16 (biases stay f32)."""
    w01 = jnp.concatenate([raw["w0"], raw["w0b"]], axis=1).astype(jnp.bfloat16)
    b01 = jnp.concatenate([raw["b0"], raw["b0b"]], axis=1)                 # (1, 1280) f32
    w4p = jnp.zeros((H2, OUT_PAD), jnp.float32).at[:, :OUTPUTS_COUNT].set(raw["w4"])
    b4p = jnp.zeros((1, OUT_PAD), jnp.float32).at[:, :OUTPUTS_COUNT].set(raw["b4"])
    return {
        "w01": w01, "b01": b01,
        "w2": raw["w2"].astype(jnp.bfloat16), "b2": raw["b2"],
        "w4p": w4p.astype(jnp.bfloat16), "b4p": b4p,
    }


def reference(x, raw):
    """Pure-JAX reference using the same bf16 weights / f32 accumulation."""
    f32 = jnp.float32
    bf16 = jnp.bfloat16
    xb = x.astype(bf16)
    h = jnp.maximum(
        jnp.dot(xb, raw["w0"].astype(bf16), preferred_element_type=f32) + raw["b0"], 0.0)
    g = jax.nn.sigmoid(
        jnp.dot(xb, raw["w0b"].astype(bf16), preferred_element_type=f32) + raw["b0b"])
    h2 = jnp.maximum(
        jnp.dot(h.astype(bf16), raw["w2"].astype(bf16), preferred_element_type=f32)
        + raw["b2"], 0.0)
    gated = (h2 * (g - 0.5)).astype(bf16)
    return jnp.dot(gated, raw["w4"].astype(bf16), preferred_element_type=f32) + raw["b4"]


if __name__ == "__main__":
    key = jax.random.PRNGKey(0)
    kx, kp = jax.random.split(key)

    B = 8
    x = jax.random.normal(kx, (B, INPUTS_COUNT), jnp.float32)
    raw_params = init_params(kp)
    params = prepare_params(raw_params)

    out = crazy_model(x, params)
    out = jax.block_until_ready(out)

    ref = reference(x, raw_params)
    assert out.shape == (B, OUTPUTS_COUNT)
    assert jnp.allclose(out, ref, atol=2e-2, rtol=2e-2), "mismatch vs reference"

    print("KERNEL_OK")
</pallas_src>

<mosaic_0001>
module attributes {stable_mosaic.version = 11 : i64} {
  func.func @crazy_kernel(%arg0: i32, %arg1: memref<8x768xf32, #tpu.memory_space<vmem>>, %arg2: memref<768x1280xbf16, #tpu.memory_space<vmem>>, %arg3: memref<1x1280xf32, #tpu.memory_space<vmem>>, %arg4: memref<1024x256xbf16, #tpu.memory_space<vmem>>, %arg5: memref<1x256xf32, #tpu.memory_space<vmem>>, %arg6: memref<256x128xbf16, #tpu.memory_space<vmem>>, %arg7: memref<1x128xf32, #tpu.memory_space<vmem>>, %arg8: memref<8x128xf32, #tpu.memory_space<vmem>>) attributes {dimension_semantics = [#tpu.dimension_semantics<parallel>], iteration_bounds = array<i64: 1>, scalar_prefetch = 0 : i64, scratch_operands = 0 : i64, tpu.core_type = #tpu.core_type<tc>, window_params = [{transform_indices = @transform_0, window_bounds = array<i64: 8, 768>}, {pipeline_mode = #tpu.pipeline_mode<synchronous>, transform_indices = @transform_1, window_bounds = array<i64: 768, 1280>}, {pipeline_mode = #tpu.pipeline_mode<synchronous>, transform_indices = @transform_2, window_bounds = array<i64: 1, 1280>}, {pipeline_mode = #tpu.pipeline_mode<synchronous>, transform_indices = @transform_3, window_bounds = array<i64: 1024, 256>}, {pipeline_mode = #tpu.pipeline_mode<synchronous>, transform_indices = @transform_4, window_bounds = array<i64: 1, 256>}, {pipeline_mode = #tpu.pipeline_mode<synchronous>, transform_indices = @transform_5, window_bounds = array<i64: 256, 128>}, {pipeline_mode = #tpu.pipeline_mode<synchronous>, transform_indices = @transform_6, window_bounds = array<i64: 1, 128>}, {transform_indices = @transform_7, window_bounds = array<i64: 8, 128>}]} {
    %c0 = arith.constant 0 : index
    %c0_0 = arith.constant 0 : index
    %0 = vector.load %arg1[%c0, %c0_0] : memref<8x768xf32, #tpu.memory_space<vmem>>, vector<8x768xf32>
    %1 = arith.truncf %0 : vector<8x768xf32> to vector<8x768xbf16>
    %c0_1 = arith.constant 0 : index
    %c0_2 = arith.constant 0 : index
    %2 = vector.load %arg2[%c0_1, %c0_2] : memref<768x1280xbf16, #tpu.memory_space<vmem>>, vector<768x1280xbf16>
    %cst = arith.constant dense<0.000000e+00> : vector<8x1280xf32>
    %3 = tpu.matmul %1, %2, %cst {dimension_numbers = #tpu.dot_dimension_numbers<[1], [0], [0], [1], [0, 0, 1, 1], [], []>} : vector<8x768xbf16>, vector<768x1280xbf16>, vector<8x1280xf32> -> vector<8x1280xf32>
    %c0_3 = arith.constant 0 : index
    %c0_4 = arith.constant 0 : index
    %4 = vector.load %arg3[%c0_3, %c0_4] : memref<1x1280xf32, #tpu.memory_space<vmem>>, vector<1x1280xf32>
    %5 = vector.broadcast %4 : vector<1x1280xf32> to vector<8x1280xf32>
    %6 = arith.addf %3, %5 : vector<8x1280xf32>
    %7 = vector.extract_strided_slice %6 {offsets = [0, 0], sizes = [8, 1024], strides = [1, 1]} : vector<8x1280xf32> to vector<8x1024xf32>
    %cst_5 = arith.constant 0.000000e+00 : f32
    %8 = vector.broadcast %cst_5 : f32 to vector<8x1024xf32>
    %9 = arith.maximumf %7, %8 : vector<8x1024xf32>
    %10 = vector.extract_strided_slice %6 {offsets = [0, 1024], sizes = [8, 256], strides = [1, 1]} : vector<8x1280xf32> to vector<8x256xf32>
    %11 = arith.negf %10 : vector<8x256xf32>
    %12 = math.exp %11 : vector<8x256xf32>
    %cst_6 = arith.constant 1.000000e+00 : f32
    %13 = vector.broadcast %cst_6 : f32 to vector<8x256xf32>
    %14 = arith.addf %13, %12 : vector<8x256xf32>
    %15 = arith.divf %13, %14 : vector<8x256xf32>
    %16 = arith.truncf %9 : vector<8x1024xf32> to vector<8x1024xbf16>
    %c0_7 = arith.constant 0 : index
    %c0_8 = arith.constant 0 : index
    %17 = vector.load %arg4[%c0_7, %c0_8] : memref<1024x256xbf16, #tpu.memory_space<vmem>>, vector<1024x256xbf16>
    %cst_9 = arith.constant dense<0.000000e+00> : vector<8x256xf32>
    %18 = tpu.matmul %16, %17, %cst_9 {dimension_numbers = #tpu.dot_dimension_numbers<[1], [0], [0], [1], [0, 0, 1, 1], [], []>} : vector<8x1024xbf16>, vector<1024x256xbf16>, vector<8x256xf32> -> vector<8x256xf32>
    %c0_10 = arith.constant 0 : index
    %c0_11 = arith.constant 0 : index
    %19 = vector.load %arg5[%c0_10, %c0_11] : memref<1x256xf32, #tpu.memory_space<vmem>>, vector<1x256xf32>
    %20 = vector.broadcast %19 : vector<1x256xf32> to vector<8x256xf32>
    %21 = arith.addf %18, %20 : vector<8x256xf32>
    %cst_12 = arith.constant 0.000000e+00 : f32
    %22 = vector.broadcast %cst_12 : f32 to vector<8x256xf32>
    %23 = arith.maximumf %21, %22 : vector<8x256xf32>
    %cst_13 = arith.constant 5.000000e-01 : f32
    %24 = vector.broadcast %cst_13 : f32 to vector<8x256xf32>
    %25 = arith.subf %15, %24 : vector<8x256xf32>
    %26 = arith.mulf %23, %25 : vector<8x256xf32>
    %27 = arith.truncf %26 : vector<8x256xf32> to vector<8x256xbf16>
    %c0_14 = arith.constant 0 : index
    %c0_15 = arith.constant 0 : index
    %28 = vector.load %arg6[%c0_14, %c0_15] : memref<256x128xbf16, #tpu.memory_space<vmem>>, vector<256x128xbf16>
    %cst_16 = arith.constant dense<0.000000e+00> : vector<8x128xf32>
    %29 = tpu.matmul %27, %28, %cst_16 {dimension_numbers = #tpu.dot_dimension_numbers<[1], [0], [0], [1], [0, 0, 1, 1], [], []>} : vector<8x256xbf16>, vector<256x128xbf16>, vector<8x128xf32> -> vector<8x128xf32>
    %c0_17 = arith.constant 0 : index
    %c0_18 = arith.constant 0 : index
    %30 = vector.load %arg7[%c0_17, %c0_18] : memref<1x128xf32, #tpu.memory_space<vmem>>, vector<1x128xf32>
    %31 = vector.broadcast %30 : vector<1x128xf32> to vector<8x128xf32>
    %32 = arith.addf %29, %31 : vector<8x128xf32>
    %c0_19 = arith.constant 0 : index
    %c0_20 = arith.constant 0 : index
    %33 = vector.load %arg8[%c0_19, %c0_20] : memref<8x128xf32, #tpu.memory_space<vmem>>, vector<8x128xf32>
    tpu.vector_store %arg8[%c0_19, %c0_20], %32 {strides = array<i32>} : memref<8x128xf32, #tpu.memory_space<vmem>>, vector<8x128xf32>,
    return
  }
  func.func @transform_0(%arg0: i32) -> (i32, i32) {
    %c0_i32 = arith.constant 0 : i32
    %c0_i32_0 = arith.constant 0 : i32
    return %arg0, %c0_i32 : i32, i32
  }
  func.func @transform_1(%arg0: i32) -> (i32, i32) {
    %c0_i32 = arith.constant 0 : i32
    %c0_i32_0 = arith.constant 0 : i32
    %c0_i32_1 = arith.constant 0 : i32
    return %c0_i32, %c0_i32_0 : i32, i32
  }
  func.func @transform_2(%arg0: i32) -> (i32, i32) {
    %c0_i32 = arith.constant 0 : i32
    %c0_i32_0 = arith.constant 0 : i32
    %c0_i32_1 = arith.constant 0 : i32
    return %c0_i32, %c0_i32_0 : i32, i32
  }
  func.func @transform_3(%arg0: i32) -> (i32, i32) {
    %c0_i32 = arith.constant 0 : i32
    %c0_i32_0 = arith.constant 0 : i32
    %c0_i32_1 = arith.constant 0 : i32
    return %c0_i32, %c0_i32_0 : i32, i32
  }
  func.func @transform_4(%arg0: i32) -> (i32, i32) {
    %c0_i32 = arith.constant 0 : i32
    %c0_i32_0 = arith.constant 0 : i32
    %c0_i32_1 = arith.constant 0 : i32
    return %c0_i32, %c0_i32_0 : i32, i32
  }
  func.func @transform_5(%arg0: i32) -> (i32, i32) {
    %c0_i32 = arith.constant 0 : i32
    %c0_i32_0 = arith.constant 0 : i32
    %c0_i32_1 = arith.constant 0 : i32
    return %c0_i32, %c0_i32_0 : i32, i32
  }
  func.func @transform_6(%arg0: i32) -> (i32, i32) {
    %c0_i32 = arith.constant 0 : i32
    %c0_i32_0 = arith.constant 0 : i32
    %c0_i32_1 = arith.constant 0 : i32
    return %c0_i32, %c0_i32_0 : i32, i32
  }
  func.func @transform_7(%arg0: i32) -> (i32, i32) {
    %c0_i32 = arith.constant 0 : i32
    %c0_i32_0 = arith.constant 0 : i32
    return %arg0, %c0_i32 : i32, i32
  }
}

</mosaic_0001>

<bundles_post_ra>
// kernel: tpu_custom_call.1
= control target key start
LH: loop header
LB: loop body
LE: loop exit
PB: predicated region body
PF: predicated region fallthrough
CT: control target
= control target key end

     0   :  { %12 = vsyncpa [#allocation3], 0  ;;  %s8662_s0 = inlined_call_operand.hbm [shape: f32[8,768], index: 0, kind: input, shape index: {}]   ;;  %s8663_s1 = inlined_call_operand.hbm [shape: bf16[768,1280], index: 1, kind: input, shape index: {}]   ;;  %s8664_s2 = inlined_call_operand.hbm [shape: f32[1,1280], index: 2, kind: input, shape index: {}]   ;;  %s8665_s3 = inlined_call_operand.hbm [shape: bf16[1024,256], index: 3, kind: input, shape index: {}]   ;;  %s8666_s4 = inlined_call_operand.hbm [shape: f32[1,256], index: 4, kind: input, shape index: {}]   ;;  %s8667_s5 = inlined_call_operand.hbm [shape: bf16[256,128], index: 5, kind: input, shape index: {}]   ;;  %s8668_s6 = inlined_call_operand.hbm [shape: f32[1,128], index: 6, kind: input, shape index: {}]   ;;  %s8669_s7 = inlined_call_operand.hbm [shape: f32[8,128], index: 7, kind: output, shape index: {}]  }
   0x1   :  { %13 = vsyncpa [#allocation6], 0 }
   0x2   :  { %14 = vsyncpa [#allocation9], 0 }
   0x3   :  { %15 = vsyncpa [#allocation12], 0  ;;  %s32_s26 = sshll.u32 %s8663_s1, 4  ;;  %s33_s26 = int_to_ptr.hbm [resolvable:$true] %s32_s26 }
   0x4   :  { %16 = vsyncpa [#allocation4], 0  ;;  %s8398_s27 = smov [#allocation5]   ;;  %s56_s8 = sshll.u32 %s8665_s3, 4  ;;  %s57_s8 = int_to_ptr.hbm [resolvable:$true] %s56_s8 }
   0x5   :  { %s34_s28 = sshll.u32 %s8398_s27, 4  ;;  %s8399_s9 = smov 640   ;;  %s35_s28 = int_to_ptr.vmem [resolvable:$true] %s34_s28 }
   0x6   :  { %s8400_s10 = smov 40   ;;  %s8401_s11 = smov [#allocation8]  }
   0x7   :  { %40 = dma.hbm_to_vmem [thread:$0]  %s33_s26, 61440, %s35_s28, [#allocation6], %s8399_s9, %s8399_s9, %s8400_s10  }
   0x8   :  { %s58_s12 = sshll.u32 %s8401_s11, 4  ;;  %s8402_s13 = smov 128   ;;  %s59_s12 = int_to_ptr.vmem [resolvable:$true] %s58_s12 }
   0x9   :  { %s8403_s14 = smov 8   ;;  %s80_s16 = sshll.u32 %s8667_s5, 4  ;;  %s81_s16 = int_to_ptr.hbm [resolvable:$true] %s80_s16 }
   0xa   :  { %64 = dma.hbm_to_vmem [thread:$0]  %s57_s8, 16384, %s59_s12, [#allocation9], %s8402_s13, %s8402_s13, %s8403_s14  }
   0xb   :  { %s8404_s17 = smov [#allocation11]   ;;  %s22_s20 = sshll.u32 %s8662_s0, 4  ;;  %s23_s20 = int_to_ptr.hbm [resolvable:$true] %s22_s20 }
   0xc   :  { %s82_s18 = sshll.u32 %s8404_s17, 4  ;;  %s8405_s21 = smov 64   ;;  %s83_s18 = int_to_ptr.vmem [resolvable:$true] %s82_s18 }
   0xd   :  { %s8406_s22 = smov 4   ;;  %s8407_s23 = smov [#allocation2]  }
   0xe   :  { %88 = dma.hbm_to_vmem [thread:$0]  %s81_s16, 2048, %s83_s18, [#allocation12], %s8405_s21, %s8405_s21, %s8406_s22  }
   0xf   :  { %s24_s24 = sshll.u32 %s8407_s23, 4  ;;  %s46_s27 = sshll.u32 %s8664_s2, 4  ;;  %s25_s24 = int_to_ptr.vmem [resolvable:$true] %s24_s24  ;;  %s47_s27 = int_to_ptr.hbm [resolvable:$true] %s46_s27 }
  0x10   :  { %27 = dma.hbm_to_vmem [thread:$0]  %s23_s20, 768, %s25_s24, [#allocation3]  }
  0x11   :  { %s70_s29 = sshll.u32 %s8666_s4, 4  ;;  %s8408_s30 = smov [#allocation7]   ;;  %s71_s29 = int_to_ptr.hbm [resolvable:$true] %s70_s29 }
  0x12   :  { %s48_s8 = sshll.u32 %s8408_s30, 4  ;;  %s8409_s0 = smov [#allocation10]   ;;  %s49_s8 = int_to_ptr.vmem [resolvable:$true] %s48_s8 }
  0x13   :  { %51 = dma.hbm_to_vmem [thread:$0]  %s47_s27, 160, %s49_s8, [#allocation6]  }
  0x14   :  { %s72_s9 = sshll.u32 %s8409_s0, 4  ;;  %s94_s12 = sshll.u32 %s8668_s6, 4  ;;  %s73_s9 = int_to_ptr.vmem [resolvable:$true] %s72_s9  ;;  %s95_s12 = int_to_ptr.hbm [resolvable:$true] %s94_s12 }
  0x15   :  { %75 = dma.hbm_to_vmem [thread:$0]  %s71_s29, 32, %s73_s9, [#allocation9]  }
  0x16   :  { %s8410_s2 = smov [#allocation13]  }
  0x17   :  { %s96_s13 = sshll.u32 %s8410_s2, 4  ;;  %s97_s13 = int_to_ptr.vmem [resolvable:$true] %s96_s13 }
  0x18   :  { %99 = dma.hbm_to_vmem [thread:$0]  %s95_s12, 16, %s97_s13, [#allocation12]  }
  0x19   :  { %8388 = dma.done.wait [#allocation3], 768  }
  0x1a   :  { %8389 = vsyncadd [#allocation3], 4294966528 }
  0x1b   :  { %8390 = dma.done.wait [#allocation6], 61600  }
  0x1c   :  { %8391 = vsyncadd [#allocation6], 4294905696 }
  0x1d   :  { %8392 = dma.done.wait [#allocation9], 16416  }
  0x1e   :  { %8393 = vsyncadd [#allocation9], 4294950880 }
  0x1f   :  { %8394 = dma.done.wait [#allocation12], 2064  }
  0x20   :  { %8395 = vsyncadd [#allocation12], 4294965232  ;;  %v5329_v0 = vld [vmem:[#allocation5 + $0x230] sm:$0xf]  ;;  %v7622_v1 = vld [vmem:[#allocation5 + $0x254] sm:$0xf0] }
  0x21   :  { %v5649_v2 = vld [vmem:[#allocation5 + $0x4b0] sm:$0xf]  ;;  %v5330_v3 = vor.u32 %v7622_v1, %v5329_v0  ;;  %v7702_v4 = vld [vmem:[#allocation5 + $0x4d4] sm:$0xf0]  ;;  %v5289_v11 = vld [vmem:[#allocation5 + $0x1e0] sm:$0xf] }
  0x22   :  { %v5969_v5 = vld [vmem:[#allocation5 + $0x730] sm:$0xf]  ;;  %v7782_v6 = vld [vmem:[#allocation5 + $0x754] sm:$0xf0]  ;;  %v5650_v7 = vor.u32 %v7702_v4, %v5649_v2  ;;  %v7612_v13 = vld [vmem:[#allocation5 + $0x204] sm:$0xf0] }
  0x23   :  { %v5970_v8 = vor.u32 %v7782_v6, %v5969_v5  ;;  %v6289_v9 = vld [vmem:[#allocation5 + $0x9b0] sm:$0xf]  ;;  %v7862_v10 = vld [vmem:[#allocation5 + $0x9d4] sm:$0xf0]  ;;  %3044 = vmatpush.bf16.msra.mxu0 %v5330_v3  ;;  %v5609_v14 = vld [vmem:[#allocation5 + $0x460] sm:$0xf]  ;;  %v5290_v16 = vor.u32 %v7612_v13, %v5289_v11 }
  0x24   :  { %v6290_v12 = vor.u32 %v7862_v10, %v6289_v9  ;;  %v7692_v15 = vld [vmem:[#allocation5 + $0x484] sm:$0xf0]  ;;  %3057 = vmatpush.bf16.msra.mxu1 %v5650_v7  ;;  %v5929_v18 = vld [vmem:[#allocation5 + $0x6e0] sm:$0xf]  ;;  %v5249_v23 = vld [vmem:[#allocation5 + $0x190] sm:$0xf] }
  0x25   :  { %3070 = vmatpush.bf16.msra.mxu2 %v5970_v8  ;;  %v5610_v17 = vor.u32 %v7692_v15, %v5609_v14  ;;  %v7772_v19 = vld [vmem:[#allocation5 + $0x704] sm:$0xf0]  ;;  %v6249_v20 = vld [vmem:[#allocation5 + $0x960] sm:$0xf]  ;;  %v7602_v24 = vld [vmem:[#allocation5 + $0x1b4] sm:$0xf0] }
  0x26   :  { %3083 = vmatpush.bf16.msra.mxu3 %v6290_v12  ;;  %v5930_v21 = vor.u32 %v7772_v19, %v5929_v18  ;;  %v7852_v22 = vld [vmem:[#allocation5 + $0x984] sm:$0xf0]  ;;  %v5569_v26 = vld [vmem:[#allocation5 + $0x410] sm:$0xf]  ;;  %v7682_v27 = vld [vmem:[#allocation5 + $0x434] sm:$0xf0]  ;;  %v5250_v29 = vor.u32 %v7602_v24, %v5249_v23 }
  0x27   :  { %v6250_v25 = vor.u32 %v7852_v22, %v6249_v20  ;;  %v5889_v28 = vld [vmem:[#allocation5 + $0x690] sm:$0xf]  ;;  %3045 = vmatpush.bf16.msra.mxu0 %v5290_v16  ;;  %v7762_v30 = vld [vmem:[#allocation5 + $0x6b4] sm:$0xf0]  ;;  %v5570_v33 = vor.u32 %v7682_v27, %v5569_v26  ;;  %v5209_v35 = vld [vmem:[#allocation5 + $0x140] sm:$0xf] }
  0x28   :  { %v6209_v31 = vld [vmem:[#allocation5 + $0x910] sm:$0xf]  ;;  %v7842_v32 = vld [vmem:[#allocation5 + $0x934] sm:$0xf0]  ;;  %3058 = vmatpush.bf16.msra.mxu1 %v5610_v17  ;;  %v5890_v34 = vor.u32 %v7762_v30, %v5889_v28  ;;  %v7592_v36 = vld [vmem:[#allocation5 + $0x164] sm:$0xf0] }
  0x29   :  { %3071 = vmatpush.bf16.msra.mxu2 %v5930_v21  ;;  %v5529_v37 = vld [vmem:[#allocation5 + $0x3c0] sm:$0xf]  ;;  %v6210_v38 = vor.u32 %v7842_v32, %v6209_v31  ;;  %v7672_v39 = vld [vmem:[#allocation5 + $0x3e4] sm:$0xf0]  ;;  %v5210_v44 = vor.u32 %v7592_v36, %v5209_v35  ;;  %v5169_v47 = vld [vmem:[#allocation5 + $0xf0] sm:$0xf] }
  0x2a   :  { %3084 = vmatpush.bf16.msra.mxu3 %v6250_v25  ;;  %v5849_v40 = vld [vmem:[#allocation5 + $0x640] sm:$0xf]  ;;  %v7752_v41 = vld [vmem:[#allocation5 + $0x664] sm:$0xf0]  ;;  %v5530_v45 = vor.u32 %v7672_v39, %v5529_v37  ;;  %v7582_v48 = vld [vmem:[#allocation5 + $0x114] sm:$0xf0] }
  0x2b   :  { %v6169_v42 = vld [vmem:[#allocation5 + $0x8c0] sm:$0xf]  ;;  %v7832_v43 = vld [vmem:[#allocation5 + $0x8e4] sm:$0xf0]  ;;  %3046 = vmatpush.bf16.msra.mxu0 %v5250_v29  ;;  %v5850_v46 = vor.u32 %v7752_v41, %v5849_v40  ;;  %v5489_v49 = vld [vmem:[#allocation5 + $0x370] sm:$0xf]  ;;  %v5170_v56 = vor.u32 %v7582_v48, %v5169_v47 }
  0x2c   :  { %3059 = vmatpush.bf16.msra.mxu1 %v5570_v33  ;;  %v6170_v50 = vor.u32 %v7832_v43, %v6169_v42  ;;  %v7662_v51 = vld [vmem:[#allocation5 + $0x394] sm:$0xf0]  ;;  %v5809_v52 = vld [vmem:[#allocation5 + $0x5f0] sm:$0xf]  ;;  %v5129_v59 = vld [vmem:[#allocation5 + $0xa0] sm:$0xf] }
  0x2d   :  { %3072 = vmatpush.bf16.msra.mxu2 %v5890_v34  ;;  %v7742_v53 = vld [vmem:[#allocation5 + $0x614] sm:$0xf0]  ;;  %v6129_v54 = vld [vmem:[#allocation5 + $0x870] sm:$0xf]  ;;  %v5490_v57 = vor.u32 %v7662_v51, %v5489_v49  ;;  %v7572_v60 = vld [vmem:[#allocation5 + $0xc4] sm:$0xf0] }
  0x2e   :  { %3085 = vmatpush.bf16.msra.mxu3 %v6210_v38  ;;  %v7822_v55 = vld [vmem:[#allocation5 + $0x894] sm:$0xf0]  ;;  %v5810_v58 = vor.u32 %v7742_v53, %v5809_v52  ;;  %v5449_v61 = vld [vmem:[#allocation5 + $0x320] sm:$0xf]  ;;  %v7652_v63 = vld [vmem:[#allocation5 + $0x344] sm:$0xf0]  ;;  %v5130_v4 = vor.u32 %v7572_v60, %v5129_v59 }
  0x2f   :  { %3047 = vmatpush.bf16.msra.mxu0 %v5210_v44  ;;  %v6130_v62 = vor.u32 %v7822_v55, %v6129_v54  ;;  %v5769_v0 = vld [vmem:[#allocation5 + $0x5a0] sm:$0xf]  ;;  %v7732_v1 = vld [vmem:[#allocation5 + $0x5c4] sm:$0xf0]  ;;  %v5450_v5 = vor.u32 %v7652_v63, %v5449_v61  ;;  %v5089_v7 = vld [vmem:[#allocation5 + $0x50] sm:$0xf] }
  0x30   :  { %3060 = vmatpush.bf16.msra.mxu1 %v5530_v45  ;;  %v6089_v2 = vld [vmem:[#allocation5 + $0x820] sm:$0xf]  ;;  %v7812_v3 = vld [vmem:[#allocation5 + $0x844] sm:$0xf0]  ;;  %v5770_v6 = vor.u32 %v7732_v1, %v5769_v0  ;;  %v7562_v8 = vld [vmem:[#allocation5 + $0x74] sm:$0xf0] }
  0x31   :  { %3073 = vmatpush.bf16.msra.mxu2 %v5850_v46  ;;  %v5409_v9 = vld [vmem:[#allocation5 + $0x2d0] sm:$0xf]  ;;  %v6090_v10 = vor.u32 %v7812_v3, %v6089_v2  ;;  %v7642_v11 = vld [vmem:[#allocation5 + $0x2f4] sm:$0xf0]  ;;  %v5090_v16 = vor.u32 %v7562_v8, %v5089_v7  ;;  %v5049_v17 = vld [vmem:[#allocation5] sm:$0xf] }
  0x32   :  { %3086 = vmatpush.bf16.msra.mxu3 %v6170_v50  ;;  %v5729_v12 = vld [vmem:[#allocation5 + $0x550] sm:$0xf]  ;;  %v7722_v13 = vld [vmem:[#allocation5 + $0x574] sm:$0xf0]  ;;  %v7552_v18 = vld [vmem:[#allocation5 + $0x24] sm:$0xf0]  ;;  %v5410_v19 = vor.u32 %v7642_v11, %v5409_v9 }
  0x33   :  { %3048 = vmatpush.bf16.msra.mxu0 %v5170_v56  ;;  %v6049_v14 = vld [vmem:[#allocation5 + $0x7d0] sm:$0xf]  ;;  %v7802_v15 = vld [vmem:[#allocation5 + $0x7f4] sm:$0xf0]  ;;  %v5730_v20 = vor.u32 %v7722_v13, %v5729_v12  ;;  %v5369_v21 = vld [vmem:[#allocation5 + $0x280] sm:$0xf]  ;;  %v5050_v31 = vor.u32 %v7552_v18, %v5049_v17 }
  0x34   :  { %3061 = vmatpush.bf16.msra.mxu1 %v5490_v57  ;;  %v7632_v22 = vld [vmem:[#allocation5 + $0x2a4] sm:$0xf0]  ;;  %v5689_v23 = vld [vmem:[#allocation5 + $0x500] sm:$0xf]  ;;  %v6050_v24 = vor.u32 %v7802_v15, %v6049_v14  ;;  %v6609_v28 = vld [vmem:[#allocation5 + $0xc30] sm:$0xf] }
  0x35   :  { %3074 = vmatpush.bf16.msra.mxu2 %v5810_v58  ;;  %v7712_v25 = vld [vmem:[#allocation5 + $0x524] sm:$0xf0]  ;;  %v6009_v26 = vld [vmem:[#allocation5 + $0x780] sm:$0xf]  ;;  %v7942_v29 = vld [vmem:[#allocation5 + $0xc54] sm:$0xf0]  ;;  %v5370_v35 = vor.u32 %v7632_v22, %v5369_v21 }
  0x36   :  { %3087 = vmatpush.bf16.msra.mxu3 %v6130_v62  ;;  %v7792_v27 = vld [vmem:[#allocation5 + $0x7a4] sm:$0xf0]  ;;  %v6929_v30 = vld [vmem:[#allocation5 + $0xeb0] sm:$0xf]  ;;  %v8022_v32 = vld [vmem:[#allocation5 + $0xed4] sm:$0xf0]  ;;  %v5690_v36 = vor.u32 %v7712_v25, %v5689_v23  ;;  %v6610_v40 = vor.u32 %v7942_v29, %v6609_v28 }
  0x37   :  { %3049 = vmatpush.bf16.msra.mxu0 %v5130_v4  ;;  %v7617_v33 = vld [vmem:[#allocation5 + $0x234] sm:$0xf]  ;;  %v5331_v34 = vld [vmem:[#allocation5 + $0x258] sm:$0xf0]  ;;  %v6010_v39 = vor.u32 %v7792_v27, %v6009_v26  ;;  %v6930_v41 = vor.u32 %v8022_v32, %v6929_v30  ;;  %v6569_v43 = vld [vmem:[#allocation5 + $0xbe0] sm:$0xf] }
  0x38   :  { %3062 = vmatpush.bf16.msra.mxu1 %v5450_v5  ;;  %v7697_v37 = vld [vmem:[#allocation5 + $0x4b4] sm:$0xf]  ;;  %v5651_v38 = vld [vmem:[#allocation5 + $0x4d8] sm:$0xf0]  ;;  %v5334_v42 = vor.u32 %v7617_v33, %v5331_v34  ;;  %v7932_v44 = vld [vmem:[#allocation5 + $0xc04] sm:$0xf0] }
  0x39   :  { %3075 = vmatpush.bf16.msra.mxu2 %v5770_v6  ;;  %v6889_v45 = vld [vmem:[#allocation5 + $0xe60] sm:$0xf]  ;;  %v5654_v46 = vor.u32 %v7697_v37, %v5651_v38  ;;  %v8012_v47 = vld [vmem:[#allocation5 + $0xe84] sm:$0xf0]  ;;  %v7607_v48 = vld [vmem:[#allocation5 + $0x1e4] sm:$0xf]  ;;  %v6570_v52 = vor.u32 %v7932_v44, %v6569_v43 }
  0x3a   :  { %3088 = vmatpush.bf16.msra.mxu3 %v6090_v10  ;;  %v5291_v49 = vld [vmem:[#allocation5 + $0x208] sm:$0xf0]  ;;  %v7687_v50 = vld [vmem:[#allocation5 + $0x464] sm:$0xf]  ;;  %v6529_v53 = vld [vmem:[#allocation5 + $0xb90] sm:$0xf]  ;;  %v6890_v54 = vor.u32 %v8012_v47, %v6889_v45 }
  0x3b   :  { %3050 = vmatpush.bf16.msra.mxu0 %v5090_v16  ;;  %v5611_v51 = vld [vmem:[#allocation5 + $0x488] sm:$0xf0]  ;;  %v5294_v55 = vor.u32 %v7607_v48, %v5291_v49  ;;  %v7922_v56 = vld [vmem:[#allocation5 + $0xbb4] sm:$0xf0]  ;;  %v6849_v57 = vld [vmem:[#allocation5 + $0xe10] sm:$0xf] }
  0x3c   :  { %3063 = vmatpush.bf16.msra.mxu1 %v5410_v19  ;;  %v8002_v58 = vld [vmem:[#allocation5 + $0xe34] sm:$0xf0]  ;;  %v5614_v59 = vor.u32 %v7687_v50, %v5611_v51  ;;  %v7597_v60 = vld [vmem:[#allocation5 + $0x194] sm:$0xf]  ;;  %v5251_v61 = vld [vmem:[#allocation5 + $0x1b8] sm:$0xf0]  ;;  %v6530_v0 = vor.u32 %v7922_v56, %v6529_v53 }
  0x3d   :  { %3076 = vmatpush.bf16.msra.mxu2 %v5730_v20  ;;  %v7677_v62 = vld [vmem:[#allocation5 + $0x414] sm:$0xf]  ;;  %v5571_v63 = vld [vmem:[#allocation5 + $0x438] sm:$0xf0]  ;;  %v6850_v1 = vor.u32 %v8002_v58, %v6849_v57  ;;  %v6489_v2 = vld [vmem:[#allocation5 + $0xb40] sm:$0xf]  ;;  %v5254_v5 = vor.u32 %v7597_v60, %v5251_v61 }
  0x3e   :  { %3089 = vmatpush.bf16.msra.mxu3 %v6050_v24  ;;  %v130_v3 = vld [vmem:[#allocation2 + $0x10] sm:$0xff]  ;;  %v128_v4 = vld [vmem:[#allocation2] sm:$0xff]  ;;  %v7912_v6 = vld [vmem:[#allocation5 + $0xb64] sm:$0xf0]  ;;  %v5574_v11 = vor.u32 %v7677_v62, %v5571_v63  ;;  %s8411_s4 = smov [#allocation14]   ;;  %s5034_s15 = sshll.u32 %s8669_s7, 4  ;;  %s5035_s15 = int_to_ptr.hbm [resolvable:$true] %s5034_s15 }
  0x3f   :  { %3051 = vmatpush.bf16.msra.mxu0 %v5050_v31  ;;  %v6809_v7 = vld [vmem:[#allocation5 + $0xdc0] sm:$0xf]  ;;  %v8473_v8 = vpack.c.bf16 %v130_v3, %v130_v3  ;;  %v8475_v9 = vpack.c.bf16 %v128_v4, %v128_v4  ;;  %v131_v10 = vld [vmem:[#allocation2 + $0x18] sm:$0xff]  ;;  %v7587_v13 = vld [vmem:[#allocation5 + $0x144] sm:$0xf]  ;;  %v6490_v18 = vor.u32 %v7912_v6, %v6489_v2  ;;  %s5032_s6 = sshll.u32 %s8411_s4, 4  ;;  %s5033_s6 = int_to_ptr.vmem [resolvable:$true] %s5032_s6 }
  0x40   :  { %3064 = vmatpush.bf16.msra.mxu1 %v5370_v35  ;;  %v7992_v12 = vld [vmem:[#allocation5 + $0xde4] sm:$0xf0]  ;;  %v5211_v14 = vld [vmem:[#allocation5 + $0x168] sm:$0xf0]  ;;  %v8477_v15 = vpack.c.bf16 %v131_v10, %v131_v10  ;;  %v7667_v16 = vld [vmem:[#allocation5 + $0x3c4] sm:$0xf] }
  0x41   :  { %3077 = vmatpush.bf16.msra.mxu2 %v5690_v36  ;;  %v5531_v17 = vld [vmem:[#allocation5 + $0x3e8] sm:$0xf0]  ;;  %v129_v19 = vld [vmem:[#allocation2 + $0x8] sm:$0xff]  ;;  %v6810_v20 = vor.u32 %v7992_v12, %v6809_v7  ;;  %v5214_v21 = vor.u32 %v7587_v13, %v5211_v14  ;;  %v6449_v22 = vld [vmem:[#allocation5 + $0xaf0] sm:$0xf] }
  0x42   :  { %3090 = vmatpush.bf16.msra.mxu3 %v6010_v39  ;;  %3052 = vmatmul.bf16.vlgmr.msra.gmra.mxu0 %v8475_v9  ;;  %v7902_v23 = vld [vmem:[#allocation5 + $0xb14] sm:$0xf0]  ;;  %v6769_v24 = vld [vmem:[#allocation5 + $0xd70] sm:$0xf]  ;;  %v8482_v25 = vpack.c.bf16 %v129_v19, %v129_v19  ;;  %v5534_v26 = vor.u32 %v7667_v16, %v5531_v17  ;;  %v7577_v28 = vld [vmem:[#allocation5 + $0xf4] sm:$0xf] }
  0x43   :  { %3096 = vmatpush.bf16.msrb.mxu0 %v6610_v40  ;;  %v7982_v27 = vld [vmem:[#allocation5 + $0xd94] sm:$0xf0]  ;;  %v5171_v29 = vld [vmem:[#allocation5 + $0x118] sm:$0xf0]  ;;  %v7657_v30 = vld [vmem:[#allocation5 + $0x374] sm:$0xf]  ;;  %v6450_v32 = vor.u32 %v7902_v23, %v6449_v22 }
  0x44   :  { %3109 = vmatpush.bf16.msrb.mxu1 %v6930_v41  ;;  %3078 = vmatmul.bf16.vlgmr.msra.gmra.mxu2 %v8473_v8  ;;  %v5491_v31 = vld [vmem:[#allocation5 + $0x398] sm:$0xf0]  ;;  %v6770_v33 = vor.u32 %v7982_v27, %v6769_v24  ;;  %v5174_v34 = vor.u32 %v7577_v28, %v5171_v29  ;;  %v6409_v35 = vld [vmem:[#allocation5 + $0xaa0] sm:$0xf]  ;;  %v7892_v36 = vld [vmem:[#allocation5 + $0xac4] sm:$0xf0] }
  0x45   :  { %3122 = vmatpush.bf16.msrb.mxu2 %v5334_v42  ;;  %3091 = vmatmul.bf16.vlgmr.msra.gmra.mxu3 %v8477_v15  ;;  %v6729_v37 = vld [vmem:[#allocation5 + $0xd20] sm:$0xf]  ;;  %v5494_v38 = vor.u32 %v7657_v30, %v5491_v31  ;;  %v7972_v39 = vld [vmem:[#allocation5 + $0xd44] sm:$0xf0]  ;;  %v7567_v40 = vld [vmem:[#allocation5 + $0xa4] sm:$0xf]  ;;  %v6410_v44 = vor.u32 %v7892_v36, %v6409_v35 }
  0x46   :  { %3135 = vmatpush.bf16.msrb.mxu3 %v5654_v46  ;;  %3065 = vmatmul.bf16.vlgmr.msra.gmra.mxu1 %v8482_v25  ;;  %v5131_v41 = vld [vmem:[#allocation5 + $0xc8] sm:$0xf0]  ;;  %v7647_v42 = vld [vmem:[#allocation5 + $0x324] sm:$0xf]  ;;  %v6730_v45 = vor.u32 %v7972_v39, %v6729_v37  ;;  %v6369_v47 = vld [vmem:[#allocation5 + $0xa50] sm:$0xf] }
  0x47   :  { %3097 = vmatpush.bf16.msrb.mxu0 %v6570_v52  ;;  %v5451_v43 = vld [vmem:[#allocation5 + $0x348] sm:$0xf0]  ;;  %v5134_v46 = vor.u32 %v7567_v40, %v5131_v41  ;;  %v7882_v48 = vld [vmem:[#allocation5 + $0xa74] sm:$0xf0]  ;;  %v6689_v49 = vld [vmem:[#allocation5 + $0xcd0] sm:$0xf] }
  0x48   :  { %3110 = vmatpush.bf16.msrb.mxu1 %v6890_v54  ;;  %v5454_v50 = vor.u32 %v7647_v42, %v5451_v43  ;;  %v7962_v51 = vld [vmem:[#allocation5 + $0xcf4] sm:$0xf0]  ;;  %v7557_v52 = vld [vmem:[#allocation5 + $0x54] sm:$0xf]  ;;  %v5091_v53 = vld [vmem:[#allocation5 + $0x78] sm:$0xf0]  ;;  %v6370_v56 = vor.u32 %v7882_v48, %v6369_v47 }
  0x49   :  { %3123 = vmatpush.bf16.msrb.mxu2 %v5294_v55  ;;  %v7637_v54 = vld [vmem:[#allocation5 + $0x2d4] sm:$0xf]  ;;  %v5411_v55 = vld [vmem:[#allocation5 + $0x2f8] sm:$0xf0]  ;;  %v6329_v57 = vld [vmem:[#allocation5 + $0xa00] sm:$0xf]  ;;  %v5094_v60 = vor.u32 %v7557_v52, %v5091_v53 }
  0x4a   :  { %3136 = vmatpush.bf16.msrb.mxu3 %v5614_v59  ;;  %v7872_v58 = vld [vmem:[#allocation5 + $0xa24] sm:$0xf0]  ;;  %v6690_v59 = vor.u32 %v7962_v51, %v6689_v49  ;;  %v6649_v61 = vld [vmem:[#allocation5 + $0xc80] sm:$0xf]  ;;  %v7547_v63 = vld [vmem:[#allocation5 + $0x4] sm:$0xf] }
  0x4b   :  { %3098 = vmatpush.bf16.msrb.mxu0 %v6530_v0  ;;  %v7952_v62 = vld [vmem:[#allocation5 + $0xca4] sm:$0xf0]  ;;  %v5414_v0 = vor.u32 %v7637_v54, %v5411_v55  ;;  %v7627_v2 = vld [vmem:[#allocation5 + $0x284] sm:$0xf]  ;;  %v5371_v3 = vld [vmem:[#allocation5 + $0x2a8] sm:$0xf0]  ;;  %v6330_v7 = vor.u32 %v7872_v58, %v6329_v57 }
  0x4c   :  { %3111 = vmatpush.bf16.msrb.mxu1 %v6850_v1  ;;  %v5051_v1 = vld [vmem:[#allocation5 + $0x28] sm:$0xf0]  ;;  %v7777_v4 = vld [vmem:[#allocation5 + $0x734] sm:$0xf]  ;;  %v6291_v10 = vld [vmem:[#allocation5 + $0x9d8] sm:$0xf0]  ;;  %v6650_v13 = vor.u32 %v7952_v62, %v6649_v61  ;;  %v5374_v19 = vor.u32 %v7627_v2, %v5371_v3 }
  0x4d   :  { %3124 = vmatpush.bf16.msrb.mxu2 %v5254_v5  ;;  %v5971_v5 = vld [vmem:[#allocation5 + $0x758] sm:$0xf0]  ;;  %v7857_v6 = vld [vmem:[#allocation5 + $0x9b4] sm:$0xf]  ;;  %v5054_v14 = vor.u32 %v7547_v63, %v5051_v1  ;;  %v7767_v24 = vld [vmem:[#allocation5 + $0x6e4] sm:$0xf] }
  0x4e   :  { %3137 = vmatpush.bf16.msrb.mxu3 %v5574_v11  ;;  %v7937_v11 = vld [vmem:[#allocation5 + $0xc34] sm:$0xf]  ;;  %v6611_v12 = vld [vmem:[#allocation5 + $0xc58] sm:$0xf0]  ;;  %v6294_v22 = vor.u32 %v7857_v6, %v6291_v10  ;;  %v7847_v27 = vld [vmem:[#allocation5 + $0x964] sm:$0xf] }
  0x4f   :  { %3099 = vmatpush.bf16.msrb.mxu0 %v6490_v18  ;;  %v8017_v16 = vld [vmem:[#allocation5 + $0xeb4] sm:$0xf]  ;;  %v6931_v17 = vld [vmem:[#allocation5 + $0xed8] sm:$0xf0]  ;;  %v6614_v23 = vor.u32 %v7937_v11, %v6611_v12  ;;  %v6251_v29 = vld [vmem:[#allocation5 + $0x988] sm:$0xf0] }
  0x50   :  { %3112 = vmatpush.bf16.msrb.mxu1 %v6810_v20  ;;  %v132_v18 = vld [vmem:[#allocation2 + $0x20] sm:$0xff]  ;;  %v5974_v20 = vor.u32 %v7777_v4, %v5971_v5  ;;  %v6934_v28 = vor.u32 %v8017_v16, %v6931_v17  ;;  %v7927_v30 = vld [vmem:[#allocation5 + $0xbe4] sm:$0xf]  ;;  %v6571_v31 = vld [vmem:[#allocation5 + $0xc08] sm:$0xf0]  ;;  %v6254_v37 = vor.u32 %v7847_v27, %v6251_v29 }
  0x51   :  { %3125 = vmatpush.bf16.msrb.mxu2 %v5214_v21  ;;  %v133_v21 = vld [vmem:[#allocation2 + $0x28] sm:$0xff]  ;;  %v7757_v39 = vld [vmem:[#allocation5 + $0x694] sm:$0xf]  ;;  %v7747_v51 = vld [vmem:[#allocation5 + $0x644] sm:$0xf] }
  0x52   :  { %3138 = vmatpush.bf16.msrb.mxu3 %v5534_v26  ;;  %v5931_v26 = vld [vmem:[#allocation5 + $0x708] sm:$0xf0]  ;;  %v8487_v35 = vpack.c.bf16 %v133_v21, %v133_v21  ;;  %v5891_v40 = vld [vmem:[#allocation5 + $0x6b8] sm:$0xf0]  ;;  %v7837_v41 = vld [vmem:[#allocation5 + $0x914] sm:$0xf] }
  0x53   :  { %3100 = vmatpush.bf16.msrb.mxu0 %v6450_v32  ;;  %v8485_v32 = vpack.c.bf16 %v132_v18, %v132_v18  ;;  %v5934_v36 = vor.u32 %v7767_v24, %v5931_v26  ;;  %v6211_v43 = vld [vmem:[#allocation5 + $0x938] sm:$0xf0]  ;;  %v5894_v48 = vor.u32 %v7757_v39, %v5891_v40  ;;  %v5851_v52 = vld [vmem:[#allocation5 + $0x668] sm:$0xf0]  ;;  %v7827_v53 = vld [vmem:[#allocation5 + $0x8c4] sm:$0xf] }
  0x54   :  { %3113 = vmatpush.bf16.msrb.mxu1 %v6770_v33  ;;  %v8007_v33 = vld [vmem:[#allocation5 + $0xe64] sm:$0xf]  ;;  %v6851_v47 = vld [vmem:[#allocation5 + $0xe38] sm:$0xf0]  ;;  %v6214_v49 = vor.u32 %v7837_v41, %v6211_v43  ;;  %v6171_v55 = vld [vmem:[#allocation5 + $0x8e8] sm:$0xf0] }
  0x55   :  { %3126 = vmatpush.bf16.msrb.mxu2 %v5174_v34  ;;  %v6891_v34 = vld [vmem:[#allocation5 + $0xe88] sm:$0xf0]  ;;  %v7987_v58 = vld [vmem:[#allocation5 + $0xdc4] sm:$0xf]  ;;  %v6174_v61 = vor.u32 %v7827_v53, %v6171_v55  ;;  %v7737_v63 = vld [vmem:[#allocation5 + $0x5f4] sm:$0xf] }
  0x56   :  { %3139 = vmatpush.bf16.msrb.mxu3 %v5494_v38  ;;  %v6574_v38 = vor.u32 %v7927_v30, %v6571_v31  ;;  %v6894_v42 = vor.u32 %v8007_v33, %v6891_v34  ;;  %v6491_v57 = vld [vmem:[#allocation5 + $0xb68] sm:$0xf0]  ;;  %v7817_v1 = vld [vmem:[#allocation5 + $0x874] sm:$0xf]  ;;  %v6131_v3 = vld [vmem:[#allocation5 + $0x898] sm:$0xf0] }
  0x57   :  { %3101 = vmatpush.bf16.msrb.mxu0 %v6410_v44  ;;  %v7917_v44 = vld [vmem:[#allocation5 + $0xb94] sm:$0xf]  ;;  %v6451_v5 = vld [vmem:[#allocation5 + $0xb18] sm:$0xf0]  ;;  %v6134_v11 = vor.u32 %v7817_v1, %v6131_v3  ;;  %v7807_v16 = vld [vmem:[#allocation5 + $0x824] sm:$0xf] }
  0x58   :  { %3114 = vmatpush.bf16.msrb.mxu1 %v6730_v45  ;;  %v6531_v45 = vld [vmem:[#allocation5 + $0xbb8] sm:$0xf0]  ;;  %v7897_v4 = vld [vmem:[#allocation5 + $0xaf4] sm:$0xf]  ;;  %v6091_v18 = vld [vmem:[#allocation5 + $0x848] sm:$0xf0] }
  0x59   :  { %3127 = vmatpush.bf16.msrb.mxu2 %v5134_v46  ;;  %v7997_v46 = vld [vmem:[#allocation5 + $0xe14] sm:$0xf]  ;;  %v6454_v12 = vor.u32 %v7897_v4, %v6451_v5  ;;  %v7967_v21 = vld [vmem:[#allocation5 + $0xd24] sm:$0xf]  ;;  %v6094_v24 = vor.u32 %v7807_v16, %v6091_v18  ;;  %v6051_v31 = vld [vmem:[#allocation5 + $0x7f8] sm:$0xf0] }
  0x5a   :  { %3140 = vmatpush.bf16.msrb.mxu3 %v5454_v50  ;;  %v6534_v50 = vor.u32 %v7917_v44, %v6531_v45  ;;  %v6854_v54 = vor.u32 %v7997_v46, %v6851_v47  ;;  %v7977_v6 = vld [vmem:[#allocation5 + $0xd74] sm:$0xf]  ;;  %v6371_v34 = vld [vmem:[#allocation5 + $0xa78] sm:$0xf0]  ;;  %v7707_v39 = vld [vmem:[#allocation5 + $0x504] sm:$0xf] }
  0x5b   :  { %3102 = vmatpush.bf16.msrb.mxu0 %v6370_v56  ;;  %v7907_v56 = vld [vmem:[#allocation5 + $0xb44] sm:$0xf]  ;;  %v7717_v27 = vld [vmem:[#allocation5 + $0x554] sm:$0xf]  ;;  %v5691_v40 = vld [vmem:[#allocation5 + $0x528] sm:$0xf0] }
  0x5c   :  { %3115 = vmatpush.bf16.msrb.mxu1 %v6690_v59  ;;  %v6811_v59 = vld [vmem:[#allocation5 + $0xde8] sm:$0xf0]  ;;  %v6494_v62 = vor.u32 %v7907_v56, %v6491_v57  ;;  %v7797_v29 = vld [vmem:[#allocation5 + $0x7d4] sm:$0xf]  ;;  %v7787_v43 = vld [vmem:[#allocation5 + $0x784] sm:$0xf]  ;;  %v5694_v53 = vor.u32 %v7707_v39, %v5691_v40 }
  0x5d   :  { %3128 = vmatpush.bf16.msrb.mxu2 %v5094_v60  ;;  %v5854_v60 = vor.u32 %v7747_v51, %v5851_v52  ;;  %v6814_v2 = vor.u32 %v7987_v58, %v6811_v59  ;;  %v7877_v33 = vld [vmem:[#allocation5 + $0xa54] sm:$0xf]  ;;  %v6054_v41 = vor.u32 %v7797_v29, %v6051_v31  ;;  %v6011_v44 = vld [vmem:[#allocation5 + $0x7a8] sm:$0xf0]  ;;  %v7867_v45 = vld [vmem:[#allocation5 + $0xa04] sm:$0xf] }
  0x5e   :  { %3141 = vmatpush.bf16.msrb.mxu3 %v5414_v0  ;;  %v5811_v0 = vld [vmem:[#allocation5 + $0x618] sm:$0xf0]  ;;  %v6331_v47 = vld [vmem:[#allocation5 + $0xa28] sm:$0xf0]  ;;  %v7623_v51 = vld [vmem:[#allocation5 + $0x25c] sm:$0xf0]  ;;  %v6014_v57 = vor.u32 %v7787_v43, %v6011_v44 }
  0x5f   :  { %3103 = vmatpush.bf16.msrb.mxu0 %v6330_v7  ;;  %v6771_v7 = vld [vmem:[#allocation5 + $0xd98] sm:$0xf0]  ;;  %v5814_v10 = vor.u32 %v7737_v63, %v5811_v0  ;;  %v5657_v52 = vld [vmem:[#allocation5 + $0x4b8] sm:$0xf]  ;;  %v7783_v56 = vld [vmem:[#allocation5 + $0x75c] sm:$0xf0]  ;;  %v6334_v58 = vor.u32 %v7867_v45, %v6331_v47 }
  0x60   :  { %3116 = vmatpush.bf16.msrb.mxu1 %v6650_v13  ;;  %v7727_v13 = vld [vmem:[#allocation5 + $0x5a4] sm:$0xf]  ;;  %v6774_v17 = vor.u32 %v7977_v6, %v6771_v7  ;;  %v5977_v55 = vld [vmem:[#allocation5 + $0x738] sm:$0xf]  ;;  %v5297_v1 = vld [vmem:[#allocation5 + $0x1e8] sm:$0xf] }
  0x61   :  { %3129 = vmatpush.bf16.msrb.mxu2 %v5054_v14  ;;  %v5771_v14 = vld [vmem:[#allocation5 + $0x5c8] sm:$0xf0]  ;;  %v6297_v59 = vld [vmem:[#allocation5 + $0x9b8] sm:$0xf]  ;;  %v5978_v0 = vor.u32 %v7783_v56, %v5977_v55  ;;  %v5617_v3 = vld [vmem:[#allocation5 + $0x468] sm:$0xf] }
  0x62   :  { %3142 = vmatpush.bf16.msrb.mxu3 %v5374_v19  ;;  %3104 = vmatmul.bf16.vlgmr.msrb.gmra.mxu0 %v8485_v32  ;;  %v7887_v19 = vld [vmem:[#allocation5 + $0xaa4] sm:$0xf]  ;;  %v7693_v5 = vld [vmem:[#allocation5 + $0x48c] sm:$0xf0]  ;;  %v5937_v6 = vld [vmem:[#allocation5 + $0x6e8] sm:$0xf] }
  0x63   :  { %3148 = vmatpush.bf16.msra.mxu0 %v5974_v20  ;;  %3117 = vmatmul.bf16.vlgmr.msrb.gmra.mxu1 %v8487_v35  ;;  %v6411_v20 = vld [vmem:[#allocation5 + $0xac8] sm:$0xf0]  ;;  %v7773_v7 = vld [vmem:[#allocation5 + $0x70c] sm:$0xf0]  ;;  %v5257_v16 = vld [vmem:[#allocation5 + $0x198] sm:$0xf] }
  0x64   :  { %3161 = vmatpush.bf16.msra.mxu1 %v6294_v22  ;;  %3130 = vmatmul.bf16.vlgmr.msrb.gmra.mxu2 %v8475_v9  ;;  %v6731_v22 = vld [vmem:[#allocation5 + $0xd48] sm:$0xf0]  ;;  %v6414_v26 = vor.u32 %v7887_v19, %v6411_v20  ;;  %v5577_v18 = vld [vmem:[#allocation5 + $0x418] sm:$0xf]  ;;  %v7683_v20 = vld [vmem:[#allocation5 + $0x43c] sm:$0xf0] }
  0x65   :  { %3174 = vmatpush.bf16.msra.mxu2 %v6614_v23  ;;  %3143 = vmatmul.bf16.vlgmr.msrb.gmra.mxu3 %v8482_v25  ;;  %v5774_v23 = vor.u32 %v7727_v13, %v5771_v14  ;;  %v6734_v30 = vor.u32 %v7967_v21, %v6731_v22  ;;  %v5618_v13 = vor.u32 %v7693_v5, %v5617_v3  ;;  %v5897_v21 = vld [vmem:[#allocation5 + $0x698] sm:$0xf]  ;;  %v7763_v22 = vld [vmem:[#allocation5 + $0x6bc] sm:$0xf0]  ;;  %v5217_v29 = vld [vmem:[#allocation5 + $0x148] sm:$0xf] }
  0x66   :  { %3187 = vmatpush.bf16.msra.mxu3 %v6934_v28  ;;  %v5731_v28 = vld [vmem:[#allocation5 + $0x578] sm:$0xf0]  ;;  %v5938_v14 = vor.u32 %v7773_v7, %v5937_v6  ;;  %v5537_v31 = vld [vmem:[#allocation5 + $0x3c8] sm:$0xf]  ;;  %v7833_v39 = vld [vmem:[#allocation5 + $0x8ec] sm:$0xf0] }
  0x67   :  { %3149 = vmatpush.bf16.msra.mxu0 %v5934_v36  ;;  %v7957_v36 = vld [vmem:[#allocation5 + $0xcd4] sm:$0xf]  ;;  %v5177_v43 = vld [vmem:[#allocation5 + $0xf8] sm:$0xf]  ;;  %v7583_v44 = vld [vmem:[#allocation5 + $0x11c] sm:$0xf0] }
  0x68   :  { %3162 = vmatpush.bf16.msra.mxu1 %v6254_v37  ;;  %v6691_v37 = vld [vmem:[#allocation5 + $0xcf8] sm:$0xf0]  ;;  %v5497_v45 = vld [vmem:[#allocation5 + $0x378] sm:$0xf]  ;;  %v7663_v47 = vld [vmem:[#allocation5 + $0x39c] sm:$0xf0] }
  0x69   :  { %3175 = vmatpush.bf16.msra.mxu2 %v6574_v38  ;;  %v5734_v38 = vor.u32 %v7717_v27, %v5731_v28  ;;  %v6694_v46 = vor.u32 %v7957_v36, %v6691_v37  ;;  %v5578_v27 = vor.u32 %v7683_v20, %v5577_v18  ;;  %v5898_v28 = vor.u32 %v7763_v22, %v5897_v21  ;;  %v5857_v36 = vld [vmem:[#allocation5 + $0x648] sm:$0xf]  ;;  %v7753_v37 = vld [vmem:[#allocation5 + $0x66c] sm:$0xf0]  ;;  %v5097_v3 = vld [vmem:[#allocation5 + $0x58] sm:$0xf] }
  0x6a   :  { %3188 = vmatpush.bf16.msra.mxu3 %v6894_v42  ;;  %v6374_v42 = vor.u32 %v7877_v33, %v6371_v34  ;;  %v7673_v34 = vld [vmem:[#allocation5 + $0x3ec] sm:$0xf0]  ;;  %v5137_v55 = vld [vmem:[#allocation5 + $0xa8] sm:$0xf]  ;;  %v5417_v5 = vld [vmem:[#allocation5 + $0x2d8] sm:$0xf] }
  0x6b   :  { %3150 = vmatpush.bf16.msra.mxu0 %v5894_v48  ;;  %v7947_v48 = vld [vmem:[#allocation5 + $0xc84] sm:$0xf]  ;;  %v7573_v56 = vld [vmem:[#allocation5 + $0xcc] sm:$0xf0]  ;;  %v7643_v7 = vld [vmem:[#allocation5 + $0x2fc] sm:$0xf0] }
  0x6c   :  { %3163 = vmatpush.bf16.msra.mxu1 %v6214_v49  ;;  %v6651_v49 = vld [vmem:[#allocation5 + $0xca8] sm:$0xf0]  ;;  %v5418_v18 = vor.u32 %v7643_v7, %v5417_v5  ;;  %v5377_v20 = vld [vmem:[#allocation5 + $0x288] sm:$0xf]  ;;  %v7633_v21 = vld [vmem:[#allocation5 + $0x2ac] sm:$0xf0] }
  0x6d   :  { %3176 = vmatpush.bf16.msra.mxu2 %v6534_v50  ;;  %v5337_v50 = vld [vmem:[#allocation5 + $0x238] sm:$0xf]  ;;  %v5697_v22 = vld [vmem:[#allocation5 + $0x508] sm:$0xf] }
  0x6e   :  { %3189 = vmatpush.bf16.msra.mxu3 %v6854_v54  ;;  %v7703_v54 = vld [vmem:[#allocation5 + $0x4dc] sm:$0xf0]  ;;  %v6497_v5 = vld [vmem:[#allocation5 + $0xb48] sm:$0xf] }
  0x6f   :  { %3151 = vmatpush.bf16.msra.mxu0 %v5854_v60  ;;  %v7863_v60 = vld [vmem:[#allocation5 + $0x9dc] sm:$0xf0]  ;;  %v5658_v63 = vor.u32 %v7703_v54, %v5657_v52  ;;  %v5178_v52 = vor.u32 %v7583_v44, %v5177_v43  ;;  %v6817_v7 = vld [vmem:[#allocation5 + $0xdc8] sm:$0xf] }
  0x70   :  { %3164 = vmatpush.bf16.msra.mxu1 %v6174_v61  ;;  %v6654_v61 = vor.u32 %v7947_v48, %v6651_v49  ;;  %v6298_v4 = vor.u32 %v7863_v60, %v6297_v59  ;;  %v5817_v48 = vld [vmem:[#allocation5 + $0x5f8] sm:$0xf]  ;;  %v7743_v49 = vld [vmem:[#allocation5 + $0x61c] sm:$0xf0]  ;;  %v7653_v59 = vld [vmem:[#allocation5 + $0x34c] sm:$0xf0] }
  0x71   :  { %3177 = vmatpush.bf16.msra.mxu2 %v6494_v62  ;;  %v5338_v62 = vor.u32 %v7623_v51, %v5337_v50  ;;  %v6137_v50 = vld [vmem:[#allocation5 + $0x878] sm:$0xf]  ;;  %v7823_v51 = vld [vmem:[#allocation5 + $0x89c] sm:$0xf0]  ;;  %v5818_v54 = vor.u32 %v7743_v49, %v5817_v48  ;;  %v5777_v60 = vld [vmem:[#allocation5 + $0x5a8] sm:$0xf] }
  0x72   :  { %3190 = vmatpush.bf16.msra.mxu3 %v6814_v2  ;;  %v7613_v2 = vld [vmem:[#allocation5 + $0x20c] sm:$0xf0] }
  0x73   :  { %3152 = vmatpush.bf16.msra.mxu0 %v5814_v10  ;;  %v6257_v10 = vld [vmem:[#allocation5 + $0x968] sm:$0xf]  ;;  %v8013_v49 = vld [vmem:[#allocation5 + $0xe8c] sm:$0xf0] }
  0x74   :  { %3165 = vmatpush.bf16.msra.mxu1 %v6134_v11  ;;  %v7853_v11 = vld [vmem:[#allocation5 + $0x98c] sm:$0xf0] }
  0x75   :  { %3178 = vmatpush.bf16.msra.mxu2 %v6454_v12  ;;  %v5298_v12 = vor.u32 %v7613_v2, %v5297_v1  ;;  %v6258_v19 = vor.u32 %v7853_v11, %v6257_v10  ;;  %v5737_v10 = vld [vmem:[#allocation5 + $0x558] sm:$0xf]  ;;  %v7723_v11 = vld [vmem:[#allocation5 + $0x57c] sm:$0xf0] }
  0x76   :  { %3191 = vmatpush.bf16.msra.mxu3 %v6774_v17  ;;  %v7603_v17 = vld [vmem:[#allocation5 + $0x1bc] sm:$0xf0] }
  0x77   :  { %3153 = vmatpush.bf16.msra.mxu0 %v5774_v23  ;;  %v6217_v23 = vld [vmem:[#allocation5 + $0x918] sm:$0xf] }
  0x78   :  { %3166 = vmatpush.bf16.msra.mxu1 %v6094_v24  ;;  %v7843_v24 = vld [vmem:[#allocation5 + $0x93c] sm:$0xf0] }
  0x79   :  { %3179 = vmatpush.bf16.msra.mxu2 %v6414_v26  ;;  %v5258_v26 = vor.u32 %v7603_v17, %v5257_v16  ;;  %v6218_v33 = vor.u32 %v7843_v24, %v6217_v23  ;;  %v5057_v16 = vld [vmem:[#allocation5 + $0x8] sm:$0xf]  ;;  %v7553_v17 = vld [vmem:[#allocation5 + $0x2c] sm:$0xf0] }
  0x7a   :  { %3192 = vmatpush.bf16.msra.mxu3 %v6734_v30  ;;  %v7593_v30 = vld [vmem:[#allocation5 + $0x16c] sm:$0xf0] }
  0x7b   :  { %3154 = vmatpush.bf16.msra.mxu0 %v5734_v38  ;;  %v6177_v38 = vld [vmem:[#allocation5 + $0x8c8] sm:$0xf]  ;;  %v5218_v40 = vor.u32 %v7593_v30, %v5217_v29  ;;  %v7713_v24 = vld [vmem:[#allocation5 + $0x52c] sm:$0xf0]  ;;  %v7943_v29 = vld [vmem:[#allocation5 + $0xc5c] sm:$0xf0] }
  0x7c   :  { %3167 = vmatpush.bf16.msra.mxu1 %v6054_v41  ;;  %v5538_v41 = vor.u32 %v7673_v34, %v5537_v31  ;;  %v6937_v30 = vld [vmem:[#allocation5 + $0xeb8] sm:$0xf]  ;;  %v5058_v31 = vor.u32 %v7553_v17, %v5057_v16  ;;  %v7618_v34 = vld [vmem:[#allocation5 + $0x23c] sm:$0xf]  ;;  %v5539_v16 = vld [vmem:[#allocation5 + $0x3f0] sm:$0xf0] }
  0x7d   :  { %3180 = vmatpush.bf16.msra.mxu2 %v6374_v42  ;;  %v5858_v42 = vor.u32 %v7753_v37, %v5857_v36  ;;  %v5339_v36 = vld [vmem:[#allocation5 + $0x260] sm:$0xf0]  ;;  %v5378_v37 = vor.u32 %v7633_v21, %v5377_v20  ;;  %v6457_v20 = vld [vmem:[#allocation5 + $0xaf8] sm:$0xf]  ;;  %v7903_v21 = vld [vmem:[#allocation5 + $0xb1c] sm:$0xf0] }
  0x7e   :  { %3193 = vmatpush.bf16.msra.mxu3 %v6694_v46  ;;  %v6178_v46 = vor.u32 %v7833_v39, %v6177_v38  ;;  %v5698_v38 = vor.u32 %v7713_v24, %v5697_v22  ;;  %v7698_v39 = vld [vmem:[#allocation5 + $0x4bc] sm:$0xf]  ;;  %v5342_v44 = vor.u32 %v7618_v34, %v5339_v36  ;;  %v6777_v22 = vld [vmem:[#allocation5 + $0xd78] sm:$0xf]  ;;  %v7983_v24 = vld [vmem:[#allocation5 + $0xd9c] sm:$0xf0] }
  0x7f   :  { %3155 = vmatpush.bf16.msra.mxu0 %v5694_v53  ;;  %v5498_v53 = vor.u32 %v7663_v47, %v5497_v45  ;;  %v6577_v45 = vld [vmem:[#allocation5 + $0xbe8] sm:$0xf]  ;;  %v7893_v36 = vld [vmem:[#allocation5 + $0xacc] sm:$0xf0] }
  0x80   :  { %3168 = vmatpush.bf16.msra.mxu1 %v6014_v57  ;;  %v5457_v57 = vld [vmem:[#allocation5 + $0x328] sm:$0xf] }
  0x81   :  { %3181 = vmatpush.bf16.msra.mxu2 %v6334_v58  ;;  %v6138_v58 = vor.u32 %v7823_v51, %v6137_v50  ;;  %v5458_v1 = vor.u32 %v7653_v59, %v5457_v57  ;;  %v6897_v47 = vld [vmem:[#allocation5 + $0xe68] sm:$0xf]  ;;  %v7608_v50 = vld [vmem:[#allocation5 + $0x1ec] sm:$0xf]  ;;  %v5299_v51 = vld [vmem:[#allocation5 + $0x210] sm:$0xf0] }
  0x82   :  { %3194 = vmatpush.bf16.msra.mxu3 %v6654_v61  ;;  %3156 = vmatmul.bf16.vlgmr.msra.gmra.mxu0 %v8473_v8  ;;  %v7733_v61 = vld [vmem:[#allocation5 + $0x5cc] sm:$0xf0]  ;;  %v6537_v57 = vld [vmem:[#allocation5 + $0xb98] sm:$0xf]  ;;  %v6417_v34 = vld [vmem:[#allocation5 + $0xaa8] sm:$0xf] }
  0x83   :  { %3200 = vmatpush.bf16.msrb.mxu0 %v5338_v62  ;;  %3169 = vmatmul.bf16.vlgmr.msra.gmra.mxu1 %v8477_v15  ;;  %v6097_v62 = vld [vmem:[#allocation5 + $0x828] sm:$0xf]  ;;  %v5778_v2 = vor.u32 %v7733_v61, %v5777_v60  ;;  %v6857_v59 = vld [vmem:[#allocation5 + $0xe18] sm:$0xf]  ;;  %v8003_v61 = vld [vmem:[#allocation5 + $0xe3c] sm:$0xf0] }
  0x84   :  { %3213 = vmatpush.bf16.msrb.mxu1 %v5658_v63  ;;  %3182 = vmatmul.bf16.vlgmr.msra.gmra.mxu2 %v8485_v32  ;;  %v7813_v63 = vld [vmem:[#allocation5 + $0x84c] sm:$0xf0] }
  0x85   :  { %3226 = vmatpush.bf16.msrb.mxu2 %v5978_v0  ;;  %3195 = vmatmul.bf16.vlgmr.msra.gmra.mxu3 %v8487_v35  ;;  %v5138_v0 = vor.u32 %v7573_v56, %v5137_v55  ;;  %v6098_v6 = vor.u32 %v7813_v63, %v6097_v62  ;;  %v6898_v55 = vor.u32 %v8013_v49, %v6897_v47  ;;  %v7598_v62 = vld [vmem:[#allocation5 + $0x19c] sm:$0xf]  ;;  %v5259_v63 = vld [vmem:[#allocation5 + $0x1c0] sm:$0xf0]  ;;  %v6377_v47 = vld [vmem:[#allocation5 + $0xa58] sm:$0xf] }
  0x86   :  { %3239 = vmatpush.bf16.msrb.mxu3 %v6298_v4  ;;  %v7563_v4 = vld [vmem:[#allocation5 + $0x7c] sm:$0xf0]  ;;  %v5302_v56 = vor.u32 %v7608_v50, %v5299_v51  ;;  %v6697_v49 = vld [vmem:[#allocation5 + $0xcd8] sm:$0xf] }
  0x87   :  { %3201 = vmatpush.bf16.msrb.mxu0 %v5298_v12  ;;  %v6057_v12 = vld [vmem:[#allocation5 + $0x7d8] sm:$0xf]  ;;  %v7963_v51 = vld [vmem:[#allocation5 + $0xcfc] sm:$0xf0] }
  0x88   :  { %3214 = vmatpush.bf16.msrb.mxu1 %v5618_v13  ;;  %v7803_v13 = vld [vmem:[#allocation5 + $0x7fc] sm:$0xf0] }
  0x89   :  { %3227 = vmatpush.bf16.msrb.mxu2 %v5938_v14  ;;  %v5098_v14 = vor.u32 %v7563_v4, %v5097_v3  ;;  %v6058_v23 = vor.u32 %v7803_v13, %v6057_v12  ;;  %v6858_v3 = vor.u32 %v8003_v61, %v6857_v59  ;;  %v5262_v4 = vor.u32 %v7598_v62, %v5259_v63  ;;  %v7588_v12 = vld [vmem:[#allocation5 + $0x14c] sm:$0xf]  ;;  %v5219_v13 = vld [vmem:[#allocation5 + $0x170] sm:$0xf0]  ;;  %v6657_v61 = vld [vmem:[#allocation5 + $0xc88] sm:$0xf] }
  0x8a   :  { %3240 = vmatpush.bf16.msrb.mxu3 %v6258_v19  ;;  %v5738_v19 = vor.u32 %v7723_v11, %v5737_v10  ;;  %v7993_v11 = vld [vmem:[#allocation5 + $0xdec] sm:$0xf0]  ;;  %v6698_v59 = vor.u32 %v7963_v51, %v6697_v49  ;;  %v7548_v63 = vld [vmem:[#allocation5 + $0xc] sm:$0xf] }
  0x8b   :  { %3202 = vmatpush.bf16.msrb.mxu0 %v5258_v26  ;;  %v6017_v26 = vld [vmem:[#allocation5 + $0x788] sm:$0xf]  ;;  %v7953_v62 = vld [vmem:[#allocation5 + $0xcac] sm:$0xf0]  ;;  %v7828_v51 = vld [vmem:[#allocation5 + $0x8cc] sm:$0xf] }
  0x8c   :  { %3215 = vmatpush.bf16.msrb.mxu1 %v5578_v27  ;;  %v7793_v27 = vld [vmem:[#allocation5 + $0x7ac] sm:$0xf0] }
  0x8d   :  { %3228 = vmatpush.bf16.msrb.mxu2 %v5898_v28  ;;  %v6617_v28 = vld [vmem:[#allocation5 + $0xc38] sm:$0xf] }
  0x8e   :  { %3241 = vmatpush.bf16.msrb.mxu3 %v6218_v33  ;;  %v8023_v33 = vld [vmem:[#allocation5 + $0xedc] sm:$0xf0] }
  0x8f   :  { %3203 = vmatpush.bf16.msrb.mxu0 %v5218_v40  ;;  %v5659_v40 = vld [vmem:[#allocation5 + $0x4e0] sm:$0xf0]  ;;  %v6938_v43 = vor.u32 %v8023_v33, %v6937_v30  ;;  %v6458_v30 = vor.u32 %v7903_v21, %v6457_v20 }
  0x90   :  { %3216 = vmatpush.bf16.msrb.mxu1 %v5538_v41  ;;  %v6018_v41 = vor.u32 %v7793_v27, %v6017_v26  ;;  %v5662_v48 = vor.u32 %v7698_v39, %v5659_v40  ;;  %v7578_v26 = vld [vmem:[#allocation5 + $0xfc] sm:$0xf]  ;;  %v5179_v27 = vld [vmem:[#allocation5 + $0x120] sm:$0xf0]  ;;  %v7973_v39 = vld [vmem:[#allocation5 + $0xd4c] sm:$0xf0] }
  0x91   :  { %3229 = vmatpush.bf16.msrb.mxu2 %v5858_v42  ;;  %v6618_v42 = vor.u32 %v7943_v29, %v6617_v28  ;;  %v7658_v28 = vld [vmem:[#allocation5 + $0x37c] sm:$0xf]  ;;  %v5499_v29 = vld [vmem:[#allocation5 + $0x3a0] sm:$0xf0]  ;;  %v5182_v33 = vor.u32 %v7578_v26, %v5179_v27  ;;  %v7568_v40 = vld [vmem:[#allocation5 + $0xac] sm:$0xf] }
  0x92   :  { %3242 = vmatpush.bf16.msrb.mxu3 %v6178_v46  ;;  %v7933_v46 = vld [vmem:[#allocation5 + $0xc0c] sm:$0xf0]  ;;  %v6259_v27 = vld [vmem:[#allocation5 + $0x990] sm:$0xf0] }
  0x93   :  { %3204 = vmatpush.bf16.msrb.mxu0 %v5178_v52  ;;  %v7688_v52 = vld [vmem:[#allocation5 + $0x46c] sm:$0xf] }
  0x94   :  { %3217 = vmatpush.bf16.msrb.mxu1 %v5498_v53  ;;  %v5619_v53 = vld [vmem:[#allocation5 + $0x490] sm:$0xf0] }
  0x95   :  { %3230 = vmatpush.bf16.msrb.mxu2 %v5818_v54  ;;  %v6578_v54 = vor.u32 %v7933_v46, %v6577_v45  ;;  %v5622_v60 = vor.u32 %v7688_v52, %v5619_v53  ;;  %v7558_v52 = vld [vmem:[#allocation5 + $0x5c] sm:$0xf]  ;;  %v5099_v53 = vld [vmem:[#allocation5 + $0x80] sm:$0xf0] }
  0x96   :  { %3243 = vmatpush.bf16.msrb.mxu3 %v6138_v58  ;;  %v7923_v58 = vld [vmem:[#allocation5 + $0xbbc] sm:$0xf0] }
  0x97   :  { %3205 = vmatpush.bf16.msrb.mxu0 %v5138_v0  ;;  %v7678_v0 = vld [vmem:[#allocation5 + $0x41c] sm:$0xf] }
  0x98   :  { %3218 = vmatpush.bf16.msrb.mxu1 %v5458_v1  ;;  %v5579_v1 = vld [vmem:[#allocation5 + $0x440] sm:$0xf0] }
  0x99   :  { %3231 = vmatpush.bf16.msrb.mxu2 %v5778_v2  ;;  %v6538_v2 = vor.u32 %v7923_v58, %v6537_v57  ;;  %v5582_v10 = vor.u32 %v7678_v0, %v5579_v1  ;;  %v6337_v57 = vld [vmem:[#allocation5 + $0xa08] sm:$0xf]  ;;  %v7873_v58 = vld [vmem:[#allocation5 + $0xa2c] sm:$0xf0]  ;;  %v5059_v1 = vld [vmem:[#allocation5 + $0x30] sm:$0xf0] }
  0x9a   :  { %3244 = vmatpush.bf16.msrb.mxu3 %v6098_v6  ;;  %v7913_v6 = vld [vmem:[#allocation5 + $0xb6c] sm:$0xf0] }
  0x9b   :  { %3206 = vmatpush.bf16.msrb.mxu0 %v5098_v14  ;;  %v7668_v14 = vld [vmem:[#allocation5 + $0x3cc] sm:$0xf]  ;;  %v6498_v17 = vor.u32 %v7913_v6, %v6497_v5  ;;  %v5979_v5 = vld [vmem:[#allocation5 + $0x760] sm:$0xf0]  ;;  %v7858_v6 = vld [vmem:[#allocation5 + $0x9bc] sm:$0xf] }
  0x9c   :  { %3219 = vmatpush.bf16.msrb.mxu1 %v5418_v18  ;;  %v6818_v18 = vor.u32 %v7993_v11, %v6817_v7  ;;  %v6338_v7 = vor.u32 %v7873_v58, %v6337_v57  ;;  %v7938_v11 = vld [vmem:[#allocation5 + $0xc3c] sm:$0xf]  ;;  %v7988_v57 = vld [vmem:[#allocation5 + $0xdcc] sm:$0xf]  ;;  %v6819_v58 = vld [vmem:[#allocation5 + $0xdf0] sm:$0xf0] }
  0x9d   :  { %3232 = vmatpush.bf16.msrb.mxu2 %v5738_v19  ;;  %v5222_v19 = vor.u32 %v7588_v12, %v5219_v13  ;;  %v6619_v12 = vld [vmem:[#allocation5 + $0xc60] sm:$0xf0]  ;;  %v6658_v13 = vor.u32 %v7953_v62, %v6657_v61 }
  0x9e   :  { %3245 = vmatpush.bf16.msrb.mxu3 %v6058_v23  ;;  %v5542_v23 = vor.u32 %v7668_v14, %v5539_v16  ;;  %v5062_v14 = vor.u32 %v7548_v63, %v5059_v1  ;;  %v8018_v16 = vld [vmem:[#allocation5 + $0xebc] sm:$0xf]  ;;  %v6622_v21 = vor.u32 %v7938_v11, %v6619_v12  ;;  %v5819_v63 = vld [vmem:[#allocation5 + $0x620] sm:$0xf0] }
  0x9f   :  { %3207 = vmatpush.bf16.msrb.mxu0 %v5058_v31  ;;  %v6778_v31 = vor.u32 %v7983_v24, %v6777_v22  ;;  %v7768_v22 = vld [vmem:[#allocation5 + $0x6ec] sm:$0xf] }
  0xa0   :  { %3220 = vmatpush.bf16.msrb.mxu1 %v5378_v37  ;;  %v6737_v37 = vld [vmem:[#allocation5 + $0xd28] sm:$0xf]  ;;  %v7848_v24 = vld [vmem:[#allocation5 + $0x96c] sm:$0xf] }
  0xa1   :  { %3233 = vmatpush.bf16.msrb.mxu2 %v5698_v38  ;;  %v5502_v38 = vor.u32 %v7658_v28, %v5499_v29  ;;  %v6738_v45 = vor.u32 %v7973_v39, %v6737_v37  ;;  %v7928_v28 = vld [vmem:[#allocation5 + $0xbec] sm:$0xf]  ;;  %v6579_v29 = vld [vmem:[#allocation5 + $0xc10] sm:$0xf0]  ;;  %v7758_v37 = vld [vmem:[#allocation5 + $0x69c] sm:$0xf] }
  0xa2   :  { %3246 = vmatpush.bf16.msrb.mxu3 %v6018_v41  ;;  %3208 = vmatmul.bf16.vlgmr.msrb.gmra.mxu0 %v8475_v9  ;;  %v5139_v41 = vld [vmem:[#allocation5 + $0xd0] sm:$0xf0]  ;;  %v7838_v39 = vld [vmem:[#allocation5 + $0x91c] sm:$0xf] }
  0xa3   :  { %3252 = vmatpush.bf16.msra.mxu0 %v6618_v42  ;;  %3221 = vmatmul.bf16.vlgmr.msrb.gmra.mxu1 %v8482_v25  ;;  %v7648_v42 = vld [vmem:[#allocation5 + $0x32c] sm:$0xf]  ;;  %v5142_v46 = vor.u32 %v7568_v40, %v5139_v41  ;;  %v6219_v41 = vld [vmem:[#allocation5 + $0x940] sm:$0xf0] }
  0xa4   :  { %3265 = vmatpush.bf16.msra.mxu1 %v6938_v43  ;;  %3234 = vmatmul.bf16.vlgmr.msrb.gmra.mxu2 %v8473_v8  ;;  %v5459_v43 = vld [vmem:[#allocation5 + $0x350] sm:$0xf0] }
  0xa5   :  { %3278 = vmatpush.bf16.msra.mxu2 %v5342_v44  ;;  %3247 = vmatmul.bf16.vlgmr.msrb.gmra.mxu3 %v8477_v15  ;;  %v6418_v44 = vor.u32 %v7893_v36, %v6417_v34  ;;  %v5462_v50 = vor.u32 %v7648_v42, %v5459_v43  ;;  %v6262_v34 = vor.u32 %v7848_v24, %v6259_v27  ;;  %v7918_v42 = vld [vmem:[#allocation5 + $0xb9c] sm:$0xf]  ;;  %v6539_v43 = vld [vmem:[#allocation5 + $0xbc0] sm:$0xf0]  ;;  %v6739_v24 = vld [vmem:[#allocation5 + $0xd50] sm:$0xf0] }
  0xa6   :  { %3291 = vmatpush.bf16.msra.mxu3 %v5662_v48  ;;  %v7883_v48 = vld [vmem:[#allocation5 + $0xa7c] sm:$0xf0]  ;;  %v6582_v36 = vor.u32 %v7928_v28, %v6579_v29  ;;  %v6542_v49 = vor.u32 %v7918_v42, %v6539_v43  ;;  %v6699_v42 = vld [vmem:[#allocation5 + $0xd00] sm:$0xf0] }
  0xa7   :  { %3253 = vmatpush.bf16.msra.mxu0 %v6578_v54  ;;  %v7638_v54 = vld [vmem:[#allocation5 + $0x2dc] sm:$0xf] }
  0xa8   :  { %3266 = vmatpush.bf16.msra.mxu1 %v6898_v55  ;;  %v5419_v55 = vld [vmem:[#allocation5 + $0x300] sm:$0xf0] }
  0xa9   :  { %3279 = vmatpush.bf16.msra.mxu2 %v5302_v56  ;;  %v6378_v56 = vor.u32 %v7883_v48, %v6377_v47  ;;  %v5422_v0 = vor.u32 %v7638_v54, %v5419_v55  ;;  %v7748_v47 = vld [vmem:[#allocation5 + $0x64c] sm:$0xf]  ;;  %v6222_v48 = vor.u32 %v7838_v39, %v6219_v41  ;;  %v6499_v55 = vld [vmem:[#allocation5 + $0xb70] sm:$0xf0]  ;;  %v6379_v39 = vld [vmem:[#allocation5 + $0xa80] sm:$0xf0] }
  0xaa   :  { %3292 = vmatpush.bf16.msra.mxu3 %v5622_v60  ;;  %v5102_v60 = vor.u32 %v7558_v52, %v5099_v53  ;;  %v6179_v52 = vld [vmem:[#allocation5 + $0x8f0] sm:$0xf0]  ;;  %v7908_v54 = vld [vmem:[#allocation5 + $0xb4c] sm:$0xf]  ;;  %v7958_v41 = vld [vmem:[#allocation5 + $0xcdc] sm:$0xf] }
  0xab   :  { %3254 = vmatpush.bf16.msra.mxu0 %v6538_v2  ;;  %v7628_v2 = vld [vmem:[#allocation5 + $0x28c] sm:$0xf]  ;;  %v6182_v61 = vor.u32 %v7828_v51, %v6179_v52  ;;  %v6502_v62 = vor.u32 %v7908_v54, %v6499_v55  ;;  %v6019_v52 = vld [vmem:[#allocation5 + $0x7b0] sm:$0xf0]  ;;  %v6702_v55 = vor.u32 %v7958_v41, %v6699_v42 }
  0xac   :  { %3267 = vmatpush.bf16.msra.mxu1 %v6858_v3  ;;  %v5379_v3 = vld [vmem:[#allocation5 + $0x2b0] sm:$0xf0]  ;;  %v7788_v51 = vld [vmem:[#allocation5 + $0x78c] sm:$0xf] }
  0xad   :  { %3280 = vmatpush.bf16.msra.mxu2 %v5262_v4  ;;  %v7778_v4 = vld [vmem:[#allocation5 + $0x73c] sm:$0xf] }
  0xae   :  { %3293 = vmatpush.bf16.msra.mxu3 %v5582_v10  ;;  %v6299_v10 = vld [vmem:[#allocation5 + $0x9e0] sm:$0xf0] }
  0xaf   :  { %3255 = vmatpush.bf16.msra.mxu0 %v6498_v17  ;;  %v6939_v17 = vld [vmem:[#allocation5 + $0xee0] sm:$0xf0]  ;;  %v6302_v20 = vor.u32 %v7858_v6, %v6299_v10  ;;  %v7978_v6 = vld [vmem:[#allocation5 + $0xd7c] sm:$0xf] }
  0xb0   :  { %3268 = vmatpush.bf16.msra.mxu1 %v6818_v18  ;;  %v5382_v18 = vor.u32 %v7628_v2, %v5379_v3  ;;  %v6942_v26 = vor.u32 %v8018_v16, %v6939_v17  ;;  %v6822_v2 = vor.u32 %v7988_v57, %v6819_v58  ;;  %v6139_v3 = vld [vmem:[#allocation5 + $0x8a0] sm:$0xf0]  ;;  %v5779_v16 = vld [vmem:[#allocation5 + $0x5d0] sm:$0xf0]  ;;  %v7808_v17 = vld [vmem:[#allocation5 + $0x82c] sm:$0xf] }
  0xb1   :  { %3281 = vmatpush.bf16.msra.mxu2 %v5222_v19  ;;  %v5982_v19 = vor.u32 %v7778_v4, %v5979_v5  ;;  %v7898_v4 = vld [vmem:[#allocation5 + $0xafc] sm:$0xf]  ;;  %v6459_v5 = vld [vmem:[#allocation5 + $0xb20] sm:$0xf0]  ;;  %v6339_v57 = vld [vmem:[#allocation5 + $0xa30] sm:$0xf0] }
  0xb2   :  { %3294 = vmatpush.bf16.msra.mxu3 %v5542_v23  ;;  %v5939_v23 = vld [vmem:[#allocation5 + $0x710] sm:$0xf0]  ;;  %v7948_v58 = vld [vmem:[#allocation5 + $0xc8c] sm:$0xf] }
  0xb3   :  { %3256 = vmatpush.bf16.msra.mxu0 %v6458_v30  ;;  %v8008_v30 = vld [vmem:[#allocation5 + $0xe6c] sm:$0xf] }
  0xb4   :  { %3269 = vmatpush.bf16.msra.mxu1 %v6778_v31  ;;  %v6899_v31 = vld [vmem:[#allocation5 + $0xe90] sm:$0xf0] }
  0xb5   :  { %3282 = vmatpush.bf16.msra.mxu2 %v5182_v33  ;;  %v5942_v33 = vor.u32 %v7768_v22, %v5939_v23  ;;  %v6902_v40 = vor.u32 %v8008_v30, %v6899_v31  ;;  %v6419_v22 = vld [vmem:[#allocation5 + $0xad0] sm:$0xf0]  ;;  %v7968_v23 = vld [vmem:[#allocation5 + $0xd2c] sm:$0xf]  ;;  %v7718_v30 = vld [vmem:[#allocation5 + $0x55c] sm:$0xf] }
  0xb6   :  { %3295 = vmatpush.bf16.msra.mxu3 %v5502_v38  ;;  %v5899_v38 = vld [vmem:[#allocation5 + $0x6c0] sm:$0xf0] }
  0xb7   :  { %3257 = vmatpush.bf16.msra.mxu0 %v6418_v44  ;;  %v7998_v44 = vld [vmem:[#allocation5 + $0xe1c] sm:$0xf]  ;;  %v5739_v31 = vld [vmem:[#allocation5 + $0x580] sm:$0xf0] }
  0xb8   :  { %3270 = vmatpush.bf16.msra.mxu1 %v6738_v45  ;;  %v6859_v45 = vld [vmem:[#allocation5 + $0xe40] sm:$0xf0] }
  0xb9   :  { %3283 = vmatpush.bf16.msra.mxu2 %v5142_v46  ;;  %v5902_v46 = vor.u32 %v7758_v37, %v5899_v38  ;;  %v6862_v53 = vor.u32 %v7998_v44, %v6859_v45  ;;  %v6059_v37 = vld [vmem:[#allocation5 + $0x800] sm:$0xf0]  ;;  %v7878_v38 = vld [vmem:[#allocation5 + $0xa5c] sm:$0xf]  ;;  %v5742_v45 = vor.u32 %v7718_v30, %v5739_v31  ;;  %v5265_v30 = vld [vmem:[#allocation5 + $0x1a0] sm:$0xf] }
  0xba   :  { %3296 = vmatpush.bf16.msra.mxu3 %v5462_v50  ;;  %v5859_v50 = vld [vmem:[#allocation5 + $0x670] sm:$0xf0]  ;;  %v7604_v31 = vld [vmem:[#allocation5 + $0x1c4] sm:$0xf0] }
  0xbb   :  { %3258 = vmatpush.bf16.msra.mxu0 %v6378_v56  ;;  %v8505_v56 = vld [vmem:[#allocation7] sm:$0xff]  ;;  %v5266_v41 = vor.u32 %v7604_v31, %v5265_v30 }
  0xbc   :  { %3271 = vmatpush.bf16.msra.mxu1 %v6698_v59  ;;  %v5862_v59 = vor.u32 %v7748_v47, %v5859_v50  ;;  %v624_v1 = vperm.slane %v8505_v56, 0  ;;  %v5699_v47 = vld [vmem:[#allocation5 + $0x530] sm:$0xf0]  ;;  %v6382_v50 = vor.u32 %v7878_v38, %v6379_v39  ;;  %v7764_v38 = vld [vmem:[#allocation5 + $0x6c4] sm:$0xf0] }
  0xbd   :  { %3284 = vmatpush.bf16.msra.mxu2 %v5102_v60  ;;  %v7738_v60 = vld [vmem:[#allocation5 + $0x5fc] sm:$0xf]  ;;  %v6225_v39 = vld [vmem:[#allocation5 + $0x920] sm:$0xf] }
  0xbe   :  { %3297 = vmatpush.bf16.msra.mxu3 %v5422_v0  ;;  %v7818_v0 = vld [vmem:[#allocation5 + $0x87c] sm:$0xf]  ;;  %v5822_v10 = vor.u32 %v7738_v60, %v5819_v63  ;;  %v5345_v60 = vld [vmem:[#allocation5 + $0x240] sm:$0xf] }
  0xbf   :  { %3259 = vmatpush.bf16.msra.mxu0 %v6338_v7  ;;  %v6779_v7 = vld [vmem:[#allocation5 + $0xda0] sm:$0xf0]  ;;  %v3053_v11 = vpop.f32.mrf.mxu0  ;;  %v6142_v12 = vor.u32 %v7818_v0, %v6139_v3  ;;  %v7704_v0 = vld [vmem:[#allocation5 + $0x4e4] sm:$0xf0]  ;;  %v5105_v31 = vld [vmem:[#allocation5 + $0x60] sm:$0xf] }
  0xc0   :  { %3272 = vmatpush.bf16.msra.mxu1 %v6658_v13  ;;  %v6462_v13 = vor.u32 %v7898_v4, %v6459_v5  ;;  %v6022_v4 = vor.u32 %v7788_v51, %v6019_v52  ;;  %v6185_v51 = vld [vmem:[#allocation5 + $0x8d0] sm:$0xf]  ;;  %v7834_v52 = vld [vmem:[#allocation5 + $0x8f4] sm:$0xf0] }
  0xc1   :  { %3285 = vmatpush.bf16.msra.mxu2 %v5062_v14  ;;  %v7728_v14 = vld [vmem:[#allocation5 + $0x5ac] sm:$0xf] }
  0xc2   :  { %3298 = vmatpush.bf16.msra.mxu3 %v5382_v18  ;;  %3260 = vmatmul.bf16.vlgmr.msra.gmra.mxu0 %v8485_v32  ;;  %v3054_v18 = vadd.f32 %v3053_v11, %v624_v1  ;;  %v5985_v1 = vld [vmem:[#allocation5 + $0x740] sm:$0xf] }
  0xc3   :  { %3304 = vmatpush.bf16.msrb.mxu0 %v5982_v19  ;;  %3273 = vmatmul.bf16.vlgmr.msra.gmra.mxu1 %v8487_v35  ;;  %v6782_v19 = vor.u32 %v7978_v6, %v6779_v7  ;;  %v3066_v27 = vpop.f32.mrf.mxu1  ;;  %v6305_v6 = vld [vmem:[#allocation5 + $0x9c0] sm:$0xf]  ;;  %v7864_v7 = vld [vmem:[#allocation5 + $0x9e4] sm:$0xf0] }
  0xc4   :  { %3317 = vmatpush.bf16.msrb.mxu1 %v6302_v20  ;;  %3286 = vmatmul.bf16.vlgmr.msra.gmra.mxu2 %v8475_v9  ;;  %v6099_v20 = vld [vmem:[#allocation5 + $0x850] sm:$0xf0] }
  0xc5   :  { %3330 = vmatpush.bf16.msrb.mxu2 %v6622_v21  ;;  %3299 = vmatmul.bf16.vlgmr.msra.gmra.mxu3 %v8482_v25  ;;  %v7888_v21 = vld [vmem:[#allocation5 + $0xaac] sm:$0xf]  ;;  %v6102_v28 = vor.u32 %v7808_v17, %v6099_v20  ;;  %v7614_v17 = vld [vmem:[#allocation5 + $0x214] sm:$0xf0]  ;;  %v6306_v20 = vor.u32 %v7864_v7, %v6305_v6  ;;  %v7824_v6 = vld [vmem:[#allocation5 + $0x8a4] sm:$0xf0] }
  0xc6   :  { %3343 = vmatpush.bf16.msrb.mxu3 %v6942_v26  ;;  %v5782_v26 = vor.u32 %v7728_v14, %v5779_v16  ;;  %v6422_v29 = vor.u32 %v7888_v21, %v6419_v22  ;;  %v5305_v16 = vld [vmem:[#allocation5 + $0x1f0] sm:$0xf]  ;;  %v7694_v21 = vld [vmem:[#allocation5 + $0x494] sm:$0xf0]  ;;  %v625_v7 = vperm.slane %v8505_v56, 1 }
  0xc7   :  { %3305 = vmatpush.bf16.msrb.mxu0 %v5942_v33  ;;  %v7798_v33 = vld [vmem:[#allocation5 + $0x7dc] sm:$0xf]  ;;  %v5945_v22 = vld [vmem:[#allocation5 + $0x6f0] sm:$0xf] }
  0xc8   :  { %3318 = vmatpush.bf16.msrb.mxu1 %v6262_v34  ;;  %v3067_v34 = vadd.f32 %v3066_v27, %v3054_v18  ;;  %v3092_v44 = vpop.f32.mrf.mxu3  ;;  %v5625_v18 = vld [vmem:[#allocation5 + $0x470] sm:$0xf]  ;;  %v5306_v27 = vor.u32 %v7614_v17, %v5305_v16  ;;  %v7654_v17 = vld [vmem:[#allocation5 + $0x354] sm:$0xf0] }
  0xc9   :  { %3331 = vmatpush.bf16.msrb.mxu2 %v6582_v36  ;;  %v6742_v36 = vor.u32 %v7968_v23, %v6739_v24  ;;  %v7774_v23 = vld [vmem:[#allocation5 + $0x714] sm:$0xf0]  ;;  %v6265_v24 = vld [vmem:[#allocation5 + $0x970] sm:$0xf] }
  0xca   :  { %3344 = vmatpush.bf16.msrb.mxu3 %v6902_v40  ;;  %v3079_v40 = vpop.f32.mrf.mxu2 }
  0xcb   :  { %3306 = vmatpush.bf16.msrb.mxu0 %v5902_v46  ;;  %v3080_v43 = vadd.f32 %v3079_v40, %v3067_v34  ;;  %v7708_v46 = vld [vmem:[#allocation5 + $0x50c] sm:$0xf]  ;;  %v3068_v3 = vpop.f32.mrf.mxu1  ;;  %v7844_v40 = vld [vmem:[#allocation5 + $0x944] sm:$0xf0] }
  0xcc   :  { %3319 = vmatpush.bf16.msrb.mxu1 %v6222_v48  ;;  %v3055_v48 = vpop.f32.mrf.mxu0  ;;  %v5702_v63 = vor.u32 %v7708_v46, %v5699_v47  ;;  %v5545_v46 = vld [vmem:[#allocation5 + $0x3d0] sm:$0xf]  ;;  %v6226_v47 = vor.u32 %v7844_v40, %v6225_v39  ;;  %v7744_v3 = vld [vmem:[#allocation5 + $0x624] sm:$0xf0]  ;;  %v5745_v39 = vld [vmem:[#allocation5 + $0x560] sm:$0xf] }
  0xcd   :  { %3332 = vmatpush.bf16.msrb.mxu2 %v6542_v49  ;;  %v6062_v49 = vor.u32 %v7798_v33, %v6059_v37  ;;  %v8508_v54 = vadd.f32 %v3092_v44, %v3080_v43  ;;  %v5585_v33 = vld [vmem:[#allocation5 + $0x420] sm:$0xf]  ;;  %v5225_v44 = vld [vmem:[#allocation5 + $0x150] sm:$0xf]  ;;  %v7674_v48 = vld [vmem:[#allocation5 + $0x3f4] sm:$0xf0] }
  0xce   :  { %3345 = vmatpush.bf16.msrb.mxu3 %v6862_v53  ;;  %v7868_v53 = vld [vmem:[#allocation5 + $0xa0c] sm:$0xf]  ;;  %v5905_v37 = vld [vmem:[#allocation5 + $0x6a0] sm:$0xf]  ;;  %v7724_v40 = vld [vmem:[#allocation5 + $0x584] sm:$0xf0] }
  0xcf   :  { %3307 = vmatpush.bf16.msrb.mxu0 %v5862_v59  ;;  %v6659_v59 = vld [vmem:[#allocation5 + $0xcb0] sm:$0xf0]  ;;  %v6342_v5 = vor.u32 %v7868_v53, %v6339_v57  ;;  %v5906_v43 = vor.u32 %v7764_v38, %v5905_v37  ;;  %v7644_v38 = vld [vmem:[#allocation5 + $0x304] sm:$0xf0] }
  0xd0   :  { %3320 = vmatpush.bf16.msrb.mxu1 %v6182_v61  ;;  %v7624_v61 = vld [vmem:[#allocation5 + $0x264] sm:$0xf0] }
  0xd1   :  { %3333 = vmatpush.bf16.msrb.mxu2 %v6502_v62  ;;  %v5665_v62 = vld [vmem:[#allocation5 + $0x4c0] sm:$0xf]  ;;  %v5346_v11 = vor.u32 %v7624_v61, %v5345_v60 }
  0xd2   :  { %3346 = vmatpush.bf16.msrb.mxu3 %v6822_v2  ;;  %v7784_v2 = vld [vmem:[#allocation5 + $0x764] sm:$0xf0]  ;;  %v5185_v61 = vld [vmem:[#allocation5 + $0x100] sm:$0xf] }
  0xd3   :  { %3308 = vmatpush.bf16.msrb.mxu0 %v5822_v10  ;;  %v6662_v10 = vor.u32 %v7948_v58, %v6659_v59  ;;  %v5986_v14 = vor.u32 %v7784_v2, %v5985_v1  ;;  %v5546_v59 = vor.u32 %v7674_v48, %v5545_v46  ;;  %v7664_v1 = vld [vmem:[#allocation5 + $0x3a4] sm:$0xf0]  ;;  %v5825_v2 = vld [vmem:[#allocation5 + $0x600] sm:$0xf]  ;;  %v5385_v48 = vld [vmem:[#allocation5 + $0x290] sm:$0xf] }
  0xd4   :  { %3321 = vmatpush.bf16.msrb.mxu1 %v6142_v12  ;;  %v3081_v12 = vpop.f32.mrf.mxu2 }
  0xd5   :  { %3334 = vmatpush.bf16.msrb.mxu2 %v6462_v13  ;;  %v5666_v13 = vor.u32 %v7704_v0, %v5665_v62  ;;  %v7584_v62 = vld [vmem:[#allocation5 + $0x124] sm:$0xf0]  ;;  %v6186_v0 = vor.u32 %v7834_v52, %v6185_v51  ;;  %v5145_v12 = vld [vmem:[#allocation5 + $0xb0] sm:$0xf]  ;;  %v7714_v52 = vld [vmem:[#allocation5 + $0x534] sm:$0xf0] }
  0xd6   :  { %3347 = vmatpush.bf16.msrb.mxu3 %v6782_v19  ;;  %v3094_v19 = vpop.f32.mrf.mxu3 }
  0xd7   :  { %3309 = vmatpush.bf16.msrb.mxu0 %v5782_v26  ;;  %v7854_v26 = vld [vmem:[#allocation5 + $0x994] sm:$0xf0] }
  0xd8   :  { %3322 = vmatpush.bf16.msrb.mxu1 %v6102_v28  ;;  %v5626_v28 = vor.u32 %v7694_v21, %v5625_v18  ;;  %v6266_v34 = vor.u32 %v7854_v26, %v6265_v24  ;;  %v5785_v18 = vld [vmem:[#allocation5 + $0x5b0] sm:$0xf]  ;;  %v7734_v19 = vld [vmem:[#allocation5 + $0x5d4] sm:$0xf0] }
  0xd9   :  { %3335 = vmatpush.bf16.msrb.mxu2 %v6422_v29  ;;  %v5946_v29 = vor.u32 %v7774_v23, %v5945_v22  ;;  %v6105_v21 = vld [vmem:[#allocation5 + $0x830] sm:$0xf]  ;;  %v7814_v22 = vld [vmem:[#allocation5 + $0x854] sm:$0xf0]  ;;  %v5786_v30 = vor.u32 %v7734_v19, %v5785_v18  ;;  %v7609_v18 = vld [vmem:[#allocation5 + $0x1f4] sm:$0xf] }
  0xda   :  { %3348 = vmatpush.bf16.msrb.mxu3 %v6742_v36  ;;  %v7684_v36 = vld [vmem:[#allocation5 + $0x444] sm:$0xf0]  ;;  %v6106_v37 = vor.u32 %v7814_v22, %v6105_v21  ;;  %v5307_v19 = vld [vmem:[#allocation5 + $0x218] sm:$0xf0] }
  0xdb   :  { %3310 = vmatpush.bf16.msrb.mxu0 %v5742_v45  ;;  %v5586_v42 = vor.u32 %v7684_v36, %v5585_v33  ;;  %v7594_v45 = vld [vmem:[#allocation5 + $0x174] sm:$0xf0]  ;;  %v7564_v33 = vld [vmem:[#allocation5 + $0x84] sm:$0xf0]  ;;  %v5627_v21 = vld [vmem:[#allocation5 + $0x498] sm:$0xf0] }
  0xdc   :  { %3323 = vmatpush.bf16.msrb.mxu1 %v6062_v49  ;;  %v5865_v49 = vld [vmem:[#allocation5 + $0x650] sm:$0xf] }
  0xdd   :  { %3336 = vmatpush.bf16.msrb.mxu2 %v6382_v50  ;;  %v7754_v50 = vld [vmem:[#allocation5 + $0x674] sm:$0xf0] }
  0xde   :  { %3349 = vmatpush.bf16.msrb.mxu3 %v6702_v55  ;;  %v5226_v55 = vor.u32 %v7594_v45, %v5225_v44  ;;  %v5866_v60 = vor.u32 %v7754_v50, %v5865_v49  ;;  %v5065_v44 = vld [vmem:[#allocation5 + $0x10] sm:$0xf]  ;;  %v7554_v45 = vld [vmem:[#allocation5 + $0x34] sm:$0xf0] }
  0xdf   :  { %3311 = vmatpush.bf16.msrb.mxu0 %v5702_v63  ;;  %v3105_v53 = vpop.f32.mrf.mxu0  ;;  %v5505_v63 = vld [vmem:[#allocation5 + $0x380] sm:$0xf]  ;;  %v7634_v49 = vld [vmem:[#allocation5 + $0x2b4] sm:$0xf0]  ;;  %v5705_v50 = vld [vmem:[#allocation5 + $0x510] sm:$0xf] }
  0xe0   :  { %3324 = vmatpush.bf16.msrb.mxu1 %v6022_v4  ;;  %v3106_v57 = vadd.f32 %v3105_v53, %v8508_v54  ;;  %v3118_v58 = vpop.f32.mrf.mxu1  ;;  %v5186_v54 = vor.u32 %v7584_v62, %v5185_v61  ;;  %v6025_v53 = vld [vmem:[#allocation5 + $0x790] sm:$0xf]  ;;  %v5066_v62 = vor.u32 %v7554_v45, %v5065_v44  ;;  %v7994_v45 = vld [vmem:[#allocation5 + $0xdf4] sm:$0xf0] }
  0xe1   :  { %3337 = vmatpush.bf16.msrb.mxu2 %v6342_v5  ;;  %v6145_v5 = vld [vmem:[#allocation5 + $0x880] sm:$0xf] }
  0xe2   :  { %3350 = vmatpush.bf16.msrb.mxu3 %v6662_v10  ;;  %3312 = vmatmul.bf16.vlgmr.msrb.gmra.mxu0 %v8473_v8  ;;  %v8515_v4 = vadd.f32 %v3118_v58, %v3106_v57  ;;  %v5506_v10 = vor.u32 %v7664_v1, %v5505_v63  ;;  %v6146_v16 = vor.u32 %v7824_v6, %v6145_v5  ;;  %v6625_v58 = vld [vmem:[#allocation5 + $0xc40] sm:$0xf]  ;;  %v8024_v63 = vld [vmem:[#allocation5 + $0xee4] sm:$0xf0]  ;;  %v5347_v1 = vld [vmem:[#allocation5 + $0x268] sm:$0xf0] }
  0xe3   :  { %3356 = vmatpush.bf16.msra.mxu0 %v5346_v11  ;;  %3325 = vmatmul.bf16.vlgmr.msrb.gmra.mxu1 %v8477_v15  ;;  %v5826_v11 = vor.u32 %v7744_v3, %v5825_v2  ;;  %v5386_v2 = vor.u32 %v7634_v49, %v5385_v48  ;;  %v5706_v3 = vor.u32 %v7714_v52, %v5705_v50  ;;  %v7699_v5 = vld [vmem:[#allocation5 + $0x4c4] sm:$0xf]  ;;  %v5667_v6 = vld [vmem:[#allocation5 + $0x4e8] sm:$0xf0]  ;;  %v7669_v48 = vld [vmem:[#allocation5 + $0x3d4] sm:$0xf] }
  0xe4   :  { %3369 = vmatpush.bf16.msra.mxu1 %v5666_v13  ;;  %3338 = vmatmul.bf16.vlgmr.msrb.gmra.mxu2 %v8485_v32  ;;  %v7574_v13 = vld [vmem:[#allocation5 + $0xd4] sm:$0xf0]  ;;  %v5547_v49 = vld [vmem:[#allocation5 + $0x3f8] sm:$0xf0] }
  0xe5   :  { %3382 = vmatpush.bf16.msra.mxu2 %v5986_v14  ;;  %3351 = vmatmul.bf16.vlgmr.msrb.gmra.mxu3 %v8487_v35  ;;  %v5465_v14 = vld [vmem:[#allocation5 + $0x330] sm:$0xf] }
  0xe6   :  { %3395 = vmatpush.bf16.msra.mxu3 %v6306_v20 }
  0xe7   :  { %3357 = vmatpush.bf16.msra.mxu0 %v5306_v27  ;;  %v3131_v20 = vpop.f32.mrf.mxu2  ;;  %v3107_v26 = vpop.f32.mrf.mxu0  ;;  %v5146_v27 = vor.u32 %v7574_v13, %v5145_v12  ;;  %v6585_v12 = vld [vmem:[#allocation5 + $0xbf0] sm:$0xf]  ;;  %v7934_v13 = vld [vmem:[#allocation5 + $0xc14] sm:$0xf0] }
  0xe8   :  { %3370 = vmatpush.bf16.msra.mxu1 %v5626_v28  ;;  %v3132_v23 = vadd.f32 %v3131_v20, %v625_v7  ;;  %v3144_v24 = vpop.f32.mrf.mxu3  ;;  %v3120_v28 = vpop.f32.mrf.mxu1  ;;  %v7689_v20 = vld [vmem:[#allocation5 + $0x474] sm:$0xf]  ;;  %v6586_v22 = vor.u32 %v7934_v13, %v6585_v12  ;;  %v6545_v26 = vld [vmem:[#allocation5 + $0xba0] sm:$0xf]  ;;  %v7974_v13 = vld [vmem:[#allocation5 + $0xd54] sm:$0xf0] }
  0xe9   :  { %3383 = vmatpush.bf16.msra.mxu2 %v5946_v29  ;;  %v5466_v29 = vor.u32 %v7654_v17, %v5465_v14  ;;  %v6905_v14 = vld [vmem:[#allocation5 + $0xe70] sm:$0xf]  ;;  %v8014_v17 = vld [vmem:[#allocation5 + $0xe94] sm:$0xf0]  ;;  %v6865_v28 = vld [vmem:[#allocation5 + $0xe20] sm:$0xf] }
  0xea   :  { %3396 = vmatpush.bf16.msra.mxu3 %v6266_v34  ;;  %v5425_v34 = vld [vmem:[#allocation5 + $0x2e0] sm:$0xf]  ;;  %v8518_v36 = vadd.f32 %v3144_v24, %v3132_v23  ;;  %v6906_v23 = vor.u32 %v8014_v17, %v6905_v14  ;;  %v5310_v24 = vor.u32 %v7609_v18, %v5307_v19  ;;  %v7569_v14 = vld [vmem:[#allocation5 + $0xb4] sm:$0xf] }
  0xeb   :  { %3358 = vmatpush.bf16.msra.mxu0 %v5266_v41  ;;  %v6065_v41 = vld [vmem:[#allocation5 + $0x7e0] sm:$0xf]  ;;  %v5426_v46 = vor.u32 %v7644_v38, %v5425_v34  ;;  %v7679_v34 = vld [vmem:[#allocation5 + $0x424] sm:$0xf]  ;;  %v7649_v19 = vld [vmem:[#allocation5 + $0x334] sm:$0xf] }
  0xec   :  { %3371 = vmatpush.bf16.msra.mxu1 %v5586_v42  ;;  %v7804_v42 = vld [vmem:[#allocation5 + $0x804] sm:$0xf0] }
  0xed   :  { %3384 = vmatpush.bf16.msra.mxu2 %v5906_v43  ;;  %v5106_v43 = vor.u32 %v7564_v33, %v5105_v31  ;;  %v6066_v51 = vor.u32 %v7804_v42, %v6065_v41  ;;  %v7599_v31 = vld [vmem:[#allocation5 + $0x1a4] sm:$0xf]  ;;  %v5267_v33 = vld [vmem:[#allocation5 + $0x1c8] sm:$0xf0]  ;;  %v6505_v41 = vld [vmem:[#allocation5 + $0xb50] sm:$0xf] }
  0xee   :  { %3397 = vmatpush.bf16.msra.mxu3 %v6226_v47  ;;  %v5746_v47 = vor.u32 %v7724_v40, %v5745_v39  ;;  %v5270_v40 = vor.u32 %v7599_v31, %v5267_v33  ;;  %v7914_v42 = vld [vmem:[#allocation5 + $0xb74] sm:$0xf0]  ;;  %v7964_v33 = vld [vmem:[#allocation5 + $0xd04] sm:$0xf0] }
  0xef   :  { %3359 = vmatpush.bf16.msra.mxu0 %v5226_v55  ;;  %v7794_v55 = vld [vmem:[#allocation5 + $0x7b4] sm:$0xf0]  ;;  %v3133_v57 = vpop.f32.mrf.mxu2  ;;  %v6506_v50 = vor.u32 %v7914_v42, %v6505_v41  ;;  %v6345_v41 = vld [vmem:[#allocation5 + $0xa10] sm:$0xf] }
  0xf0   :  { %3372 = vmatpush.bf16.msra.mxu1 %v5546_v59  ;;  %v7944_v59 = vld [vmem:[#allocation5 + $0xc64] sm:$0xf0]  ;;  %v3146_v61 = vpop.f32.mrf.mxu3  ;;  %v6026_v7 = vor.u32 %v7794_v55, %v6025_v53  ;;  %v6465_v55 = vld [vmem:[#allocation5 + $0xb00] sm:$0xf]  ;;  %v7874_v42 = vld [vmem:[#allocation5 + $0xa34] sm:$0xf0] }
  0xf1   :  { %3385 = vmatpush.bf16.msra.mxu2 %v5866_v60  ;;  %v6945_v60 = vld [vmem:[#allocation5 + $0xec0] sm:$0xf]  ;;  %v7904_v57 = vld [vmem:[#allocation5 + $0xb24] sm:$0xf0]  ;;  %v5550_v61 = vor.u32 %v7669_v48, %v5547_v49 }
  0xf2   :  { %3398 = vmatpush.bf16.msra.mxu3 %v6186_v0  ;;  %v7619_v0 = vld [vmem:[#allocation5 + $0x244] sm:$0xf] }
  0xf3   :  { %3360 = vmatpush.bf16.msra.mxu0 %v5186_v54  ;;  %v6626_v54 = vor.u32 %v7944_v59, %v6625_v58  ;;  %v6785_v58 = vld [vmem:[#allocation5 + $0xd80] sm:$0xf] }
  0xf4   :  { %3373 = vmatpush.bf16.msra.mxu1 %v5506_v10  ;;  %v6946_v10 = vor.u32 %v8024_v63, %v6945_v60  ;;  %v7579_v63 = vld [vmem:[#allocation5 + $0x104] sm:$0xf] }
  0xf5   :  { %3386 = vmatpush.bf16.msra.mxu2 %v5826_v11  ;;  %v5350_v11 = vor.u32 %v7619_v0, %v5347_v1  ;;  %v5187_v0 = vld [vmem:[#allocation5 + $0x128] sm:$0xf0]  ;;  %v7659_v1 = vld [vmem:[#allocation5 + $0x384] sm:$0xf] }
  0xf6   :  { %3399 = vmatpush.bf16.msra.mxu3 %v6146_v16  ;;  %v5670_v16 = vor.u32 %v7699_v5, %v5667_v6  ;;  %v6466_v5 = vor.u32 %v7904_v57, %v6465_v55  ;;  %v7779_v55 = vld [vmem:[#allocation5 + $0x744] sm:$0xf]  ;;  %v5987_v57 = vld [vmem:[#allocation5 + $0x768] sm:$0xf0] }
  0xf7   :  { %3361 = vmatpush.bf16.msra.mxu0 %v5146_v27  ;;  %v7924_v27 = vld [vmem:[#allocation5 + $0xbc4] sm:$0xf0] }
  0xf8   :  { %3374 = vmatpush.bf16.msra.mxu1 %v5466_v29  ;;  %v5630_v29 = vor.u32 %v7689_v20, %v5627_v21  ;;  %v6546_v38 = vor.u32 %v7924_v27, %v6545_v26  ;;  %v5467_v20 = vld [vmem:[#allocation5 + $0x358] sm:$0xf0]  ;;  %v6385_v27 = vld [vmem:[#allocation5 + $0xa60] sm:$0xf] }
  0xf9   :  { %3387 = vmatpush.bf16.msra.mxu2 %v5786_v30  ;;  %v8004_v30 = vld [vmem:[#allocation5 + $0xe44] sm:$0xf0]  ;;  %v5470_v31 = vor.u32 %v7649_v19, %v5467_v20 }
  0xfa   :  { %3400 = vmatpush.bf16.msra.mxu3 %v6106_v37  ;;  %v5587_v37 = vld [vmem:[#allocation5 + $0x448] sm:$0xf0]  ;;  %v6866_v39 = vor.u32 %v8004_v30, %v6865_v28  ;;  %v7884_v28 = vld [vmem:[#allocation5 + $0xa84] sm:$0xf0] }
  0xfb   :  { %3362 = vmatpush.bf16.msra.mxu0 %v5106_v43  ;;  %v6825_v43 = vld [vmem:[#allocation5 + $0xdd0] sm:$0xf]  ;;  %v5590_v44 = vor.u32 %v7679_v34, %v5587_v37  ;;  %v7559_v34 = vld [vmem:[#allocation5 + $0x64] sm:$0xf]  ;;  %v5107_v37 = vld [vmem:[#allocation5 + $0x88] sm:$0xf0] }
  0xfc   :  { %3375 = vmatpush.bf16.msra.mxu1 %v5426_v46  ;;  %v7589_v46 = vld [vmem:[#allocation5 + $0x154] sm:$0xf]  ;;  %v6826_v52 = vor.u32 %v7994_v45, %v6825_v43  ;;  %v6665_v45 = vld [vmem:[#allocation5 + $0xc90] sm:$0xf] }
  0xfd   :  { %3388 = vmatpush.bf16.msra.mxu2 %v5746_v47  ;;  %v5227_v47 = vld [vmem:[#allocation5 + $0x178] sm:$0xf0] }
  0xfe   :  { %3401 = vmatpush.bf16.msra.mxu3 %v6066_v51  ;;  %v5230_v53 = vor.u32 %v7589_v46, %v5227_v47  ;;  %v7954_v46 = vld [vmem:[#allocation5 + $0xcb4] sm:$0xf0]  ;;  %v7549_v47 = vld [vmem:[#allocation5 + $0x14] sm:$0xf] }
  0xff   :  { %3363 = vmatpush.bf16.msra.mxu0 %v5066_v62  ;;  %v3157_v51 = vpop.f32.mrf.mxu0  ;;  %v7984_v62 = vld [vmem:[#allocation5 + $0xda4] sm:$0xf0] }
 0x100   :  { %3376 = vmatpush.bf16.msra.mxu1 %v5386_v2  ;;  %v3158_v59 = vadd.f32 %v3157_v51, %v8518_v36  ;;  %v3170_v60 = vpop.f32.mrf.mxu1  ;;  %v5507_v2 = vld [vmem:[#allocation5 + $0x3a8] sm:$0xf0]  ;;  %v6786_v6 = vor.u32 %v7984_v62, %v6785_v58  ;;  %v7629_v51 = vld [vmem:[#allocation5 + $0x294] sm:$0xf]  ;;  %v7859_v58 = vld [vmem:[#allocation5 + $0x9c4] sm:$0xf] }
 0x101   :  { %3389 = vmatpush.bf16.msra.mxu2 %v5706_v3  ;;  %v5510_v36 = vor.u32 %v7659_v1, %v5507_v2  ;;  %v6627_v62 = vld [vmem:[#allocation5 + $0xc68] sm:$0xf0]  ;;  %v8019_v1 = vld [vmem:[#allocation5 + $0xec4] sm:$0xf] }
 0x102   :  { %3402 = vmatpush.bf16.msra.mxu3 %v6026_v7  ;;  %3364 = vmatmul.bf16.vlgmr.msra.gmra.mxu0 %v8475_v9  ;;  %v3171_v3 = vadd.f32 %v3170_v60, %v3158_v59  ;;  %v5190_v7 = vor.u32 %v7579_v63, %v5187_v0  ;;  %v6346_v59 = vor.u32 %v7874_v42, %v6345_v41  ;;  %v6307_v60 = vld [vmem:[#allocation5 + $0x9e8] sm:$0xf0]  ;;  %v626_v41 = vperm.slane %v8505_v56, 2 }
 0x103   :  { %3408 = vmatpush.bf16.msrb.mxu0 %v6626_v54  ;;  %3377 = vmatmul.bf16.vlgmr.msra.gmra.mxu1 %v8482_v25  ;;  %v6425_v54 = vld [vmem:[#allocation5 + $0xab0] sm:$0xf]  ;;  %v6666_v63 = vor.u32 %v7954_v46, %v6665_v45  ;;  %v6947_v2 = vld [vmem:[#allocation5 + $0xee8] sm:$0xf0]  ;;  %v6507_v45 = vld [vmem:[#allocation5 + $0xb78] sm:$0xf0] }
 0x104   :  { %3421 = vmatpush.bf16.msrb.mxu1 %v6946_v10  ;;  %3390 = vmatmul.bf16.vlgmr.msra.gmra.mxu2 %v8473_v8  ;;  %v7894_v10 = vld [vmem:[#allocation5 + $0xad4] sm:$0xf0]  ;;  %v7989_v46 = vld [vmem:[#allocation5 + $0xdd4] sm:$0xf] }
 0x105   :  { %3434 = vmatpush.bf16.msrb.mxu2 %v5350_v11  ;;  %3403 = vmatmul.bf16.vlgmr.msra.gmra.mxu3 %v8477_v15  ;;  %v6745_v11 = vld [vmem:[#allocation5 + $0xd30] sm:$0xf]  ;;  %v6426_v21 = vor.u32 %v7894_v10, %v6425_v54  ;;  %v7769_v54 = vld [vmem:[#allocation5 + $0x6f4] sm:$0xf]  ;;  %v5947_v10 = vld [vmem:[#allocation5 + $0x718] sm:$0xf0] }
 0x106   :  { %3447 = vmatpush.bf16.msrb.mxu3 %v5670_v16  ;;  %v5147_v16 = vld [vmem:[#allocation5 + $0xd8] sm:$0xf0] }
 0x107   :  { %3409 = vmatpush.bf16.msrb.mxu0 %v6586_v22  ;;  %v3183_v12 = vpop.f32.mrf.mxu2  ;;  %v5150_v26 = vor.u32 %v7569_v14, %v5147_v16  ;;  %v6587_v14 = vld [vmem:[#allocation5 + $0xc18] sm:$0xf0]  ;;  %v8009_v16 = vld [vmem:[#allocation5 + $0xe74] sm:$0xf] }
 0x108   :  { %3422 = vmatpush.bf16.msrb.mxu1 %v6906_v23  ;;  %v3184_v17 = vadd.f32 %v3183_v12, %v3171_v3  ;;  %v3196_v18 = vpop.f32.mrf.mxu3  ;;  %v3159_v23 = vpop.f32.mrf.mxu0  ;;  %v6950_v12 = vor.u32 %v8019_v1, %v6947_v2 }
 0x109   :  { %3435 = vmatpush.bf16.msrb.mxu2 %v5310_v24  ;;  %v6746_v24 = vor.u32 %v7974_v13, %v6745_v11  ;;  %v3172_v30 = vpop.f32.mrf.mxu1  ;;  %v7849_v11 = vld [vmem:[#allocation5 + $0x974] sm:$0xf]  ;;  %v5907_v23 = vld [vmem:[#allocation5 + $0x6c8] sm:$0xf0] }
 0x10a   :  { %3448 = vmatpush.bf16.msrb.mxu3 %v5630_v29  ;;  %v8525_v22 = vadd.f32 %v3196_v18, %v3184_v17  ;;  %v6705_v29 = vld [vmem:[#allocation5 + $0xce0] sm:$0xf]  ;;  %v7929_v13 = vld [vmem:[#allocation5 + $0xbf4] sm:$0xf]  ;;  %v6907_v17 = vld [vmem:[#allocation5 + $0xe98] sm:$0xf0]  ;;  %v5950_v18 = vor.u32 %v7769_v54, %v5947_v10 }
 0x10b   :  { %3410 = vmatpush.bf16.msrb.mxu0 %v6546_v38  ;;  %v7639_v38 = vld [vmem:[#allocation5 + $0x2e4] sm:$0xf]  ;;  %v6706_v43 = vor.u32 %v7964_v33, %v6705_v29  ;;  %v6590_v20 = vor.u32 %v7929_v13, %v6587_v14  ;;  %v6547_v29 = vld [vmem:[#allocation5 + $0xbc8] sm:$0xf0] }
 0x10c   :  { %3423 = vmatpush.bf16.msrb.mxu1 %v6866_v39  ;;  %v5427_v39 = vld [vmem:[#allocation5 + $0x308] sm:$0xf0]  ;;  %v7999_v30 = vld [vmem:[#allocation5 + $0xe24] sm:$0xf] }
 0x10d   :  { %3436 = vmatpush.bf16.msrb.mxu2 %v5270_v40  ;;  %v6386_v40 = vor.u32 %v7884_v28, %v6385_v27  ;;  %v5430_v49 = vor.u32 %v7639_v38, %v5427_v39  ;;  %v6227_v27 = vld [vmem:[#allocation5 + $0x948] sm:$0xf0]  ;;  %v7919_v28 = vld [vmem:[#allocation5 + $0xba4] sm:$0xf]  ;;  %v5867_v39 = vld [vmem:[#allocation5 + $0x678] sm:$0xf0] }
 0x10e   :  { %3449 = vmatpush.bf16.msrb.mxu3 %v5590_v44  ;;  %v5110_v44 = vor.u32 %v7559_v34, %v5107_v37  ;;  %v7749_v34 = vld [vmem:[#allocation5 + $0x654] sm:$0xf]  ;;  %v6550_v38 = vor.u32 %v7919_v28, %v6547_v29 }
 0x10f   :  { %3411 = vmatpush.bf16.msrb.mxu0 %v6506_v50  ;;  %v3185_v48 = vpop.f32.mrf.mxu2  ;;  %v5067_v50 = vld [vmem:[#allocation5 + $0x38] sm:$0xf0] }
 0x110   :  { %3424 = vmatpush.bf16.msrb.mxu1 %v6826_v52  ;;  %v5387_v52 = vld [vmem:[#allocation5 + $0x2b8] sm:$0xf0]  ;;  %v5070_v0 = vor.u32 %v7549_v47, %v5067_v50  ;;  %v5870_v48 = vor.u32 %v7749_v34, %v5867_v39  ;;  %v7959_v34 = vld [vmem:[#allocation5 + $0xce4] sm:$0xf]  ;;  %v7709_v39 = vld [vmem:[#allocation5 + $0x514] sm:$0xf] }
 0x111   :  { %3437 = vmatpush.bf16.msrb.mxu2 %v5230_v53  ;;  %v3198_v53 = vpop.f32.mrf.mxu3  ;;  %v5390_v3 = vor.u32 %v7629_v51, %v5387_v52  ;;  %v6827_v47 = vld [vmem:[#allocation5 + $0xdf8] sm:$0xf0]  ;;  %v7739_v52 = vld [vmem:[#allocation5 + $0x604] sm:$0xf] }
 0x112   :  { %3450 = vmatpush.bf16.msrb.mxu3 %v5550_v61  ;;  %v7939_v61 = vld [vmem:[#allocation5 + $0xc44] sm:$0xf]  ;;  %v5827_v53 = vld [vmem:[#allocation5 + $0x628] sm:$0xf0]  ;;  %v6830_v56 = vor.u32 %v7989_v46, %v6827_v47 }
 0x113   :  { %3412 = vmatpush.bf16.msrb.mxu0 %v6466_v5  ;;  %v5990_v5 = vor.u32 %v7779_v55, %v5987_v57  ;;  %v7819_v55 = vld [vmem:[#allocation5 + $0x884] sm:$0xf]  ;;  %v5830_v1 = vor.u32 %v7739_v52, %v5827_v53  ;;  %v5353_v52 = vld [vmem:[#allocation5 + $0x248] sm:$0xf]  ;;  %v7625_v53 = vld [vmem:[#allocation5 + $0x26c] sm:$0xf0] }
 0x114   :  { %3425 = vmatpush.bf16.msrb.mxu1 %v6786_v6  ;;  %v6310_v6 = vor.u32 %v7859_v58, %v6307_v60  ;;  %v7899_v60 = vld [vmem:[#allocation5 + $0xb04] sm:$0xf] }
 0x115   :  { %3438 = vmatpush.bf16.msrb.mxu2 %v5190_v7  ;;  %v6630_v7 = vor.u32 %v7939_v61, %v6627_v62  ;;  %v6467_v61 = vld [vmem:[#allocation5 + $0xb28] sm:$0xf0]  ;;  %v7979_v62 = vld [vmem:[#allocation5 + $0xd84] sm:$0xf] }
 0x116   :  { %3451 = vmatpush.bf16.msrb.mxu3 %v5510_v36  ;;  %v6267_v36 = vld [vmem:[#allocation5 + $0x998] sm:$0xf0] }
 0x117   :  { %3413 = vmatpush.bf16.msrb.mxu0 %v6426_v21  ;;  %v6270_v19 = vor.u32 %v7849_v11, %v6267_v36  ;;  %v7759_v21 = vld [vmem:[#allocation5 + $0x6a4] sm:$0xf]  ;;  %v6107_v11 = vld [vmem:[#allocation5 + $0x858] sm:$0xf0] }
 0x118   :  { %3426 = vmatpush.bf16.msrb.mxu1 %v6746_v24  ;;  %v7839_v24 = vld [vmem:[#allocation5 + $0x924] sm:$0xf]  ;;  %v5910_v33 = vor.u32 %v7759_v21, %v5907_v23  ;;  %v6427_v36 = vld [vmem:[#allocation5 + $0xad8] sm:$0xf0] }
 0x119   :  { %3439 = vmatpush.bf16.msrb.mxu2 %v5150_v26  ;;  %v6910_v26 = vor.u32 %v8009_v16, %v6907_v17  ;;  %v6230_v37 = vor.u32 %v7839_v24, %v6227_v27  ;;  %v7969_v16 = vld [vmem:[#allocation5 + $0xd34] sm:$0xf]  ;;  %v6747_v17 = vld [vmem:[#allocation5 + $0xd58] sm:$0xf0]  ;;  %v7719_v24 = vld [vmem:[#allocation5 + $0x564] sm:$0xf] }
 0x11a   :  { %3452 = vmatpush.bf16.msrb.mxu3 %v5470_v31  ;;  %v6867_v31 = vld [vmem:[#allocation5 + $0xe48] sm:$0xf0]  ;;  %v7799_v27 = vld [vmem:[#allocation5 + $0x7e4] sm:$0xf]  ;;  %v6750_v29 = vor.u32 %v7969_v16, %v6747_v17 }
 0x11b   :  { %3414 = vmatpush.bf16.msrb.mxu0 %v6386_v40  ;;  %v7829_v40 = vld [vmem:[#allocation5 + $0x8d4] sm:$0xf]  ;;  %v6870_v42 = vor.u32 %v7999_v30, %v6867_v31  ;;  %v6067_v30 = vld [vmem:[#allocation5 + $0x808] sm:$0xf0]  ;;  %v7879_v31 = vld [vmem:[#allocation5 + $0xa64] sm:$0xf] }
 0x11c   :  { %3427 = vmatpush.bf16.msrb.mxu1 %v6706_v43  ;;  %v6187_v43 = vld [vmem:[#allocation5 + $0x8f8] sm:$0xf0] }
 0x11d   :  { %3440 = vmatpush.bf16.msrb.mxu2 %v5110_v44  ;;  %v7909_v44 = vld [vmem:[#allocation5 + $0xb54] sm:$0xf]  ;;  %v6190_v50 = vor.u32 %v7829_v40, %v6187_v43  ;;  %v5707_v40 = vld [vmem:[#allocation5 + $0x538] sm:$0xf0] }
 0x11e   :  { %3453 = vmatpush.bf16.msrb.mxu3 %v5430_v49  ;;  %v6510_v51 = vor.u32 %v7909_v44, %v6507_v45  ;;  %v7789_v43 = vld [vmem:[#allocation5 + $0x794] sm:$0xf]  ;;  %v6027_v44 = vld [vmem:[#allocation5 + $0x7b8] sm:$0xf0] }
 0x11f   :  { %3415 = vmatpush.bf16.msrb.mxu0 %v6346_v59  ;;  %v3209_v49 = vpop.f32.mrf.mxu0  ;;  %v6147_v59 = vld [vmem:[#allocation5 + $0x8a8] sm:$0xf0]  ;;  %v7869_v45 = vld [vmem:[#allocation5 + $0xa14] sm:$0xf] }
 0x120   :  { %3428 = vmatpush.bf16.msrb.mxu1 %v6666_v63  ;;  %v3210_v57 = vadd.f32 %v3209_v49, %v626_v41  ;;  %v3222_v58 = vpop.f32.mrf.mxu1  ;;  %v6787_v63 = vld [vmem:[#allocation5 + $0xda8] sm:$0xf0]  ;;  %v6150_v2 = vor.u32 %v7819_v55, %v6147_v59  ;;  %v6070_v41 = vor.u32 %v7799_v27, %v6067_v30  ;;  %v7949_v49 = vld [vmem:[#allocation5 + $0xc94] sm:$0xf]  ;;  %v5673_v55 = vld [vmem:[#allocation5 + $0x4c8] sm:$0xf] }
 0x121   :  { %3441 = vmatpush.bf16.msrb.mxu2 %v5070_v0  ;;  %v6790_v10 = vor.u32 %v7979_v62, %v6787_v63  ;;  %v7785_v59 = vld [vmem:[#allocation5 + $0x76c] sm:$0xf0]  ;;  %v6313_v62 = vld [vmem:[#allocation5 + $0x9c8] sm:$0xf] }
 0x122   :  { %3454 = vmatpush.bf16.msrb.mxu3 %v5390_v3  ;;  %3416 = vmatmul.bf16.vlgmr.msrb.gmra.mxu0 %v8485_v32  ;;  %v3223_v0 = vadd.f32 %v3222_v58, %v3210_v57  ;;  %v6470_v3 = vor.u32 %v7899_v60, %v6467_v61  ;;  %v5710_v57 = vor.u32 %v7709_v39, %v5707_v40  ;;  %v7705_v58 = vld [vmem:[#allocation5 + $0x4ec] sm:$0xf0]  ;;  %v7675_v40 = vld [vmem:[#allocation5 + $0x3fc] sm:$0xf0] }
 0x123   :  { %3460 = vmatpush.bf16.msra.mxu0 %v5990_v5  ;;  %3429 = vmatmul.bf16.vlgmr.msrb.gmra.mxu1 %v8487_v35  ;;  %v7729_v5 = vld [vmem:[#allocation5 + $0x5b4] sm:$0xf]  ;;  %v6030_v60 = vor.u32 %v7789_v43, %v6027_v44  ;;  %v7865_v63 = vld [vmem:[#allocation5 + $0x9ec] sm:$0xf0]  ;;  %v6193_v43 = vld [vmem:[#allocation5 + $0x8d8] sm:$0xf] }
 0x124   :  { %3473 = vmatpush.bf16.msra.mxu1 %v6310_v6  ;;  %3442 = vmatmul.bf16.vlgmr.msrb.gmra.mxu2 %v8475_v9  ;;  %v5787_v6 = vld [vmem:[#allocation5 + $0x5d8] sm:$0xf0]  ;;  %v7765_v27 = vld [vmem:[#allocation5 + $0x6cc] sm:$0xf0]  ;;  %v7835_v44 = vld [vmem:[#allocation5 + $0x8fc] sm:$0xf0] }
 0x125   :  { %3486 = vmatpush.bf16.msra.mxu2 %v6630_v7  ;;  %3455 = vmatmul.bf16.vlgmr.msrb.gmra.mxu3 %v8482_v25  ;;  %v7809_v7 = vld [vmem:[#allocation5 + $0x834] sm:$0xf] }
 0x126   :  { %3499 = vmatpush.bf16.msra.mxu3 %v6950_v12  ;;  %v7889_v12 = vld [vmem:[#allocation5 + $0xab4] sm:$0xf]  ;;  %v6110_v21 = vor.u32 %v7809_v7, %v6107_v11  ;;  %v5633_v7 = vld [vmem:[#allocation5 + $0x478] sm:$0xf] }
 0x127   :  { %3461 = vmatpush.bf16.msra.mxu0 %v5950_v18  ;;  %v3235_v54 = vpop.f32.mrf.mxu2  ;;  %v5790_v18 = vor.u32 %v7729_v5, %v5787_v6  ;;  %v6430_v23 = vor.u32 %v7889_v12, %v6427_v36  ;;  %v5313_v5 = vld [vmem:[#allocation5 + $0x1f8] sm:$0xf]  ;;  %v7615_v6 = vld [vmem:[#allocation5 + $0x21c] sm:$0xf0] }
 0x128   :  { %3474 = vmatpush.bf16.msra.mxu1 %v6270_v19  ;;  %v3236_v13 = vadd.f32 %v3235_v54, %v3223_v0  ;;  %v3248_v14 = vpop.f32.mrf.mxu3  ;;  %v3224_v28 = vpop.f32.mrf.mxu1  ;;  %v6314_v54 = vor.u32 %v7865_v63, %v6313_v62  ;;  %v5953_v11 = vld [vmem:[#allocation5 + $0x6f8] sm:$0xf]  ;;  %v7775_v12 = vld [vmem:[#allocation5 + $0x71c] sm:$0xf0] }
 0x129   :  { %3487 = vmatpush.bf16.msra.mxu2 %v6590_v20  ;;  %v3211_v20 = vpop.f32.mrf.mxu0  ;;  %v6273_v36 = vld [vmem:[#allocation5 + $0x978] sm:$0xf]  ;;  %v5954_v17 = vor.u32 %v7775_v12, %v5953_v11  ;;  %v6233_v28 = vld [vmem:[#allocation5 + $0x928] sm:$0xf]  ;;  %v8541_v62 = vld [vmem:[#allocation7] sm:$0xff] }
 0x12a   :  { %3500 = vmatpush.bf16.msra.mxu3 %v6910_v26  ;;  %v8532_v19 = vadd.f32 %v3248_v14, %v3236_v13  ;;  %v5747_v26 = vld [vmem:[#allocation5 + $0x588] sm:$0xf0]  ;;  %v7855_v13 = vld [vmem:[#allocation5 + $0x99c] sm:$0xf0]  ;;  %v5314_v14 = vor.u32 %v7615_v6, %v5313_v5  ;;  %v7605_v20 = vld [vmem:[#allocation5 + $0x1cc] sm:$0xf0] }
 0x12b   :  { %3462 = vmatpush.bf16.msra.mxu0 %v5910_v33  ;;  %v6387_v33 = vld [vmem:[#allocation5 + $0xa88] sm:$0xf0]  ;;  %v5473_v5 = vld [vmem:[#allocation5 + $0x338] sm:$0xf] }
 0x12c   :  { %3475 = vmatpush.bf16.msra.mxu1 %v6230_v37  ;;  %v6707_v37 = vld [vmem:[#allocation5 + $0xd08] sm:$0xf0]  ;;  %v6113_v12 = vld [vmem:[#allocation5 + $0x838] sm:$0xf] }
 0x12d   :  { %3488 = vmatpush.bf16.msra.mxu2 %v6550_v38  ;;  %v5750_v38 = vor.u32 %v7719_v24, %v5747_v26  ;;  %v6710_v47 = vor.u32 %v7959_v34, %v6707_v37  ;;  %v7685_v24 = vld [vmem:[#allocation5 + $0x44c] sm:$0xf0]  ;;  %v5913_v26 = vld [vmem:[#allocation5 + $0x6a8] sm:$0xf]  ;;  %v5233_v34 = vld [vmem:[#allocation5 + $0x158] sm:$0xf] }
 0x12e   :  { %3501 = vmatpush.bf16.msra.mxu3 %v6870_v42  ;;  %v6390_v42 = vor.u32 %v7879_v31, %v6387_v33  ;;  %v5914_v33 = vor.u32 %v7765_v27, %v5913_v26  ;;  %v7595_v37 = vld [vmem:[#allocation5 + $0x17c] sm:$0xf0]  ;;  %v5433_v26 = vld [vmem:[#allocation5 + $0x2e8] sm:$0xf] }
 0x12f   :  { %3463 = vmatpush.bf16.msra.mxu0 %v5870_v48  ;;  %v3237_v46 = vpop.f32.mrf.mxu2  ;;  %v6347_v48 = vld [vmem:[#allocation5 + $0xa38] sm:$0xf0] }
 0x130   :  { %3476 = vmatpush.bf16.msra.mxu1 %v6190_v50  ;;  %v6667_v50 = vld [vmem:[#allocation5 + $0xcb8] sm:$0xf0]  ;;  %v6350_v61 = vor.u32 %v7869_v45, %v6347_v48  ;;  %v5234_v46 = vor.u32 %v7595_v37, %v5233_v34  ;;  %v7805_v34 = vld [vmem:[#allocation5 + $0x80c] sm:$0xf0] }
 0x131   :  { %3489 = vmatpush.bf16.msra.mxu2 %v6510_v51  ;;  %v3250_v51 = vpop.f32.mrf.mxu3  ;;  %v6670_v0 = vor.u32 %v7949_v49, %v6667_v50 }
 0x132   :  { %3502 = vmatpush.bf16.msra.mxu3 %v6830_v56  ;;  %v5993_v56 = vld [vmem:[#allocation5 + $0x748] sm:$0xf] }
 0x133   :  { %3464 = vmatpush.bf16.msra.mxu0 %v5830_v1  ;;  %v5354_v1 = vor.u32 %v7625_v53, %v5353_v52  ;;  %v5193_v51 = vld [vmem:[#allocation5 + $0x108] sm:$0xf]  ;;  %v7585_v52 = vld [vmem:[#allocation5 + $0x12c] sm:$0xf0] }
 0x134   :  { %3477 = vmatpush.bf16.msra.mxu1 %v6150_v2  ;;  %v5674_v2 = vor.u32 %v7705_v58, %v5673_v55  ;;  %v5513_v53 = vld [vmem:[#allocation5 + $0x388] sm:$0xf]  ;;  %v6194_v55 = vor.u32 %v7835_v44, %v6193_v43  ;;  %v5194_v63 = vor.u32 %v7585_v52, %v5193_v51  ;;  %v7635_v43 = vld [vmem:[#allocation5 + $0x2bc] sm:$0xf0]  ;;  %v5713_v44 = vld [vmem:[#allocation5 + $0x518] sm:$0xf] }
 0x135   :  { %3490 = vmatpush.bf16.msra.mxu2 %v6470_v3  ;;  %v5994_v3 = vor.u32 %v7785_v59, %v5993_v56  ;;  %v5833_v58 = vld [vmem:[#allocation5 + $0x608] sm:$0xf]  ;;  %v7745_v56 = vld [vmem:[#allocation5 + $0x62c] sm:$0xf0] }
 0x136   :  { %3503 = vmatpush.bf16.msra.mxu3 %v6790_v10  ;;  %v7695_v10 = vld [vmem:[#allocation5 + $0x49c] sm:$0xf0]  ;;  %v7945_v51 = vld [vmem:[#allocation5 + $0xc6c] sm:$0xf0]  ;;  %v6953_v52 = vld [vmem:[#allocation5 + $0xec8] sm:$0xf] }
 0x137   :  { %3465 = vmatpush.bf16.msra.mxu0 %v5790_v18  ;;  %v5634_v16 = vor.u32 %v7695_v10, %v5633_v7  ;;  %v5273_v18 = vld [vmem:[#allocation5 + $0x1a8] sm:$0xf]  ;;  %v7655_v7 = vld [vmem:[#allocation5 + $0x35c] sm:$0xf0] }
 0x138   :  { %3478 = vmatpush.bf16.msra.mxu1 %v6110_v21  ;;  %v5593_v21 = vld [vmem:[#allocation5 + $0x428] sm:$0xf]  ;;  %v5274_v30 = vor.u32 %v7605_v20, %v5273_v18  ;;  %v7735_v10 = vld [vmem:[#allocation5 + $0x5dc] sm:$0xf0]  ;;  %v5474_v20 = vor.u32 %v7655_v7, %v5473_v5  ;;  %v6593_v5 = vld [vmem:[#allocation5 + $0xbf8] sm:$0xf] }
 0x139   :  { %3491 = vmatpush.bf16.msra.mxu2 %v6430_v23  ;;  %v6274_v23 = vor.u32 %v7855_v13, %v6273_v36  ;;  %v5594_v31 = vor.u32 %v7685_v24, %v5593_v21  ;;  %v7815_v36 = vld [vmem:[#allocation5 + $0x85c] sm:$0xf0]  ;;  %v7565_v24 = vld [vmem:[#allocation5 + $0x8c] sm:$0xf0]  ;;  %v6913_v7 = vld [vmem:[#allocation5 + $0xe78] sm:$0xf] }
 0x13a   :  { %3504 = vmatpush.bf16.msra.mxu3 %v6750_v29  ;;  %v7845_v29 = vld [vmem:[#allocation5 + $0x94c] sm:$0xf0] }
 0x13b   :  { %3466 = vmatpush.bf16.msra.mxu0 %v5750_v38  ;;  %v5553_v38 = vld [vmem:[#allocation5 + $0x3d8] sm:$0xf]  ;;  %v6234_v39 = vor.u32 %v7845_v29, %v6233_v28  ;;  %v6114_v28 = vor.u32 %v7815_v36, %v6113_v12  ;;  %v7645_v29 = vld [vmem:[#allocation5 + $0x30c] sm:$0xf0]  ;;  %v5315_v12 = vld [vmem:[#allocation5 + $0x220] sm:$0xf0] }
 0x13c   :  { %3479 = vmatpush.bf16.msra.mxu1 %v6070_v41  ;;  %v5873_v41 = vld [vmem:[#allocation5 + $0x658] sm:$0xf]  ;;  %v5554_v49 = vor.u32 %v7675_v40, %v5553_v38  ;;  %v5434_v40 = vor.u32 %v7645_v29, %v5433_v26  ;;  %v7690_v36 = vld [vmem:[#allocation5 + $0x47c] sm:$0xf]  ;;  %v7600_v26 = vld [vmem:[#allocation5 + $0x1ac] sm:$0xf] }
 0x13d   :  { %3492 = vmatpush.bf16.msra.mxu2 %v6390_v42  ;;  %v7755_v42 = vld [vmem:[#allocation5 + $0x67c] sm:$0xf0]  ;;  %v5073_v38 = vld [vmem:[#allocation5 + $0x18] sm:$0xf]  ;;  %v7680_v29 = vld [vmem:[#allocation5 + $0x42c] sm:$0xf] }
 0x13e   :  { %3505 = vmatpush.bf16.msra.mxu3 %v6710_v47  ;;  %v5874_v50 = vor.u32 %v7755_v42, %v5873_v41  ;;  %v5393_v42 = vld [vmem:[#allocation5 + $0x298] sm:$0xf] }
 0x13f   :  { %3467 = vmatpush.bf16.msra.mxu0 %v5710_v57  ;;  %v3261_v45 = vpop.f32.mrf.mxu0  ;;  %v7665_v57 = vld [vmem:[#allocation5 + $0x3ac] sm:$0xf0] }
 0x140   :  { %3480 = vmatpush.bf16.msra.mxu1 %v6030_v60  ;;  %v3262_v47 = vadd.f32 %v3261_v45, %v8532_v19  ;;  %v3274_v48 = vpop.f32.mrf.mxu1  ;;  %v6153_v60 = vld [vmem:[#allocation5 + $0x888] sm:$0xf]  ;;  %v627_v19 = vperm.slane %v8541_v62, 3 }
 0x141   :  { %3493 = vmatpush.bf16.msra.mxu2 %v6350_v61  ;;  %v7825_v61 = vld [vmem:[#allocation5 + $0x8ac] sm:$0xf0] }
 0x142   :  { %3506 = vmatpush.bf16.msra.mxu3 %v6670_v0  ;;  %3468 = vmatmul.bf16.vlgmr.msra.gmra.mxu0 %v8473_v8  ;;  %v8539_v59 = vadd.f32 %v3274_v48, %v3262_v47  ;;  %v5514_v0 = vor.u32 %v7665_v57, %v5513_v53  ;;  %v6154_v6 = vor.u32 %v7825_v61, %v6153_v60  ;;  %v6033_v47 = vld [vmem:[#allocation5 + $0x798] sm:$0xf]  ;;  %v7795_v48 = vld [vmem:[#allocation5 + $0x7bc] sm:$0xf0]  ;;  %v8025_v57 = vld [vmem:[#allocation5 + $0xeec] sm:$0xf0] }
 0x143   :  { %3512 = vmatpush.bf16.msrb.mxu0 %v5354_v1  ;;  %3481 = vmatmul.bf16.vlgmr.msra.gmra.mxu1 %v8477_v15  ;;  %v5834_v1 = vor.u32 %v7745_v56, %v5833_v58  ;;  %v7620_v58 = vld [vmem:[#allocation5 + $0x24c] sm:$0xf]  ;;  %v5355_v56 = vld [vmem:[#allocation5 + $0x270] sm:$0xf0]  ;;  %v5394_v60 = vor.u32 %v7635_v43, %v5393_v42  ;;  %v7590_v42 = vld [vmem:[#allocation5 + $0x15c] sm:$0xf] }
 0x144   :  { %3525 = vmatpush.bf16.msrb.mxu1 %v5674_v2  ;;  %3494 = vmatmul.bf16.vlgmr.msra.gmra.mxu2 %v8485_v32  ;;  %v5153_v2 = vld [vmem:[#allocation5 + $0xb8] sm:$0xf]  ;;  %v5235_v43 = vld [vmem:[#allocation5 + $0x180] sm:$0xf0] }
 0x145   :  { %3538 = vmatpush.bf16.msrb.mxu2 %v5994_v3  ;;  %3507 = vmatmul.bf16.vlgmr.msra.gmra.mxu3 %v8487_v35  ;;  %v7575_v3 = vld [vmem:[#allocation5 + $0xdc] sm:$0xf0] }
 0x146   :  { %3551 = vmatpush.bf16.msrb.mxu3 %v6314_v54  ;;  %v5793_v54 = vld [vmem:[#allocation5 + $0x5b8] sm:$0xf] }
 0x147   :  { %3513 = vmatpush.bf16.msrb.mxu0 %v5314_v14  ;;  %v3287_v11 = vpop.f32.mrf.mxu2  ;;  %v5794_v21 = vor.u32 %v7735_v10, %v5793_v54  ;;  %v8015_v10 = vld [vmem:[#allocation5 + $0xe9c] sm:$0xf0] }
 0x148   :  { %3526 = vmatpush.bf16.msrb.mxu1 %v5634_v16  ;;  %v3288_v13 = vadd.f32 %v3287_v11, %v627_v19  ;;  %v3300_v14 = vpop.f32.mrf.mxu3  ;;  %v3263_v16 = vpop.f32.mrf.mxu0  ;;  %v7700_v19 = vld [vmem:[#allocation5 + $0x4cc] sm:$0xf]  ;;  %v7610_v11 = vld [vmem:[#allocation5 + $0x1fc] sm:$0xf] }
 0x149   :  { %3539 = vmatpush.bf16.msrb.mxu2 %v5954_v17  ;;  %v5154_v17 = vor.u32 %v7575_v3, %v5153_v2  ;;  %v3276_v18 = vpop.f32.mrf.mxu1  ;;  %v6954_v2 = vor.u32 %v8025_v57, %v6953_v52  ;;  %v5358_v3 = vor.u32 %v7620_v58, %v5355_v56  ;;  %v6914_v16 = vor.u32 %v8015_v10, %v6913_v7  ;;  %v6793_v52 = vld [vmem:[#allocation5 + $0xd88] sm:$0xf]  ;;  %v7985_v58 = vld [vmem:[#allocation5 + $0xdac] sm:$0xf0]  ;;  %v7580_v56 = vld [vmem:[#allocation5 + $0x10c] sm:$0xf] }
 0x14a   :  { %3552 = vmatpush.bf16.msrb.mxu3 %v6274_v23  ;;  %v5113_v23 = vld [vmem:[#allocation5 + $0x68] sm:$0xf]  ;;  %v8544_v27 = vadd.f32 %v3300_v14, %v3288_v13  ;;  %v5635_v13 = vld [vmem:[#allocation5 + $0x4a0] sm:$0xf0]  ;;  %v7570_v10 = vld [vmem:[#allocation5 + $0xbc] sm:$0xf] }
 0x14b   :  { %3514 = vmatpush.bf16.msrb.mxu0 %v5274_v30  ;;  %v5753_v30 = vld [vmem:[#allocation5 + $0x568] sm:$0xf]  ;;  %v5114_v37 = vor.u32 %v7565_v24, %v5113_v23  ;;  %v5638_v23 = vor.u32 %v7690_v36, %v5635_v13  ;;  %v8005_v24 = vld [vmem:[#allocation5 + $0xe4c] sm:$0xf0]  ;;  %v7650_v13 = vld [vmem:[#allocation5 + $0x33c] sm:$0xf] }
 0x14c   :  { %3527 = vmatpush.bf16.msrb.mxu1 %v5594_v31  ;;  %v7725_v31 = vld [vmem:[#allocation5 + $0x58c] sm:$0xf0]  ;;  %v6553_v18 = vld [vmem:[#allocation5 + $0xba8] sm:$0xf] }
 0x14d   :  { %3540 = vmatpush.bf16.msrb.mxu2 %v5914_v33  ;;  %v6073_v33 = vld [vmem:[#allocation5 + $0x7e8] sm:$0xf]  ;;  %v5754_v41 = vor.u32 %v7725_v31, %v5753_v30  ;;  %v5595_v30 = vld [vmem:[#allocation5 + $0x450] sm:$0xf0] }
 0x14e   :  { %3553 = vmatpush.bf16.msrb.mxu3 %v6234_v39  ;;  %v7555_v39 = vld [vmem:[#allocation5 + $0x3c] sm:$0xf0]  ;;  %v6074_v45 = vor.u32 %v7805_v34, %v6073_v33 }
 0x14f   :  { %3515 = vmatpush.bf16.msrb.mxu0 %v5234_v46  ;;  %v7715_v46 = vld [vmem:[#allocation5 + $0x53c] sm:$0xf0] }
 0x150   :  { %3528 = vmatpush.bf16.msrb.mxu1 %v5554_v49  ;;  %v3289_v49 = vpop.f32.mrf.mxu2  ;;  %v3302_v53 = vpop.f32.mrf.mxu3  ;;  %v5714_v61 = vor.u32 %v7715_v46, %v5713_v44  ;;  %v7670_v44 = vld [vmem:[#allocation5 + $0x3dc] sm:$0xf] }
 0x151   :  { %3541 = vmatpush.bf16.msrb.mxu2 %v5874_v50  ;;  %v6633_v50 = vld [vmem:[#allocation5 + $0xc48] sm:$0xf]  ;;  %v5238_v49 = vor.u32 %v7590_v42, %v5235_v43  ;;  %v6673_v43 = vld [vmem:[#allocation5 + $0xc98] sm:$0xf] }
 0x152   :  { %3554 = vmatpush.bf16.msrb.mxu3 %v6194_v55  ;;  %v5074_v55 = vor.u32 %v7555_v39, %v5073_v38  ;;  %v7915_v38 = vld [vmem:[#allocation5 + $0xb7c] sm:$0xf0]  ;;  %v6833_v39 = vld [vmem:[#allocation5 + $0xdd8] sm:$0xf] }
 0x153   :  { %3516 = vmatpush.bf16.msrb.mxu0 %v5194_v63  ;;  %v5675_v63 = vld [vmem:[#allocation5 + $0x4f0] sm:$0xf0] }
 0x154   :  { %3529 = vmatpush.bf16.msrb.mxu1 %v5514_v0  ;;  %v6034_v0 = vor.u32 %v7795_v48, %v6033_v47  ;;  %v5678_v54 = vor.u32 %v7700_v19, %v5675_v63  ;;  %v5515_v19 = vld [vmem:[#allocation5 + $0x3b0] sm:$0xf0] }
 0x155   :  { %3542 = vmatpush.bf16.msrb.mxu2 %v5834_v1  ;;  %v6634_v1 = vor.u32 %v7945_v51, %v6633_v50  ;;  %v6473_v50 = vld [vmem:[#allocation5 + $0xb08] sm:$0xf]  ;;  %v7905_v51 = vld [vmem:[#allocation5 + $0xb2c] sm:$0xf0] }
 0x156   :  { %3555 = vmatpush.bf16.msrb.mxu3 %v6154_v6  ;;  %v7935_v6 = vld [vmem:[#allocation5 + $0xc1c] sm:$0xf0] }
 0x157   :  { %3517 = vmatpush.bf16.msrb.mxu0 %v5154_v17  ;;  %v6594_v14 = vor.u32 %v7935_v6, %v6593_v5  ;;  %v5318_v17 = vor.u32 %v7610_v11, %v5315_v12  ;;  %v7895_v5 = vld [vmem:[#allocation5 + $0xadc] sm:$0xf0]  ;;  %v6753_v6 = vld [vmem:[#allocation5 + $0xd38] sm:$0xf]  ;;  %v5155_v11 = vld [vmem:[#allocation5 + $0xe0] sm:$0xf0] }
 0x158   :  { %3530 = vmatpush.bf16.msrb.mxu1 %v5474_v20  ;;  %v7925_v20 = vld [vmem:[#allocation5 + $0xbcc] sm:$0xf0] }
 0x159   :  { %3543 = vmatpush.bf16.msrb.mxu2 %v5794_v21  ;;  %v6873_v21 = vld [vmem:[#allocation5 + $0xe28] sm:$0xf]  ;;  %v6554_v31 = vor.u32 %v7925_v20, %v6553_v18 }
 0x15a   :  { %3556 = vmatpush.bf16.msrb.mxu3 %v6114_v28  ;;  %v5275_v28 = vld [vmem:[#allocation5 + $0x1d0] sm:$0xf0]  ;;  %v6874_v33 = vor.u32 %v8005_v24, %v6873_v21  ;;  %v5158_v21 = vor.u32 %v7570_v10, %v5155_v11  ;;  %v7885_v24 = vld [vmem:[#allocation5 + $0xa8c] sm:$0xf0]  ;;  %v6275_v10 = vld [vmem:[#allocation5 + $0x9a0] sm:$0xf0] }
 0x15b   :  { %3518 = vmatpush.bf16.msrb.mxu0 %v5114_v37  ;;  %v5278_v34 = vor.u32 %v7600_v26, %v5275_v28  ;;  %v6513_v37 = vld [vmem:[#allocation5 + $0xb58] sm:$0xf]  ;;  %v6713_v26 = vld [vmem:[#allocation5 + $0xce8] sm:$0xf]  ;;  %v7930_v11 = vld [vmem:[#allocation5 + $0xbfc] sm:$0xf] }
 0x15c   :  { %3531 = vmatpush.bf16.msrb.mxu1 %v5434_v40  ;;  %v5598_v40 = vor.u32 %v7680_v29, %v5595_v30  ;;  %v6514_v46 = vor.u32 %v7915_v38, %v6513_v37  ;;  %v7965_v30 = vld [vmem:[#allocation5 + $0xd0c] sm:$0xf0]  ;;  %v5435_v37 = vld [vmem:[#allocation5 + $0x310] sm:$0xf0] }
 0x15d   :  { %3544 = vmatpush.bf16.msrb.mxu2 %v5754_v41  ;;  %v7995_v41 = vld [vmem:[#allocation5 + $0xdfc] sm:$0xf0] }
 0x15e   :  { %3557 = vmatpush.bf16.msrb.mxu3 %v6074_v45  ;;  %v5555_v45 = vld [vmem:[#allocation5 + $0x400] sm:$0xf0]  ;;  %v6834_v48 = vor.u32 %v7995_v41, %v6833_v39  ;;  %v6353_v39 = vld [vmem:[#allocation5 + $0xa18] sm:$0xf]  ;;  %v6714_v41 = vor.u32 %v7965_v30, %v6713_v26  ;;  %v6235_v26 = vld [vmem:[#allocation5 + $0x950] sm:$0xf0] }
 0x15f   :  { %3519 = vmatpush.bf16.msrb.mxu0 %v5074_v55  ;;  %v3313_v47 = vpop.f32.mrf.mxu0  ;;  %v5558_v57 = vor.u32 %v7670_v44, %v5555_v45  ;;  %v7955_v44 = vld [vmem:[#allocation5 + $0xcbc] sm:$0xf0]  ;;  %v7550_v45 = vld [vmem:[#allocation5 + $0x1c] sm:$0xf]  ;;  %v8000_v30 = vld [vmem:[#allocation5 + $0xe2c] sm:$0xf] }
 0x160   :  { %3532 = vmatpush.bf16.msrb.mxu1 %v5394_v60  ;;  %v3314_v53 = vadd.f32 %v3313_v47, %v8544_v27  ;;  %v3326_v55 = vpop.f32.mrf.mxu1  ;;  %v5195_v60 = vld [vmem:[#allocation5 + $0x130] sm:$0xf0] }
 0x161   :  { %3545 = vmatpush.bf16.msrb.mxu2 %v5714_v61  ;;  %v7660_v61 = vld [vmem:[#allocation5 + $0x38c] sm:$0xf] }
 0x162   :  { %3558 = vmatpush.bf16.msrb.mxu3 %v6034_v0  ;;  %3520 = vmatmul.bf16.vlgmr.msrb.gmra.mxu0 %v8475_v9  ;;  %v3327_v63 = vadd.f32 %v3326_v55, %v3314_v53  ;;  %v6474_v0 = vor.u32 %v7905_v51, %v6473_v50  ;;  %v5518_v27 = vor.u32 %v7660_v61, %v5515_v19  ;;  %v5395_v50 = vld [vmem:[#allocation5 + $0x2c0] sm:$0xf0]  ;;  %v5995_v53 = vld [vmem:[#allocation5 + $0x770] sm:$0xf0]  ;;  %v7860_v55 = vld [vmem:[#allocation5 + $0x9cc] sm:$0xf] }
 0x163   :  { %3564 = vmatpush.bf16.msra.mxu0 %v6634_v1  ;;  %3533 = vmatmul.bf16.vlgmr.msrb.gmra.mxu1 %v8482_v25  ;;  %v6794_v1 = vor.u32 %v7985_v58, %v6793_v52  ;;  %v7780_v52 = vld [vmem:[#allocation5 + $0x74c] sm:$0xf]  ;;  %v6315_v58 = vld [vmem:[#allocation5 + $0x9f0] sm:$0xf0]  ;;  %v6674_v61 = vor.u32 %v7955_v44, %v6673_v43  ;;  %v6195_v43 = vld [vmem:[#allocation5 + $0x900] sm:$0xf0] }
 0x164   :  { %3577 = vmatpush.bf16.msra.mxu1 %v6954_v2  ;;  %3546 = vmatmul.bf16.vlgmr.msrb.gmra.mxu2 %v8473_v8  ;;  %v5198_v2 = vor.u32 %v7580_v56, %v5195_v60  ;;  %v7940_v56 = vld [vmem:[#allocation5 + $0xc4c] sm:$0xf]  ;;  %v6635_v60 = vld [vmem:[#allocation5 + $0xc70] sm:$0xf0]  ;;  %v7910_v44 = vld [vmem:[#allocation5 + $0xb5c] sm:$0xf] }
 0x165   :  { %3590 = vmatpush.bf16.msra.mxu2 %v5358_v3  ;;  %3559 = vmatmul.bf16.vlgmr.msrb.gmra.mxu3 %v8477_v15  ;;  %v6433_v3 = vld [vmem:[#allocation5 + $0xab8] sm:$0xf] }
 0x166   :  { %3603 = vmatpush.bf16.msra.mxu3 %v5678_v54  ;;  %v7975_v54 = vld [vmem:[#allocation5 + $0xd5c] sm:$0xf0] }
 0x167   :  { %3565 = vmatpush.bf16.msra.mxu0 %v6594_v14  ;;  %v3339_v7 = vpop.f32.mrf.mxu2  ;;  %v5475_v14 = vld [vmem:[#allocation5 + $0x360] sm:$0xf0]  ;;  %v3315_v18 = vpop.f32.mrf.mxu0  ;;  %v6754_v20 = vor.u32 %v7975_v54, %v6753_v6  ;;  %v7770_v6 = vld [vmem:[#allocation5 + $0x6fc] sm:$0xf] }
 0x168   :  { %3578 = vmatpush.bf16.msra.mxu1 %v6914_v16  ;;  %v3340_v12 = vadd.f32 %v3339_v7, %v3327_v63  ;;  %v3352_v36 = vpop.f32.mrf.mxu3  ;;  %v6434_v16 = vor.u32 %v7895_v5, %v6433_v3  ;;  %v3328_v28 = vpop.f32.mrf.mxu1  ;;  %v5478_v29 = vor.u32 %v7650_v13, %v5475_v14  ;;  %v8020_v63 = vld [vmem:[#allocation5 + $0xecc] sm:$0xf]  ;;  %v6318_v3 = vor.u32 %v7860_v55, %v6315_v58  ;;  %v5955_v7 = vld [vmem:[#allocation5 + $0x720] sm:$0xf0] }
 0x169   :  { %3591 = vmatpush.bf16.msra.mxu2 %v5318_v17  ;;  %v6638_v5 = vor.u32 %v7940_v56, %v6635_v60  ;;  %v6915_v13 = vld [vmem:[#allocation5 + $0xea0] sm:$0xf0]  ;;  %v5958_v14 = vor.u32 %v7770_v6, %v5955_v7  ;;  %v7920_v28 = vld [vmem:[#allocation5 + $0xbac] sm:$0xf]  ;;  %v6155_v60 = vld [vmem:[#allocation5 + $0x8b0] sm:$0xf0] }
 0x16a   :  { %3604 = vmatpush.bf16.msra.mxu3 %v5638_v23  ;;  %v8551_v17 = vadd.f32 %v3352_v36, %v3340_v12  ;;  %v6393_v23 = vld [vmem:[#allocation5 + $0xa68] sm:$0xf]  ;;  %v6595_v12 = vld [vmem:[#allocation5 + $0xc20] sm:$0xf0]  ;;  %v8010_v36 = vld [vmem:[#allocation5 + $0xe7c] sm:$0xf] }
 0x16b   :  { %3566 = vmatpush.bf16.msra.mxu0 %v6554_v31  ;;  %v7560_v31 = vld [vmem:[#allocation5 + $0x6c] sm:$0xf]  ;;  %v6394_v38 = vor.u32 %v7885_v24, %v6393_v23  ;;  %v6598_v18 = vor.u32 %v7930_v11, %v6595_v12  ;;  %v6918_v24 = vor.u32 %v8010_v36, %v6915_v13  ;;  %v7730_v6 = vld [vmem:[#allocation5 + $0x5bc] sm:$0xf]  ;;  %v5795_v7 = vld [vmem:[#allocation5 + $0x5e0] sm:$0xf0] }
 0x16c   :  { %3579 = vmatpush.bf16.msra.mxu1 %v6874_v33  ;;  %v5115_v33 = vld [vmem:[#allocation5 + $0x90] sm:$0xf0]  ;;  %v7840_v23 = vld [vmem:[#allocation5 + $0x92c] sm:$0xf]  ;;  %v6115_v11 = vld [vmem:[#allocation5 + $0x860] sm:$0xf0] }
 0x16d   :  { %3592 = vmatpush.bf16.msra.mxu2 %v5278_v34  ;;  %v7640_v34 = vld [vmem:[#allocation5 + $0x2ec] sm:$0xf]  ;;  %v5118_v42 = vor.u32 %v7560_v31, %v5115_v33  ;;  %v6875_v31 = vld [vmem:[#allocation5 + $0xe50] sm:$0xf0]  ;;  %v7890_v12 = vld [vmem:[#allocation5 + $0xabc] sm:$0xf] }
 0x16e   :  { %3605 = vmatpush.bf16.msra.mxu3 %v5598_v40  ;;  %v7875_v40 = vld [vmem:[#allocation5 + $0xa3c] sm:$0xf0]  ;;  %v5438_v47 = vor.u32 %v7640_v34, %v5435_v37  ;;  %v7750_v34 = vld [vmem:[#allocation5 + $0x65c] sm:$0xf]  ;;  %v6238_v37 = vor.u32 %v7840_v23, %v6235_v26  ;;  %v7820_v55 = vld [vmem:[#allocation5 + $0x88c] sm:$0xf] }
 0x16f   :  { %3567 = vmatpush.bf16.msra.mxu0 %v6514_v46  ;;  %v3341_v46 = vpop.f32.mrf.mxu2  ;;  %v6435_v36 = vld [vmem:[#allocation5 + $0xae0] sm:$0xf0] }
 0x170   :  { %3580 = vmatpush.bf16.msra.mxu1 %v6834_v48  ;;  %v5075_v48 = vld [vmem:[#allocation5 + $0x40] sm:$0xf0]  ;;  %v3354_v51 = vpop.f32.mrf.mxu3  ;;  %v7990_v46 = vld [vmem:[#allocation5 + $0xddc] sm:$0xf]  ;;  %v6438_v26 = vor.u32 %v7890_v12, %v6435_v36  ;;  %v7696_v36 = vld [vmem:[#allocation5 + $0x4a4] sm:$0xf0] }
 0x171   :  { %3593 = vmatpush.bf16.msra.mxu2 %v5238_v49  ;;  %v7630_v49 = vld [vmem:[#allocation5 + $0x29c] sm:$0xf]  ;;  %v5078_v19 = vor.u32 %v7550_v45, %v5075_v48  ;;  %v6515_v45 = vld [vmem:[#allocation5 + $0xb80] sm:$0xf0] }
 0x172   :  { %3606 = vmatpush.bf16.msra.mxu3 %v5558_v57  ;;  %v6354_v57 = vor.u32 %v7875_v40, %v6353_v39  ;;  %v5875_v39 = vld [vmem:[#allocation5 + $0x680] sm:$0xf0]  ;;  %v7830_v40 = vld [vmem:[#allocation5 + $0x8dc] sm:$0xf]  ;;  %v6518_v51 = vor.u32 %v7910_v44, %v6515_v45 }
 0x173   :  { %3568 = vmatpush.bf16.msra.mxu0 %v6474_v0  ;;  %v6955_v0 = vld [vmem:[#allocation5 + $0xef0] sm:$0xf0]  ;;  %v5878_v48 = vor.u32 %v7750_v34, %v5875_v39  ;;  %v7960_v39 = vld [vmem:[#allocation5 + $0xcec] sm:$0xf] }
 0x174   :  { %3581 = vmatpush.bf16.msra.mxu1 %v6794_v1  ;;  %v5398_v1 = vor.u32 %v7630_v49, %v5395_v50  ;;  %v6958_v54 = vor.u32 %v8020_v63, %v6955_v0  ;;  %v6198_v50 = vor.u32 %v7830_v40, %v6195_v43  ;;  %v7980_v63 = vld [vmem:[#allocation5 + $0xd8c] sm:$0xf]  ;;  %v6795_v0 = vld [vmem:[#allocation5 + $0xdb0] sm:$0xf0]  ;;  %v5715_v43 = vld [vmem:[#allocation5 + $0x540] sm:$0xf0] }
 0x175   :  { %3594 = vmatpush.bf16.msra.mxu2 %v5198_v2  ;;  %v5998_v2 = vor.u32 %v7780_v52, %v5995_v53  ;;  %v7740_v52 = vld [vmem:[#allocation5 + $0x60c] sm:$0xf]  ;;  %v5835_v53 = vld [vmem:[#allocation5 + $0x630] sm:$0xf0] }
 0x176   :  { %3607 = vmatpush.bf16.msra.mxu3 %v5518_v27  ;;  %v7850_v27 = vld [vmem:[#allocation5 + $0x97c] sm:$0xf]  ;;  %v6075_v34 = vld [vmem:[#allocation5 + $0x810] sm:$0xf0] }
 0x177   :  { %3569 = vmatpush.bf16.msra.mxu0 %v6434_v16  ;;  %v6278_v16 = vor.u32 %v7850_v27, %v6275_v10  ;;  %v7810_v27 = vld [vmem:[#allocation5 + $0x83c] sm:$0xf]  ;;  %v6798_v10 = vor.u32 %v7980_v63, %v6795_v0  ;;  %v6715_v40 = vld [vmem:[#allocation5 + $0xd10] sm:$0xf0]  ;;  %v7786_v63 = vld [vmem:[#allocation5 + $0x774] sm:$0xf0] }
 0x178   :  { %3582 = vmatpush.bf16.msra.mxu1 %v6754_v20  ;;  %v7760_v20 = vld [vmem:[#allocation5 + $0x6ac] sm:$0xf] }
 0x179   :  { %3595 = vmatpush.bf16.msra.mxu2 %v5158_v21  ;;  %v5915_v21 = vld [vmem:[#allocation5 + $0x6d0] sm:$0xf0] }
 0x17a   :  { %3608 = vmatpush.bf16.msra.mxu3 %v5478_v29  ;;  %v6555_v29 = vld [vmem:[#allocation5 + $0xbd0] sm:$0xf0]  ;;  %v5918_v33 = vor.u32 %v7760_v20, %v5915_v21  ;;  %v5798_v20 = vor.u32 %v7730_v6, %v5795_v7 }
 0x17b   :  { %3570 = vmatpush.bf16.msra.mxu0 %v6394_v38  ;;  %v6558_v38 = vor.u32 %v7920_v28, %v6555_v29  ;;  %v7720_v28 = vld [vmem:[#allocation5 + $0x56c] sm:$0xf]  ;;  %v5755_v29 = vld [vmem:[#allocation5 + $0x590] sm:$0xf0] }
 0x17c   :  { %3583 = vmatpush.bf16.msra.mxu1 %v6714_v41  ;;  %v628_v41 = vperm.slane %v8541_v62, 4 }
 0x17d   :  { %3596 = vmatpush.bf16.msra.mxu2 %v5118_v42  ;;  %v6878_v42 = vor.u32 %v8000_v30, %v6875_v31  ;;  %v7800_v30 = vld [vmem:[#allocation5 + $0x7ec] sm:$0xf] }
 0x17e   :  { %3609 = vmatpush.bf16.msra.mxu3 %v5438_v47  ;;  %v6835_v47 = vld [vmem:[#allocation5 + $0xe00] sm:$0xf0]  ;;  %v6078_v44 = vor.u32 %v7800_v30, %v6075_v34  ;;  %v7766_v34 = vld [vmem:[#allocation5 + $0x6d4] sm:$0xf0] }
 0x17f   :  { %3571 = vmatpush.bf16.msra.mxu0 %v6354_v57  ;;  %v3365_v49 = vpop.f32.mrf.mxu0  ;;  %v6838_v56 = vor.u32 %v7990_v46, %v6835_v47  ;;  %v7790_v46 = vld [vmem:[#allocation5 + $0x79c] sm:$0xf]  ;;  %v6035_v47 = vld [vmem:[#allocation5 + $0x7c0] sm:$0xf0] }
 0x180   :  { %3584 = vmatpush.bf16.msra.mxu1 %v6674_v61  ;;  %v3366_v57 = vadd.f32 %v3365_v49, %v628_v41  ;;  %v3378_v58 = vpop.f32.mrf.mxu1  ;;  %v7900_v61 = vld [vmem:[#allocation5 + $0xb0c] sm:$0xf]  ;;  %v5758_v41 = vor.u32 %v7720_v28, %v5755_v29  ;;  %v6038_v0 = vor.u32 %v7790_v46, %v6035_v47  ;;  %v7606_v28 = vld [vmem:[#allocation5 + $0x1d4] sm:$0xf0]  ;;  %v5601_v29 = vld [vmem:[#allocation5 + $0x430] sm:$0xf] }
 0x181   :  { %3597 = vmatpush.bf16.msra.mxu2 %v5078_v19  ;;  %v6475_v19 = vld [vmem:[#allocation5 + $0xb30] sm:$0xf0]  ;;  %v7676_v46 = vld [vmem:[#allocation5 + $0x404] sm:$0xf0]  ;;  %v5881_v47 = vld [vmem:[#allocation5 + $0x660] sm:$0xf] }
 0x182   :  { %3610 = vmatpush.bf16.msra.mxu3 %v5398_v1  ;;  %3572 = vmatmul.bf16.vlgmr.msra.gmra.mxu0 %v8485_v32  ;;  %v3379_v1 = vadd.f32 %v3378_v58, %v3366_v57  ;;  %v5361_v57 = vld [vmem:[#allocation5 + $0x250] sm:$0xf]  ;;  %v7626_v58 = vld [vmem:[#allocation5 + $0x274] sm:$0xf0] }
 0x183   :  { %3616 = vmatpush.bf16.msrb.mxu0 %v5998_v2  ;;  %3585 = vmatmul.bf16.vlgmr.msra.gmra.mxu1 %v8487_v35  ;;  %v5838_v2 = vor.u32 %v7740_v52, %v5835_v53  ;;  %v7950_v52 = vld [vmem:[#allocation5 + $0xc9c] sm:$0xf]  ;;  %v6675_v53 = vld [vmem:[#allocation5 + $0xcc0] sm:$0xf0]  ;;  %v5362_v6 = vor.u32 %v7626_v58, %v5361_v57 }
 0x184   :  { %3629 = vmatpush.bf16.msrb.mxu1 %v6318_v3  ;;  %3598 = vmatmul.bf16.vlgmr.msra.gmra.mxu2 %v8475_v9  ;;  %v6158_v3 = vor.u32 %v7820_v55, %v6155_v60 }
 0x185   :  { %3642 = vmatpush.bf16.msrb.mxu2 %v6638_v5  ;;  %3611 = vmatmul.bf16.vlgmr.msra.gmra.mxu3 %v8482_v25  ;;  %v6478_v5 = vor.u32 %v7900_v61, %v6475_v19  ;;  %v7706_v61 = vld [vmem:[#allocation5 + $0x4f4] sm:$0xf0]  ;;  %v6001_v19 = vld [vmem:[#allocation5 + $0x750] sm:$0xf] }
 0x186   :  { %3655 = vmatpush.bf16.msrb.mxu3 %v6958_v54 }
 0x187   :  { %3617 = vmatpush.bf16.msrb.mxu0 %v5958_v14  ;;  %v3391_v54 = vpop.f32.mrf.mxu2  ;;  %v3367_v23 = vpop.f32.mrf.mxu0 }
 0x188   :  { %3630 = vmatpush.bf16.msrb.mxu1 %v6278_v16  ;;  %v3392_v13 = vadd.f32 %v3391_v54, %v3379_v1  ;;  %v3404_v14 = vpop.f32.mrf.mxu3  ;;  %v7970_v16 = vld [vmem:[#allocation5 + $0xd3c] sm:$0xf]  ;;  %v3380_v31 = vpop.f32.mrf.mxu1  ;;  %v5321_v54 = vld [vmem:[#allocation5 + $0x200] sm:$0xf] }
 0x189   :  { %3643 = vmatpush.bf16.msrb.mxu2 %v6598_v18  ;;  %v6755_v18 = vld [vmem:[#allocation5 + $0xd60] sm:$0xf0]  ;;  %v7686_v31 = vld [vmem:[#allocation5 + $0x454] sm:$0xf0] }
 0x18a   :  { %3656 = vmatpush.bf16.msrb.mxu3 %v6918_v24  ;;  %v8558_v21 = vadd.f32 %v3404_v14, %v3392_v13  ;;  %v6118_v24 = vor.u32 %v7810_v27, %v6115_v11  ;;  %v6002_v27 = vor.u32 %v7786_v63, %v6001_v19  ;;  %v5641_v11 = vld [vmem:[#allocation5 + $0x480] sm:$0xf]  ;;  %v7776_v14 = vld [vmem:[#allocation5 + $0x724] sm:$0xf0]  ;;  %v7666_v63 = vld [vmem:[#allocation5 + $0x3b4] sm:$0xf0] }
 0x18b   :  { %3618 = vmatpush.bf16.msrb.mxu0 %v5918_v33  ;;  %v6758_v33 = vor.u32 %v7970_v16, %v6755_v18  ;;  %v5961_v13 = vld [vmem:[#allocation5 + $0x700] sm:$0xf]  ;;  %v7856_v18 = vld [vmem:[#allocation5 + $0x9a4] sm:$0xf0]  ;;  %v5642_v23 = vor.u32 %v7696_v36, %v5641_v11 }
 0x18c   :  { %3631 = vmatpush.bf16.msrb.mxu1 %v6238_v37  ;;  %v7880_v37 = vld [vmem:[#allocation5 + $0xa6c] sm:$0xf]  ;;  %v6281_v16 = vld [vmem:[#allocation5 + $0x980] sm:$0xf]  ;;  %v7656_v36 = vld [vmem:[#allocation5 + $0x364] sm:$0xf0] }
 0x18d   :  { %3644 = vmatpush.bf16.msrb.mxu2 %v6558_v38  ;;  %v6395_v38 = vld [vmem:[#allocation5 + $0xa90] sm:$0xf0]  ;;  %v6282_v30 = vor.u32 %v7856_v18, %v6281_v16  ;;  %v5481_v11 = vld [vmem:[#allocation5 + $0x340] sm:$0xf] }
 0x18e   :  { %3657 = vmatpush.bf16.msrb.mxu3 %v6878_v42  ;;  %v7710_v42 = vld [vmem:[#allocation5 + $0x51c] sm:$0xf]  ;;  %v6398_v45 = vor.u32 %v7880_v37, %v6395_v38  ;;  %v6241_v37 = vld [vmem:[#allocation5 + $0x930] sm:$0xf]  ;;  %v7846_v38 = vld [vmem:[#allocation5 + $0x954] sm:$0xf0] }
 0x18f   :  { %3619 = vmatpush.bf16.msrb.mxu0 %v5878_v48  ;;  %v7870_v48 = vld [vmem:[#allocation5 + $0xa1c] sm:$0xf]  ;;  %v3393_v49 = vpop.f32.mrf.mxu2  ;;  %v5718_v60 = vor.u32 %v7710_v42, %v5715_v43  ;;  %v5241_v42 = vld [vmem:[#allocation5 + $0x160] sm:$0xf]  ;;  %v7596_v43 = vld [vmem:[#allocation5 + $0x184] sm:$0xf0] }
 0x190   :  { %3632 = vmatpush.bf16.msrb.mxu1 %v6198_v50  ;;  %v6718_v50 = vor.u32 %v7960_v39, %v6715_v40  ;;  %v3406_v55 = vpop.f32.mrf.mxu3  ;;  %v5602_v40 = vor.u32 %v7686_v31, %v5601_v29  ;;  %v6201_v49 = vld [vmem:[#allocation5 + $0x8e0] sm:$0xf]  ;;  %v5482_v29 = vor.u32 %v7656_v36, %v5481_v11  ;;  %v5121_v31 = vld [vmem:[#allocation5 + $0x70] sm:$0xf]  ;;  %v7936_v36 = vld [vmem:[#allocation5 + $0xc24] sm:$0xf0] }
 0x191   :  { %3645 = vmatpush.bf16.msrb.mxu2 %v6518_v51  ;;  %v6355_v51 = vld [vmem:[#allocation5 + $0xa40] sm:$0xf0]  ;;  %v6121_v18 = vld [vmem:[#allocation5 + $0x840] sm:$0xf] }
 0x192   :  { %3658 = vmatpush.bf16.msrb.mxu3 %v6838_v56  ;;  %v5681_v56 = vld [vmem:[#allocation5 + $0x4d0] sm:$0xf]  ;;  %v6358_v1 = vor.u32 %v7870_v48, %v6355_v51  ;;  %v7756_v48 = vld [vmem:[#allocation5 + $0x684] sm:$0xf0] }
 0x193   :  { %3620 = vmatpush.bf16.msrb.mxu0 %v5838_v2  ;;  %v6321_v2 = vld [vmem:[#allocation5 + $0x9d0] sm:$0xf]  ;;  %v5682_v7 = vor.u32 %v7706_v61, %v5681_v56  ;;  %v5882_v58 = vor.u32 %v7756_v48, %v5881_v47 }
 0x194   :  { %3633 = vmatpush.bf16.msrb.mxu1 %v6158_v3  ;;  %v7866_v3 = vld [vmem:[#allocation5 + $0x9f4] sm:$0xf0]  ;;  %v5201_v56 = vld [vmem:[#allocation5 + $0x110] sm:$0xf] }
 0x195   :  { %3646 = vmatpush.bf16.msrb.mxu2 %v6478_v5  ;;  %v6678_v5 = vor.u32 %v7950_v52, %v6675_v53  ;;  %v6322_v12 = vor.u32 %v7866_v3, %v6321_v2  ;;  %v5242_v52 = vor.u32 %v7596_v43, %v5241_v42  ;;  %v5521_v61 = vld [vmem:[#allocation5 + $0x390] sm:$0xf]  ;;  %v7806_v43 = vld [vmem:[#allocation5 + $0x814] sm:$0xf0] }
 0x196   :  { %3659 = vmatpush.bf16.msrb.mxu3 %v6798_v10  ;;  %v7616_v10 = vld [vmem:[#allocation5 + $0x224] sm:$0xf0]  ;;  %v6161_v3 = vld [vmem:[#allocation5 + $0x890] sm:$0xf] }
 0x197   :  { %3621 = vmatpush.bf16.msrb.mxu0 %v5798_v20  ;;  %v5322_v20 = vor.u32 %v7616_v10, %v5321_v54  ;;  %v5161_v54 = vld [vmem:[#allocation5 + $0xc0] sm:$0xf]  ;;  %v7576_v10 = vld [vmem:[#allocation5 + $0xe4] sm:$0xf0]  ;;  %v6081_v42 = vld [vmem:[#allocation5 + $0x7f0] sm:$0xf] }
 0x198   :  { %3634 = vmatpush.bf16.msrb.mxu1 %v6118_v24  ;;  %v5962_v24 = vor.u32 %v7776_v14, %v5961_v13  ;;  %v5801_v13 = vld [vmem:[#allocation5 + $0x5c0] sm:$0xf]  ;;  %v7736_v14 = vld [vmem:[#allocation5 + $0x5e4] sm:$0xf0] }
 0x199   :  { %3647 = vmatpush.bf16.msrb.mxu2 %v6438_v26  ;;  %v5281_v26 = vld [vmem:[#allocation5 + $0x1b0] sm:$0xf] }
 0x19a   :  { %3660 = vmatpush.bf16.msrb.mxu3 %v6758_v33  ;;  %v5921_v33 = vld [vmem:[#allocation5 + $0x6b0] sm:$0xf]  ;;  %v5282_v39 = vor.u32 %v7606_v28, %v5281_v26  ;;  %v5162_v26 = vor.u32 %v7576_v10, %v5161_v54 }
 0x19b   :  { %3622 = vmatpush.bf16.msrb.mxu0 %v5758_v41  ;;  %v5922_v41 = vor.u32 %v7766_v34, %v5921_v33  ;;  %v7566_v33 = vld [vmem:[#allocation5 + $0x94] sm:$0xf0]  ;;  %v5441_v34 = vld [vmem:[#allocation5 + $0x2f0] sm:$0xf] }
 0x19c   :  { %3635 = vmatpush.bf16.msrb.mxu1 %v6078_v44  ;;  %v5561_v44 = vld [vmem:[#allocation5 + $0x3e0] sm:$0xf] }
 0x19d   :  { %3648 = vmatpush.bf16.msrb.mxu2 %v6398_v45  ;;  %v6242_v45 = vor.u32 %v7846_v38, %v6241_v37  ;;  %v5562_v57 = vor.u32 %v7676_v46, %v5561_v44  ;;  %v5122_v44 = vor.u32 %v7566_v33, %v5121_v31  ;;  %v7556_v46 = vld [vmem:[#allocation5 + $0x44] sm:$0xf0]  ;;  %v6881_v31 = vld [vmem:[#allocation5 + $0xe30] sm:$0xf] }
 0x19e   :  { %3661 = vmatpush.bf16.msrb.mxu3 %v6718_v50  ;;  %v7836_v50 = vld [vmem:[#allocation5 + $0x904] sm:$0xf0] }
 0x19f   :  { %3623 = vmatpush.bf16.msrb.mxu0 %v5718_v60  ;;  %v3417_v51 = vpop.f32.mrf.mxu0  ;;  %v7586_v60 = vld [vmem:[#allocation5 + $0x134] sm:$0xf0]  ;;  %v6202_v19 = vor.u32 %v7836_v50, %v6201_v49  ;;  %v5401_v49 = vld [vmem:[#allocation5 + $0x2a0] sm:$0xf]  ;;  %v7636_v50 = vld [vmem:[#allocation5 + $0x2c4] sm:$0xf0] }
 0x1a0   :  { %3636 = vmatpush.bf16.msrb.mxu1 %v6038_v0  ;;  %v3418_v53 = vadd.f32 %v3417_v51, %v8558_v21  ;;  %v3430_v55 = vpop.f32.mrf.mxu1  ;;  %v5841_v0 = vld [vmem:[#allocation5 + $0x610] sm:$0xf]  ;;  %v5202_v21 = vor.u32 %v7586_v60, %v5201_v56  ;;  %v5721_v51 = vld [vmem:[#allocation5 + $0x520] sm:$0xf]  ;;  %v7946_v60 = vld [vmem:[#allocation5 + $0xc74] sm:$0xf0] }
 0x1a1   :  { %3649 = vmatpush.bf16.msrb.mxu2 %v6358_v1  ;;  %v7746_v1 = vld [vmem:[#allocation5 + $0x634] sm:$0xf0]  ;;  %v6641_v56 = vld [vmem:[#allocation5 + $0xc50] sm:$0xf] }
 0x1a2   :  { %3662 = vmatpush.bf16.msrb.mxu3 %v6678_v5  ;;  %3624 = vmatmul.bf16.vlgmr.msrb.gmra.mxu0 %v8473_v8  ;;  %v8565_v2 = vadd.f32 %v3430_v55, %v3418_v53  ;;  %v7826_v5 = vld [vmem:[#allocation5 + $0x8b4] sm:$0xf0]  ;;  %v7716_v53 = vld [vmem:[#allocation5 + $0x544] sm:$0xf0]  ;;  %v6041_v55 = vld [vmem:[#allocation5 + $0x7a0] sm:$0xf]  ;;  %v6642_v54 = vor.u32 %v7946_v60, %v6641_v56 }
 0x1a3   :  { %3668 = vmatpush.bf16.msra.mxu0 %v5362_v6  ;;  %3637 = vmatmul.bf16.vlgmr.msrb.gmra.mxu1 %v8477_v15  ;;  %v629_v6 = vperm.slane %v8541_v62, 5  ;;  %v6481_v60 = vld [vmem:[#allocation5 + $0xb10] sm:$0xf] }
 0x1a4   :  { %3681 = vmatpush.bf16.msra.mxu1 %v5682_v7  ;;  %3650 = vmatmul.bf16.vlgmr.msrb.gmra.mxu2 %v8485_v32  ;;  %v5522_v7 = vor.u32 %v7666_v63, %v5521_v61  ;;  %v6961_v61 = vld [vmem:[#allocation5 + $0xed0] sm:$0xf] }
 0x1a5   :  { %3694 = vmatpush.bf16.msra.mxu2 %v6002_v27  ;;  %3663 = vmatmul.bf16.vlgmr.msrb.gmra.mxu3 %v8487_v35  ;;  %v5842_v27 = vor.u32 %v7746_v1, %v5841_v0  ;;  %v8026_v0 = vld [vmem:[#allocation5 + $0xef4] sm:$0xf0]  ;;  %v7621_v1 = vld [vmem:[#allocation5 + $0x254] sm:$0xf] }
 0x1a6   :  { %3707 = vmatpush.bf16.msra.mxu3 %v6322_v12  ;;  %v6162_v12 = vor.u32 %v7826_v5, %v6161_v3  ;;  %v5363_v3 = vld [vmem:[#allocation5 + $0x278] sm:$0xf0]  ;;  %v5402_v5 = vor.u32 %v7636_v50, %v5401_v49  ;;  %v6962_v10 = vor.u32 %v8026_v0, %v6961_v61  ;;  %v7996_v49 = vld [vmem:[#allocation5 + $0xe04] sm:$0xf0]  ;;  %v7591_v50 = vld [vmem:[#allocation5 + $0x164] sm:$0xf] }
 0x1a7   :  { %3669 = vmatpush.bf16.msra.mxu0 %v5322_v20  ;;  %v3443_v16 = vpop.f32.mrf.mxu2  ;;  %v7816_v20 = vld [vmem:[#allocation5 + $0x864] sm:$0xf0]  ;;  %v3419_v62 = vpop.f32.mrf.mxu0  ;;  %v5366_v11 = vor.u32 %v7621_v1, %v5363_v3  ;;  %v7906_v61 = vld [vmem:[#allocation5 + $0xb34] sm:$0xf0] }
 0x1a8   :  { %3682 = vmatpush.bf16.msra.mxu1 %v5642_v23  ;;  %v3444_v23 = vadd.f32 %v3443_v16, %v629_v6  ;;  %v3432_v28 = vpop.f32.mrf.mxu1  ;;  %v6122_v38 = vor.u32 %v7816_v20, %v6121_v18  ;;  %v5722_v6 = vor.u32 %v7716_v53, %v5721_v51  ;;  %v8016_v16 = vld [vmem:[#allocation5 + $0xea4] sm:$0xf0]  ;;  %v7611_v18 = vld [vmem:[#allocation5 + $0x204] sm:$0xf]  ;;  %v5323_v20 = vld [vmem:[#allocation5 + $0x228] sm:$0xf0] }
 0x1a9   :  { %3695 = vmatpush.bf16.msra.mxu2 %v5962_v24  ;;  %v3456_v24 = vpop.f32.mrf.mxu3  ;;  %v5326_v28 = vor.u32 %v7611_v18, %v5323_v20  ;;  %v5243_v51 = vld [vmem:[#allocation5 + $0x188] sm:$0xf0]  ;;  %v7986_v3 = vld [vmem:[#allocation5 + $0xdb4] sm:$0xf0]  ;;  %v7571_v18 = vld [vmem:[#allocation5 + $0xc4] sm:$0xf] }
 0x1aa   :  { %3708 = vmatpush.bf16.msra.mxu3 %v6282_v30  ;;  %v5802_v30 = vor.u32 %v7736_v14, %v5801_v13  ;;  %v8568_v37 = vadd.f32 %v3456_v24, %v3444_v23  ;;  %v6921_v13 = vld [vmem:[#allocation5 + $0xe80] sm:$0xf]  ;;  %v7691_v23 = vld [vmem:[#allocation5 + $0x484] sm:$0xf]  ;;  %v5643_v24 = vld [vmem:[#allocation5 + $0x4a8] sm:$0xf0]  ;;  %v5246_v56 = vor.u32 %v7591_v50, %v5243_v51 }
 0x1ab   :  { %3670 = vmatpush.bf16.msra.mxu0 %v5282_v39  ;;  %v7646_v39 = vld [vmem:[#allocation5 + $0x314] sm:$0xf0]  ;;  %v5646_v33 = vor.u32 %v7691_v23, %v5643_v24  ;;  %v5563_v53 = vld [vmem:[#allocation5 + $0x408] sm:$0xf0] }
 0x1ac   :  { %3683 = vmatpush.bf16.msra.mxu1 %v5602_v40  ;;  %v5761_v40 = vld [vmem:[#allocation5 + $0x570] sm:$0xf]  ;;  %v5442_v47 = vor.u32 %v7646_v39, %v5441_v34  ;;  %v8006_v34 = vld [vmem:[#allocation5 + $0xe54] sm:$0xf0]  ;;  %v5283_v39 = vld [vmem:[#allocation5 + $0x1d8] sm:$0xf0] }
 0x1ad   :  { %3696 = vmatpush.bf16.msra.mxu2 %v5922_v41  ;;  %v7726_v41 = vld [vmem:[#allocation5 + $0x594] sm:$0xf0]  ;;  %v5163_v20 = vld [vmem:[#allocation5 + $0xe8] sm:$0xf0] }
 0x1ae   :  { %3709 = vmatpush.bf16.msra.mxu3 %v6242_v45  ;;  %v5081_v45 = vld [vmem:[#allocation5 + $0x20] sm:$0xf]  ;;  %v5762_v48 = vor.u32 %v7726_v41, %v5761_v40  ;;  %v7681_v40 = vld [vmem:[#allocation5 + $0x434] sm:$0xf]  ;;  %v5603_v41 = vld [vmem:[#allocation5 + $0x458] sm:$0xf0] }
 0x1af   :  { %3671 = vmatpush.bf16.msra.mxu0 %v5242_v52  ;;  %v6082_v52 = vor.u32 %v7806_v43, %v6081_v42  ;;  %v5082_v63 = vor.u32 %v7556_v46, %v5081_v45  ;;  %v6882_v43 = vor.u32 %v8006_v34, %v6881_v31  ;;  %v6521_v45 = vld [vmem:[#allocation5 + $0xb60] sm:$0xf]  ;;  %v7916_v46 = vld [vmem:[#allocation5 + $0xb84] sm:$0xf0]  ;;  %v6401_v34 = vld [vmem:[#allocation5 + $0xa70] sm:$0xf] }
 0x1b0   :  { %3684 = vmatpush.bf16.msra.mxu1 %v5562_v57  ;;  %v7796_v57 = vld [vmem:[#allocation5 + $0x7c4] sm:$0xf0] }
 0x1b1   :  { %3697 = vmatpush.bf16.msra.mxu2 %v5882_v58  ;;  %v3445_v58 = vpop.f32.mrf.mxu2 }
 0x1b2   :  { %3710 = vmatpush.bf16.msra.mxu3 %v6202_v19  ;;  %v3458_v19 = vpop.f32.mrf.mxu3 }
 0x1b3   :  { %3672 = vmatpush.bf16.msra.mxu0 %v5202_v21  ;;  %v7701_v21 = vld [vmem:[#allocation5 + $0x4d4] sm:$0xf]  ;;  %v6801_v19 = vld [vmem:[#allocation5 + $0xd90] sm:$0xf] }
 0x1b4   :  { %3685 = vmatpush.bf16.msra.mxu1 %v5522_v7  ;;  %v5683_v7 = vld [vmem:[#allocation5 + $0x4f8] sm:$0xf0] }
 0x1b5   :  { %3698 = vmatpush.bf16.msra.mxu2 %v5842_v27  ;;  %v6042_v27 = vor.u32 %v7796_v57, %v6041_v55  ;;  %v5686_v14 = vor.u32 %v7701_v21, %v5683_v7  ;;  %v6522_v55 = vor.u32 %v7916_v46, %v6521_v45  ;;  %v7661_v21 = vld [vmem:[#allocation5 + $0x394] sm:$0xf]  ;;  %v5523_v7 = vld [vmem:[#allocation5 + $0x3b8] sm:$0xf0] }
 0x1b6   :  { %3711 = vmatpush.bf16.msra.mxu3 %v6162_v12  ;;  %v6601_v12 = vld [vmem:[#allocation5 + $0xc00] sm:$0xf]  ;;  %v7641_v45 = vld [vmem:[#allocation5 + $0x2f4] sm:$0xf]  ;;  %v5443_v46 = vld [vmem:[#allocation5 + $0x318] sm:$0xf0] }
 0x1b7   :  { %3673 = vmatpush.bf16.msra.mxu0 %v5162_v26  ;;  %v6602_v62 = vor.u32 %v7936_v36, %v6601_v12  ;;  %v6922_v26 = vor.u32 %v8016_v16, %v6921_v13  ;;  %v6441_v12 = vld [vmem:[#allocation5 + $0xac0] sm:$0xf]  ;;  %v7896_v36 = vld [vmem:[#allocation5 + $0xae4] sm:$0xf0] }
 0x1b8   :  { %3686 = vmatpush.bf16.msra.mxu1 %v5482_v29  ;;  %v6561_v29 = vld [vmem:[#allocation5 + $0xbb0] sm:$0xf]  ;;  %v6761_v13 = vld [vmem:[#allocation5 + $0xd40] sm:$0xf]  ;;  %v7976_v16 = vld [vmem:[#allocation5 + $0xd64] sm:$0xf0] }
 0x1b9   :  { %3699 = vmatpush.bf16.msra.mxu2 %v5802_v30  ;;  %v7926_v30 = vld [vmem:[#allocation5 + $0xbd4] sm:$0xf0]  ;;  %v6762_v31 = vor.u32 %v7976_v16, %v6761_v13  ;;  %v7851_v16 = vld [vmem:[#allocation5 + $0x984] sm:$0xf] }
 0x1ba   :  { %3712 = vmatpush.bf16.msra.mxu3 %v6122_v38  ;;  %v7601_v38 = vld [vmem:[#allocation5 + $0x1b4] sm:$0xf]  ;;  %v6562_v42 = vor.u32 %v7926_v30, %v6561_v29 }
 0x1bb   :  { %3674 = vmatpush.bf16.msra.mxu0 %v5122_v44  ;;  %v5286_v44 = vor.u32 %v7601_v38, %v5283_v39  ;;  %v7886_v38 = vld [vmem:[#allocation5 + $0xa94] sm:$0xf0]  ;;  %v6721_v39 = vld [vmem:[#allocation5 + $0xcf0] sm:$0xf] }
 0x1bc   :  { %3687 = vmatpush.bf16.msra.mxu1 %v5442_v47  ;;  %v6841_v47 = vld [vmem:[#allocation5 + $0xde0] sm:$0xf] }
 0x1bd   :  { %3700 = vmatpush.bf16.msra.mxu2 %v5762_v48  ;;  %v5606_v48 = vor.u32 %v7681_v40, %v5603_v41  ;;  %v6842_v58 = vor.u32 %v7996_v49, %v6841_v47  ;;  %v6402_v47 = vor.u32 %v7886_v38, %v6401_v34  ;;  %v7876_v49 = vld [vmem:[#allocation5 + $0xa44] sm:$0xf0]  ;;  %v5923_v34 = vld [vmem:[#allocation5 + $0x6d8] sm:$0xf0]  ;;  %v7841_v38 = vld [vmem:[#allocation5 + $0x934] sm:$0xf] }
 0x1be   :  { %3713 = vmatpush.bf16.msra.mxu3 %v6082_v52  ;;  %v7671_v52 = vld [vmem:[#allocation5 + $0x3e4] sm:$0xf] }
 0x1bf   :  { %3675 = vmatpush.bf16.msra.mxu0 %v5082_v63  ;;  %v3469_v57 = vpop.f32.mrf.mxu0  ;;  %v5566_v1 = vor.u32 %v7671_v52, %v5563_v53  ;;  %v6681_v52 = vld [vmem:[#allocation5 + $0xca0] sm:$0xf]  ;;  %v7956_v53 = vld [vmem:[#allocation5 + $0xcc4] sm:$0xf0] }
 0x1c0   :  { %3688 = vmatpush.bf16.msra.mxu1 %v5402_v5  ;;  %v3470_v63 = vadd.f32 %v3469_v57, %v8568_v37  ;;  %v3482_v0 = vpop.f32.mrf.mxu1  ;;  %v7581_v5 = vld [vmem:[#allocation5 + $0x114] sm:$0xf]  ;;  %v5526_v37 = vor.u32 %v7661_v21, %v5523_v7  ;;  %v6643_v21 = vld [vmem:[#allocation5 + $0xc78] sm:$0xf0]  ;;  %v6682_v7 = vor.u32 %v7956_v53, %v6681_v52 }
 0x1c1   :  { %3701 = vmatpush.bf16.msra.mxu2 %v5722_v6  ;;  %v5203_v6 = vld [vmem:[#allocation5 + $0x138] sm:$0xf0] }
 0x1c2   :  { %3714 = vmatpush.bf16.msra.mxu3 %v6042_v27  ;;  %3676 = vmatmul.bf16.vlgmr.msra.gmra.mxu0 %v8475_v9  ;;  %v3483_v27 = vadd.f32 %v3482_v0, %v3470_v63  ;;  %v7781_v63 = vld [vmem:[#allocation5 + $0x754] sm:$0xf]  ;;  %v6003_v0 = vld [vmem:[#allocation5 + $0x778] sm:$0xf0] }
 0x1c3   :  { %3720 = vmatpush.bf16.msrb.mxu0 %v6642_v54  ;;  %3689 = vmatmul.bf16.vlgmr.msra.gmra.mxu1 %v8482_v25  ;;  %v6482_v54 = vor.u32 %v7906_v61, %v6481_v60  ;;  %v7631_v60 = vld [vmem:[#allocation5 + $0x2a4] sm:$0xf]  ;;  %v5403_v61 = vld [vmem:[#allocation5 + $0x2c8] sm:$0xf0] }
 0x1c4   :  { %3733 = vmatpush.bf16.msrb.mxu1 %v6962_v10  ;;  %3702 = vmatmul.bf16.vlgmr.msra.gmra.mxu2 %v8473_v8  ;;  %v6802_v10 = vor.u32 %v7986_v3, %v6801_v19 }
 0x1c5   :  { %3746 = vmatpush.bf16.msrb.mxu2 %v5366_v11  ;;  %3715 = vmatmul.bf16.vlgmr.msra.gmra.mxu3 %v8477_v15  ;;  %v5206_v11 = vor.u32 %v7581_v5, %v5203_v6  ;;  %v6323_v5 = vld [vmem:[#allocation5 + $0x9f8] sm:$0xf0]  ;;  %v7941_v6 = vld [vmem:[#allocation5 + $0xc54] sm:$0xf] }
 0x1c6   :  { %3759 = vmatpush.bf16.msrb.mxu3 %v5686_v14  ;;  %v6646_v13 = vor.u32 %v7941_v6, %v6643_v21  ;;  %v6163_v21 = vld [vmem:[#allocation5 + $0x8b8] sm:$0xf0] }
 0x1c7   :  { %3721 = vmatpush.bf16.msrb.mxu0 %v6602_v62  ;;  %v3495_v14 = vpop.f32.mrf.mxu2  ;;  %v7651_v62 = vld [vmem:[#allocation5 + $0x344] sm:$0xf]  ;;  %v3471_v30 = vpop.f32.mrf.mxu0 }
 0x1c8   :  { %3734 = vmatpush.bf16.msrb.mxu1 %v6922_v26  ;;  %v3496_v23 = vadd.f32 %v3495_v14, %v3483_v27  ;;  %v3508_v24 = vpop.f32.mrf.mxu3  ;;  %v5483_v26 = vld [vmem:[#allocation5 + $0x368] sm:$0xf0]  ;;  %v3484_v40 = vpop.f32.mrf.mxu1  ;;  %v7771_v14 = vld [vmem:[#allocation5 + $0x704] sm:$0xf] }
 0x1c9   :  { %3747 = vmatpush.bf16.msrb.mxu2 %v5326_v28  ;;  %v6442_v28 = vor.u32 %v7896_v36, %v6441_v12  ;;  %v5486_v41 = vor.u32 %v7651_v62, %v5483_v26  ;;  %v6006_v12 = vor.u32 %v7781_v63, %v6003_v0  ;;  %v8011_v62 = vld [vmem:[#allocation5 + $0xe84] sm:$0xf]  ;;  %v6923_v26 = vld [vmem:[#allocation5 + $0xea8] sm:$0xf0]  ;;  %v6243_v40 = vld [vmem:[#allocation5 + $0x958] sm:$0xf0] }
 0x1ca   :  { %3760 = vmatpush.bf16.msrb.mxu3 %v5646_v33  ;;  %v8575_v29 = vadd.f32 %v3508_v24, %v3496_v23  ;;  %v5166_v33 = vor.u32 %v7571_v18, %v5163_v20  ;;  %v6283_v20 = vld [vmem:[#allocation5 + $0x9a8] sm:$0xf0]  ;;  %v7931_v23 = vld [vmem:[#allocation5 + $0xc04] sm:$0xf]  ;;  %v7741_v63 = vld [vmem:[#allocation5 + $0x614] sm:$0xf] }
 0x1cb   :  { %3722 = vmatpush.bf16.msrb.mxu0 %v6562_v42  ;;  %v7966_v42 = vld [vmem:[#allocation5 + $0xd14] sm:$0xf0]  ;;  %v6603_v24 = vld [vmem:[#allocation5 + $0xc28] sm:$0xf0]  ;;  %v6286_v30 = vor.u32 %v7851_v16, %v6283_v20  ;;  %v5843_v0 = vld [vmem:[#allocation5 + $0x638] sm:$0xf0] }
 0x1cc   :  { %3735 = vmatpush.bf16.msrb.mxu1 %v6882_v43  ;;  %v7561_v43 = vld [vmem:[#allocation5 + $0x74] sm:$0xf]  ;;  %v6722_v50 = vor.u32 %v7966_v42, %v6721_v39  ;;  %v6926_v39 = vor.u32 %v8011_v62, %v6923_v26  ;;  %v6563_v42 = vld [vmem:[#allocation5 + $0xbd8] sm:$0xf0]  ;;  %v7811_v16 = vld [vmem:[#allocation5 + $0x844] sm:$0xf] }
 0x1cd   :  { %3748 = vmatpush.bf16.msrb.mxu2 %v5286_v44  ;;  %v5123_v44 = vld [vmem:[#allocation5 + $0x98] sm:$0xf0]  ;;  %v6443_v62 = vld [vmem:[#allocation5 + $0xae8] sm:$0xf0] }
 0x1ce   :  { %3761 = vmatpush.bf16.msrb.mxu3 %v5606_v48  ;;  %v6361_v48 = vld [vmem:[#allocation5 + $0xa20] sm:$0xf]  ;;  %v5126_v51 = vor.u32 %v7561_v43, %v5123_v44  ;;  %v8001_v43 = vld [vmem:[#allocation5 + $0xe34] sm:$0xf]  ;;  %v6883_v44 = vld [vmem:[#allocation5 + $0xe58] sm:$0xf0] }
 0x1cf   :  { %3723 = vmatpush.bf16.msrb.mxu0 %v6522_v55  ;;  %v7551_v55 = vld [vmem:[#allocation5 + $0x24] sm:$0xf]  ;;  %v3497_v57 = vpop.f32.mrf.mxu2  ;;  %v6362_v3 = vor.u32 %v7876_v49, %v6361_v48  ;;  %v5883_v49 = vld [vmem:[#allocation5 + $0x688] sm:$0xf0]  ;;  %v6886_v53 = vor.u32 %v8001_v43, %v6883_v44  ;;  %v7801_v43 = vld [vmem:[#allocation5 + $0x7f4] sm:$0xf] }
 0x1d0   :  { %3736 = vmatpush.bf16.msrb.mxu1 %v6842_v58  ;;  %v5446_v58 = vor.u32 %v7641_v45, %v5443_v46  ;;  %v3510_v19 = vpop.f32.mrf.mxu3  ;;  %v7751_v46 = vld [vmem:[#allocation5 + $0x664] sm:$0xf] }
 0x1d1   :  { %3749 = vmatpush.bf16.msrb.mxu2 %v5246_v56  ;;  %v5083_v56 = vld [vmem:[#allocation5 + $0x48] sm:$0xf0]  ;;  %v7911_v57 = vld [vmem:[#allocation5 + $0xb64] sm:$0xf] }
 0x1d2   :  { %3762 = vmatpush.bf16.msrb.mxu3 %v5566_v1  ;;  %v7861_v1 = vld [vmem:[#allocation5 + $0x9d4] sm:$0xf]  ;;  %v5086_v27 = vor.u32 %v7551_v55, %v5083_v56  ;;  %v6203_v55 = vld [vmem:[#allocation5 + $0x908] sm:$0xf0] }
 0x1d3   :  { %3724 = vmatpush.bf16.msrb.mxu0 %v6482_v54  ;;  %v8021_v54 = vld [vmem:[#allocation5 + $0xed4] sm:$0xf]  ;;  %v6326_v36 = vor.u32 %v7861_v1, %v6323_v5  ;;  %v6843_v56 = vld [vmem:[#allocation5 + $0xe08] sm:$0xf0] }
 0x1d4   :  { %3737 = vmatpush.bf16.msrb.mxu1 %v6802_v10  ;;  %v6963_v10 = vld [vmem:[#allocation5 + $0xef8] sm:$0xf0]  ;;  %v7821_v1 = vld [vmem:[#allocation5 + $0x894] sm:$0xf] }
 0x1d5   :  { %3750 = vmatpush.bf16.msrb.mxu2 %v5206_v11  ;;  %v5406_v11 = vor.u32 %v7631_v60, %v5403_v61  ;;  %v6966_v18 = vor.u32 %v8021_v54, %v6963_v10  ;;  %v5886_v60 = vor.u32 %v7751_v46, %v5883_v49  ;;  %v7981_v54 = vld [vmem:[#allocation5 + $0xd94] sm:$0xf]  ;;  %v6803_v10 = vld [vmem:[#allocation5 + $0xdb8] sm:$0xf0] }
 0x1d6   :  { %3763 = vmatpush.bf16.msrb.mxu3 %v5526_v37  ;;  %v5963_v37 = vld [vmem:[#allocation5 + $0x728] sm:$0xf0]  ;;  %v6806_v20 = vor.u32 %v7981_v54, %v6803_v10  ;;  %v6083_v46 = vld [vmem:[#allocation5 + $0x818] sm:$0xf0]  ;;  %v7961_v49 = vld [vmem:[#allocation5 + $0xcf4] sm:$0xf] }
 0x1d7   :  { %3725 = vmatpush.bf16.msrb.mxu0 %v6442_v28  ;;  %v5966_v28 = vor.u32 %v7771_v14, %v5963_v37  ;;  %v7731_v14 = vld [vmem:[#allocation5 + $0x5c4] sm:$0xf]  ;;  %v5803_v37 = vld [vmem:[#allocation5 + $0x5e8] sm:$0xf0] }
 0x1d8   :  { %3738 = vmatpush.bf16.msrb.mxu1 %v6762_v31  ;;  %v6606_v31 = vor.u32 %v7931_v23, %v6603_v24  ;;  %v6123_v23 = vld [vmem:[#allocation5 + $0x868] sm:$0xf0]  ;;  %v7891_v24 = vld [vmem:[#allocation5 + $0xac4] sm:$0xf] }
 0x1d9   :  { %3751 = vmatpush.bf16.msrb.mxu2 %v5166_v33  ;;  %v7761_v33 = vld [vmem:[#allocation5 + $0x6b4] sm:$0xf]  ;;  %v8074_v54 = vld [vmem:[#allocation8 + $0x174] sm:$0xf0] }
 0x1da   :  { %3764 = vmatpush.bf16.msrb.mxu3 %v5486_v41  ;;  %v7921_v41 = vld [vmem:[#allocation5 + $0xbb4] sm:$0xf]  ;;  %v5926_v45 = vor.u32 %v7761_v33, %v5923_v34  ;;  %v5806_v33 = vor.u32 %v7731_v14, %v5803_v37 }
 0x1db   :  { %3726 = vmatpush.bf16.msrb.mxu0 %v6402_v47  ;;  %v6246_v47 = vor.u32 %v7841_v38, %v6243_v40  ;;  %v6566_v48 = vor.u32 %v7921_v41, %v6563_v42  ;;  %v6446_v40 = vor.u32 %v7891_v24, %v6443_v62  ;;  %v7721_v41 = vld [vmem:[#allocation5 + $0x574] sm:$0xf]  ;;  %v5763_v42 = vld [vmem:[#allocation5 + $0x598] sm:$0xf0] }
 0x1dc   :  { %3739 = vmatpush.bf16.msrb.mxu1 %v6722_v50  ;;  %v7831_v50 = vld [vmem:[#allocation5 + $0x8e4] sm:$0xf]  ;;  %v8056_v62 = vld [vmem:[#allocation8 + $0xe4] sm:$0xf0] }
 0x1dd   :  { %3752 = vmatpush.bf16.msrb.mxu2 %v5126_v51  ;;  %v8581_v51 = vld [vmem:[#allocation7] sm:$0xff]  ;;  %v6206_v61 = vor.u32 %v7831_v50, %v6203_v55  ;;  %v6723_v50 = vld [vmem:[#allocation5 + $0xd18] sm:$0xf0]  ;;  %v5723_v55 = vld [vmem:[#allocation5 + $0x548] sm:$0xf0] }
 0x1de   :  { %3765 = vmatpush.bf16.msrb.mxu3 %v5446_v58  ;;  %v630_v52 = vperm.slane %v8581_v51, 6  ;;  %v7991_v58 = vld [vmem:[#allocation5 + $0xde4] sm:$0xf] }
 0x1df   :  { %3727 = vmatpush.bf16.msrb.mxu0 %v6362_v3  ;;  %v6846_v6 = vor.u32 %v7991_v58, %v6843_v56  ;;  %v7791_v58 = vld [vmem:[#allocation5 + $0x7a4] sm:$0xf]  ;;  %v6043_v56 = vld [vmem:[#allocation5 + $0x7c8] sm:$0xf0] }
 0x1e0   :  { %3740 = vmatpush.bf16.msrb.mxu1 %v6682_v7  ;;  %v3534_v5 = vpop.f32.mrf.mxu1  ;;  %v7901_v7 = vld [vmem:[#allocation5 + $0xb14] sm:$0xf]  ;;  %v6046_v10 = vor.u32 %v7791_v58, %v6043_v56  ;;  %v7131_v58 = vld [vmem:[#allocation8 + $0x140] sm:$0xf] }
 0x1e1   :  { %3753 = vmatpush.bf16.msrb.mxu2 %v5086_v27  ;;  %v6483_v27 = vld [vmem:[#allocation5 + $0xb38] sm:$0xf0]  ;;  %v7195_v56 = vld [vmem:[#allocation8 + $0x1c0] sm:$0xf] }
 0x1e2   :  { %3766 = vmatpush.bf16.msrb.mxu3 %v5406_v11  ;;  %3728 = vmatmul.bf16.vlgmr.msrb.gmra.mxu0 %v8485_v32 }
 0x1e3   :  { %3772 = vmatpush.bf16.msra.mxu0 %v6006_v12  ;;  %3741 = vmatmul.bf16.vlgmr.msrb.gmra.mxu1 %v8487_v35  ;;  %v5846_v12 = vor.u32 %v7741_v63, %v5843_v0  ;;  %v7951_v63 = vld [vmem:[#allocation5 + $0xca4] sm:$0xf]  ;;  %v6683_v0 = vld [vmem:[#allocation5 + $0xcc8] sm:$0xf0] }
 0x1e4   :  { %3785 = vmatpush.bf16.msra.mxu1 %v6326_v36  ;;  %3754 = vmatmul.bf16.vlgmr.msrb.gmra.mxu2 %v8475_v9  ;;  %v6523_v9 = vld [vmem:[#allocation5 + $0xb88] sm:$0xf0]  ;;  %v6166_v36 = vor.u32 %v7821_v1, %v6163_v21 }
 0x1e5   :  { %3798 = vmatpush.bf16.msra.mxu2 %v6646_v13  ;;  %3767 = vmatmul.bf16.vlgmr.msrb.gmra.mxu3 %v8482_v25  ;;  %v3521_v25 = vpop.f32.mrf.mxu0  ;;  %v6526_v19 = vor.u32 %v7911_v57, %v6523_v9  ;;  %v6486_v13 = vor.u32 %v7901_v7, %v6483_v27  ;;  %v6086_v57 = vor.u32 %v7801_v43, %v6083_v46  ;;  %v8058_v7 = vld [vmem:[#allocation8 + $0xf4] sm:$0xf0]  ;;  %v7155_v27 = vld [vmem:[#allocation8 + $0x170] sm:$0xf] }
 0x1e6   :  { %3811 = vmatpush.bf16.msra.mxu3 %v6966_v18  ;;  %v3522_v3 = vadd.f32 %v3521_v25, %v630_v52  ;;  %v5766_v52 = vor.u32 %v7721_v41, %v5763_v42  ;;  %v8038_v41 = vld [vmem:[#allocation8 + $0x54] sm:$0xf0]  ;;  %v7075_v42 = vld [vmem:[#allocation8 + $0xd0] sm:$0xf] }
 0x1e7   :  { %3773 = vmatpush.bf16.msra.mxu0 %v5966_v28  ;;  %v3547_v18 = vpop.f32.mrf.mxu2  ;;  %v8070_v46 = vld [vmem:[#allocation8 + $0x154] sm:$0xf0] }
 0x1e8   :  { %3786 = vmatpush.bf16.msra.mxu1 %v6286_v30  ;;  %v3535_v11 = vadd.f32 %v3534_v5, %v3522_v3  ;;  %v3560_v28 = vpop.f32.mrf.mxu3  ;;  %v7971_v30 = vld [vmem:[#allocation5 + $0xd44] sm:$0xf]  ;;  %v3536_v44 = vpop.f32.mrf.mxu1  ;;  %v7027_v3 = vld [vmem:[#allocation8 + $0x70] sm:$0xf] }
 0x1e9   :  { %3799 = vmatpush.bf16.msra.mxu2 %v6606_v31  ;;  %v6763_v31 = vld [vmem:[#allocation5 + $0xd68] sm:$0xf0]  ;;  %v8042_v5 = vld [vmem:[#allocation8 + $0x74] sm:$0xf0] }
 0x1ea   :  { %3812 = vmatpush.bf16.msra.mxu3 %v6926_v39  ;;  %v3548_v26 = vadd.f32 %v3547_v18, %v3535_v11  ;;  %v6126_v39 = vor.u32 %v7811_v16, %v6123_v23  ;;  %v7028_v14 = vor.u32 %v8042_v5, %v7027_v3  ;;  %v7156_v16 = vor.u32 %v8074_v54, %v7155_v27  ;;  %v7019_v18 = vld [vmem:[#allocation8 + $0x60] sm:$0xf]  ;;  %v8054_v44 = vld [vmem:[#allocation8 + $0xd4] sm:$0xf0] }
 0x1eb   :  { %3774 = vmatpush.bf16.msra.mxu0 %v5926_v45  ;;  %v6766_v45 = vor.u32 %v7971_v30, %v6763_v31  ;;  %v7083_v23 = vld [vmem:[#allocation8 + $0xe0] sm:$0xf]  ;;  %v8088_v31 = vld [vmem:[#allocation8 + $0x1e4] sm:$0xf0]  ;;  %v8050_v5 = vld [vmem:[#allocation8 + $0xb4] sm:$0xf0] }
 0x1ec   :  { %3787 = vmatpush.bf16.msra.mxu1 %v6246_v47  ;;  %v8584_v34 = vadd.f32 %v3560_v28, %v3548_v26  ;;  %v7881_v47 = vld [vmem:[#allocation5 + $0xa74] sm:$0xf]  ;;  %v7147_v26 = vld [vmem:[#allocation8 + $0x160] sm:$0xf]  ;;  %v8082_v27 = vld [vmem:[#allocation8 + $0x1b4] sm:$0xf0] }
 0x1ed   :  { %3800 = vmatpush.bf16.msra.mxu2 %v6566_v48  ;;  %v3523_v38 = vpop.f32.mrf.mxu0  ;;  %v6403_v48 = vld [vmem:[#allocation5 + $0xa98] sm:$0xf0]  ;;  %v8072_v28 = vld [vmem:[#allocation8 + $0x164] sm:$0xf0]  ;;  %v7211_v30 = vld [vmem:[#allocation8 + $0x1e0] sm:$0xf] }
 0x1ee   :  { %3813 = vmatpush.bf16.msra.mxu3 %v6886_v53  ;;  %v7711_v53 = vld [vmem:[#allocation5 + $0x524] sm:$0xf]  ;;  %v6406_v9 = vor.u32 %v7881_v47, %v6403_v48  ;;  %v7084_v38 = vor.u32 %v8056_v62, %v7083_v23  ;;  %v7212_v43 = vor.u32 %v8088_v31, %v7211_v30  ;;  %v7203_v47 = vld [vmem:[#allocation8 + $0x1d0] sm:$0xf]  ;;  %v7179_v23 = vld [vmem:[#allocation8 + $0x1a0] sm:$0xf] }
 0x1ef   :  { %3775 = vmatpush.bf16.msra.mxu0 %v5886_v60  ;;  %v7871_v60 = vld [vmem:[#allocation5 + $0xa24] sm:$0xf]  ;;  %v3549_v25 = vpop.f32.mrf.mxu2  ;;  %v5726_v21 = vor.u32 %v7711_v53, %v5723_v55  ;;  %v7003_v53 = vld [vmem:[#allocation8 + $0x40] sm:$0xf] }
 0x1f0   :  { %3788 = vmatpush.bf16.msra.mxu1 %v6206_v61  ;;  %v6726_v61 = vor.u32 %v7961_v49, %v6723_v50  ;;  %v3562_v1 = vpop.f32.mrf.mxu3  ;;  %v8086_v48 = vld [vmem:[#allocation8 + $0x1d4] sm:$0xf0]  ;;  %v7076_v50 = vor.u32 %v8054_v44, %v7075_v42  ;;  %v7067_v55 = vld [vmem:[#allocation8 + $0xc0] sm:$0xf] }
 0x1f1   :  { %3801 = vmatpush.bf16.msra.mxu2 %v6526_v19  ;;  %v6363_v19 = vld [vmem:[#allocation5 + $0xa48] sm:$0xf0]  ;;  %v7059_v1 = vld [vmem:[#allocation8 + $0xb0] sm:$0xf]  ;;  %v8046_v42 = vld [vmem:[#allocation8 + $0x94] sm:$0xf0] }
 0x1f2   :  { %3814 = vmatpush.bf16.msra.mxu3 %v6846_v6  ;;  %v7091_v6 = vld [vmem:[#allocation8 + $0xf0] sm:$0xf]  ;;  %v6366_v11 = vor.u32 %v7871_v60, %v6363_v19  ;;  %v8062_v44 = vld [vmem:[#allocation8 + $0x114] sm:$0xf0] }
 0x1f3   :  { %3776 = vmatpush.bf16.msra.mxu0 %v5846_v12  ;;  %v7219_v12 = vld [vmem:[#allocation8 + $0x1f0] sm:$0xf]  ;;  %v7092_v37 = vor.u32 %v8058_v7, %v7091_v6 }
 0x1f4   :  { %3789 = vmatpush.bf16.msra.mxu1 %v6166_v36  ;;  %v8090_v36 = vld [vmem:[#allocation8 + $0x1f4] sm:$0xf0]  ;;  %v7123_v6 = vld [vmem:[#allocation8 + $0x130] sm:$0xf] }
 0x1f5   :  { %3802 = vmatpush.bf16.msra.mxu2 %v6486_v13  ;;  %v6686_v13 = vor.u32 %v7951_v63, %v6683_v0  ;;  %v7220_v24 = vor.u32 %v8090_v36, %v7219_v12  ;;  %v6995_v63 = vld [vmem:[#allocation8 + $0x30] sm:$0xf]  ;;  %v8034_v0 = vld [vmem:[#allocation8 + $0x34] sm:$0xf0]  ;;  %v6987_v12 = vld [vmem:[#allocation8 + $0x20] sm:$0xf] }
 0x1f6   :  { %3815 = vmatpush.bf16.msra.mxu3 %v6806_v20  ;;  %v8040_v20 = vld [vmem:[#allocation8 + $0x64] sm:$0xf0]  ;;  %v7187_v7 = vld [vmem:[#allocation8 + $0x1b0] sm:$0xf]  ;;  %v6996_v54 = vor.u32 %v8034_v0, %v6995_v63  ;;  %v8122_v0 = vld [vmem:[#allocation8 + $0x2f4] sm:$0xf0] }
 0x1f7   :  { %3777 = vmatpush.bf16.msra.mxu0 %v5806_v33  ;;  %v7020_v33 = vor.u32 %v8040_v20, %v7019_v18  ;;  %v8032_v36 = vld [vmem:[#allocation8 + $0x24] sm:$0xf0] }
 0x1f8   :  { %3790 = vmatpush.bf16.msra.mxu1 %v6126_v39  ;;  %v7148_v39 = vor.u32 %v8072_v28, %v7147_v26  ;;  %v8064_v18 = vld [vmem:[#allocation8 + $0x124] sm:$0xf0]  ;;  %v6988_v28 = vor.u32 %v8032_v36, %v6987_v12  ;;  %v7275_v36 = vld [vmem:[#allocation8 + $0x260] sm:$0xf] }
 0x1f9   :  { %3803 = vmatpush.bf16.msra.mxu2 %v6446_v40  ;;  %v7011_v40 = vld [vmem:[#allocation8 + $0x50] sm:$0xf] }
 0x1fa   :  { %3816 = vmatpush.bf16.msra.mxu3 %v6766_v45  ;;  %v7139_v45 = vld [vmem:[#allocation8 + $0x150] sm:$0xf]  ;;  %v7012_v49 = vor.u32 %v8038_v41, %v7011_v40 }
 0x1fb   :  { %3778 = vmatpush.bf16.msra.mxu0 %v5766_v52  ;;  %v7140_v52 = vor.u32 %v8070_v46, %v7139_v45  ;;  %v7043_v40 = vld [vmem:[#allocation8 + $0x90] sm:$0xf]  ;;  %v8078_v46 = vld [vmem:[#allocation8 + $0x194] sm:$0xf0] }
 0x1fc   :  { %3791 = vmatpush.bf16.msra.mxu1 %v6086_v57  ;;  %v7204_v57 = vor.u32 %v8086_v48, %v7203_v47  ;;  %v7171_v45 = vld [vmem:[#allocation8 + $0x190] sm:$0xf]  ;;  %v6971_v48 = vld [vmem:[#allocation8] sm:$0xf] }
 0x1fd   :  { %3804 = vmatpush.bf16.msra.mxu2 %v6406_v9  ;;  %v8052_v9 = vld [vmem:[#allocation8 + $0xc4] sm:$0xf0] }
 0x1fe   :  { %3817 = vmatpush.bf16.msra.mxu3 %v6726_v61  ;;  %v7068_v61 = vor.u32 %v8052_v9, %v7067_v55  ;;  %v7099_v55 = vld [vmem:[#allocation8 + $0x100] sm:$0xf]  ;;  %v8060_v9 = vld [vmem:[#allocation8 + $0x104] sm:$0xf0] }
 0x1ff   :  { %3779 = vmatpush.bf16.msra.mxu0 %v5726_v21  ;;  %v8590_v60 = vpop.f32.mrf.mxu0  ;;  %v8066_v21 = vld [vmem:[#allocation8 + $0x134] sm:$0xf0] }
 0x200   :  { %3792 = vmatpush.bf16.msra.mxu1 %v6046_v10  ;;  %v7060_v10 = vor.u32 %v8050_v5, %v7059_v1  ;;  %v7411_v1 = vld [vmem:[#allocation8 + $0x370] sm:$0xf]  ;;  %v3824_v5 = vmax.f32 %v8515_v4, 0.0  ;;  %v3827_v4 = vmax.f32 %v8551_v17, 0.0 }
 0x201   :  { %3805 = vmatpush.bf16.msra.mxu2 %v6366_v11  ;;  %v7124_v11 = vor.u32 %v8066_v21, %v7123_v6  ;;  %v7100_v21 = vor.u32 %v8060_v9, %v7099_v55  ;;  %v8100_v55 = vld [vmem:[#allocation8 + $0x244] sm:$0xf0] }
 0x202   :  { %3818 = vmatpush.bf16.msra.mxu3 %v6686_v13  ;;  %3780 = vmatmul.bf16.vlgmr.msra.gmra.mxu0 %v8473_v8  ;;  %v8068_v8 = vld [vmem:[#allocation8 + $0x144] sm:$0xf0]  ;;  %v7051_v13 = vld [vmem:[#allocation8 + $0xa0] sm:$0xf] }
 0x203   :  { %4652 = vmatpush.bf16.msrb.mxu0 %v7028_v14  ;;  %3793 = vmatmul.bf16.vlgmr.msra.gmra.mxu1 %v8477_v15  ;;  %v8592_v15 = vpop.f32.mrf.mxu1  ;;  %v7132_v19 = vor.u32 %v8068_v8, %v7131_v58  ;;  %v7188_v14 = vor.u32 %v8082_v27, %v7187_v7  ;;  %v7163_v58 = vld [vmem:[#allocation8 + $0x180] sm:$0xf]  ;;  %v8076_v8 = vld [vmem:[#allocation8 + $0x184] sm:$0xf0]  ;;  %v7475_v7 = vld [vmem:[#allocation8 + $0x3f0] sm:$0xf] }
 0x204   :  { %4665 = vmatpush.bf16.msrb.mxu1 %v7092_v37  ;;  %3806 = vmatmul.bf16.vlgmr.msra.gmra.mxu2 %v8485_v32  ;;  %v8036_v32 = vld [vmem:[#allocation8 + $0x44] sm:$0xf0]  ;;  %v8154_v27 = vld [vmem:[#allocation8 + $0x3f4] sm:$0xf0] }
 0x205   :  { %4678 = vmatpush.bf16.msrb.mxu2 %v7156_v16  ;;  %3819 = vmatmul.bf16.vlgmr.msra.gmra.mxu3 %v8487_v35  ;;  %v8084_v35 = vld [vmem:[#allocation8 + $0x1c4] sm:$0xf0]  ;;  %v7004_v25 = vor.u32 %v8036_v32, %v7003_v53  ;;  %v7115_v16 = vld [vmem:[#allocation8 + $0x120] sm:$0xf] }
 0x206   :  { %4691 = vmatpush.bf16.msrb.mxu3 %v7220_v24  ;;  %v7196_v3 = vor.u32 %v8084_v35, %v7195_v56  ;;  %v8048_v37 = vld [vmem:[#allocation8 + $0xa4] sm:$0xf0]  ;;  %v7035_v53 = vld [vmem:[#allocation8 + $0x80] sm:$0xf]  ;;  %v7283_v35 = vld [vmem:[#allocation8 + $0x270] sm:$0xf] }
 0x207   :  { %4653 = vmatpush.bf16.msrb.mxu0 %v7020_v33  ;;  %v8594_v20 = vpop.f32.mrf.mxu2  ;;  %v8080_v24 = vld [vmem:[#allocation8 + $0x1a4] sm:$0xf0]  ;;  %v3575_v26 = vpop.f32.mrf.mxu0  ;;  %v7052_v31 = vor.u32 %v8048_v37, %v7051_v13  ;;  %v7116_v33 = vor.u32 %v8064_v18, %v7115_v16  ;;  %v7339_v16 = vld [vmem:[#allocation8 + $0x2e0] sm:$0xf] }
 0x208   :  { %4666 = vmatpush.bf16.msrb.mxu1 %v7084_v38  ;;  %v8596_v62 = vpop.f32.mrf.mxu3  ;;  %v6979_v38 = vld [vmem:[#allocation8 + $0x10] sm:$0xf]  ;;  %v7180_v41 = vor.u32 %v8080_v24, %v7179_v23  ;;  %v8044_v32 = vld [vmem:[#allocation8 + $0x84] sm:$0xf0]  ;;  %v7476_v23 = vor.u32 %v8154_v27, %v7475_v7  ;;  %v7403_v24 = vld [vmem:[#allocation8 + $0x360] sm:$0xf] }
 0x209   :  { %4679 = vmatpush.bf16.msrb.mxu2 %v7148_v39  ;;  %v8030_v39 = vld [vmem:[#allocation8 + $0x14] sm:$0xf0]  ;;  %v7036_v6 = vor.u32 %v8044_v32, %v7035_v53  ;;  %v8104_v37 = vld [vmem:[#allocation8 + $0x264] sm:$0xf0]  ;;  %v7259_v32 = vld [vmem:[#allocation8 + $0x240] sm:$0xf] }
 0x20a   :  { %4692 = vmatpush.bf16.msrb.mxu3 %v7212_v43  ;;  %v7107_v43 = vld [vmem:[#allocation8 + $0x110] sm:$0xf]  ;;  %v6980_v47 = vor.u32 %v8030_v39, %v6979_v38  ;;  %v8120_v18 = vld [vmem:[#allocation8 + $0x2e4] sm:$0xf0]  ;;  %v8130_v27 = vld [vmem:[#allocation8 + $0x334] sm:$0xf0] }
 0x20b   :  { %4654 = vmatpush.bf16.msrb.mxu0 %v7012_v49  ;;  %v3588_v30 = vpop.f32.mrf.mxu1  ;;  %v8028_v49 = vld [vmem:[#allocation8 + $0x4] sm:$0xf0]  ;;  %v7340_v17 = vor.u32 %v8120_v18, %v7339_v16  ;;  %v7379_v7 = vld [vmem:[#allocation8 + $0x330] sm:$0xf]  ;;  %v7307_v16 = vld [vmem:[#allocation8 + $0x2a0] sm:$0xf] }
 0x20c   :  { %4667 = vmatpush.bf16.msrb.mxu1 %v7076_v50  ;;  %v7044_v50 = vor.u32 %v8046_v42, %v7043_v40  ;;  %v6972_v63 = vor.u32 %v8028_v49, %v6971_v48  ;;  %v8136_v26 = vld [vmem:[#allocation8 + $0x364] sm:$0xf0]  ;;  %v8603_v30 = vpack.c.bf16 %v3824_v5, %v3824_v5  ;;  %v7267_v40 = vld [vmem:[#allocation8 + $0x250] sm:$0xf]  ;;  %v8609_v42 = vpack.c.bf16 %v3827_v4, %v3827_v4  ;;  %v8150_v49 = vld [vmem:[#allocation8 + $0x3d4] sm:$0xf0] }
 0x20d   :  { %4680 = vmatpush.bf16.msrb.mxu2 %v7140_v52  ;;  %v7108_v52 = vor.u32 %v8062_v44, %v7107_v43  ;;  %v7404_v39 = vor.u32 %v8136_v26, %v7403_v24  ;;  %v7459_v48 = vld [vmem:[#allocation8 + $0x3d0] sm:$0xf]  ;;  %v8112_v24 = vld [vmem:[#allocation8 + $0x2a4] sm:$0xf0]  ;;  %v7371_v26 = vld [vmem:[#allocation8 + $0x320] sm:$0xf] }
 0x20e   :  { %4693 = vmatpush.bf16.msrb.mxu3 %v7204_v57  ;;  %v7172_v57 = vor.u32 %v8078_v46, %v7171_v45  ;;  %v8118_v45 = vld [vmem:[#allocation8 + $0x2d4] sm:$0xf0]  ;;  %v7395_v46 = vld [vmem:[#allocation8 + $0x350] sm:$0xf]  ;;  %v7460_v9 = vor.u32 %v8150_v49, %v7459_v48 }
 0x20f   :  { %4655 = vmatpush.bf16.msrb.mxu0 %v7004_v25  ;;  %v3601_v56 = vpop.f32.mrf.mxu2  ;;  %v8106_v25 = vld [vmem:[#allocation8 + $0x274] sm:$0xf0]  ;;  %v7315_v5 = vld [vmem:[#allocation8 + $0x2b0] sm:$0xf] }
 0x210   :  { %4668 = vmatpush.bf16.msrb.mxu1 %v7068_v61  ;;  %v7347_v61 = vld [vmem:[#allocation8 + $0x2f0] sm:$0xf]  ;;  %v7284_v12 = vor.u32 %v8106_v25, %v7283_v35  ;;  %v8132_v56 = vld [vmem:[#allocation8 + $0x344] sm:$0xf0]  ;;  %v7451_v35 = vld [vmem:[#allocation8 + $0x3c0] sm:$0xf] }
 0x211   :  { %4681 = vmatpush.bf16.msrb.mxu2 %v7132_v19  ;;  %v3614_v19 = vpop.f32.mrf.mxu3  ;;  %v7348_v13 = vor.u32 %v8122_v0, %v7347_v61  ;;  %v8148_v25 = vld [vmem:[#allocation8 + $0x3c4] sm:$0xf0]  ;;  %v7260_v61 = vor.u32 %v8100_v55, %v7259_v32  ;;  %v8110_v49 = vld [vmem:[#allocation8 + $0x294] sm:$0xf0] }
 0x212   :  { %4694 = vmatpush.bf16.msrb.mxu3 %v7196_v3  ;;  %v8138_v3 = vld [vmem:[#allocation8 + $0x374] sm:$0xf0] }
 0x213   :  { %4656 = vmatpush.bf16.msrb.mxu0 %v6996_v54  ;;  %v3825_v54 = vmax.f32 %v8525_v22, 0.0  ;;  %v7467_v22 = vld [vmem:[#allocation8 + $0x3e0] sm:$0xf]  ;;  %v8142_v32 = vld [vmem:[#allocation8 + $0x394] sm:$0xf0] }
 0x214   :  { %4669 = vmatpush.bf16.msrb.mxu1 %v7060_v10  ;;  %v3826_v10 = vmax.f32 %v8539_v59, 0.0  ;;  %v8152_v59 = vld [vmem:[#allocation8 + $0x3e4] sm:$0xf0] }
 0x215   :  { %4682 = vmatpush.bf16.msrb.mxu2 %v7124_v11  ;;  %v7164_v11 = vor.u32 %v8076_v8, %v7163_v58  ;;  %v7468_v43 = vor.u32 %v8152_v59, %v7467_v22  ;;  %v8116_v58 = vld [vmem:[#allocation8 + $0x2c4] sm:$0xf0]  ;;  %v7387_v8 = vld [vmem:[#allocation8 + $0x340] sm:$0xf] }
 0x216   :  { %4695 = vmatpush.bf16.msrb.mxu3 %v7188_v14  ;;  %v7412_v14 = vor.u32 %v8138_v3, %v7411_v1  ;;  %v8607_v38 = vpack.c.bf16 %v3826_v10, %v3826_v10  ;;  %v7388_v0 = vor.u32 %v8132_v56, %v7387_v8  ;;  %v7251_v1 = vld [vmem:[#allocation8 + $0x230] sm:$0xf]  ;;  %v8098_v3 = vld [vmem:[#allocation8 + $0x234] sm:$0xf0]  ;;  %v7435_v59 = vld [vmem:[#allocation8 + $0x3a0] sm:$0xf] }
 0x217   :  { %4657 = vmatpush.bf16.msrb.mxu0 %v6988_v28  ;;  %v631_v28 = vperm.slane %v8581_v51, 7  ;;  %v7331_v51 = vld [vmem:[#allocation8 + $0x2d0] sm:$0xf]  ;;  %v7291_v8 = vld [vmem:[#allocation8 + $0x280] sm:$0xf] }
 0x218   :  { %4670 = vmatpush.bf16.msrb.mxu1 %v7052_v31  ;;  %v8605_v31 = vpack.c.bf16 %v3825_v54, %v3825_v54  ;;  %v7443_v10 = vld [vmem:[#allocation8 + $0x3b0] sm:$0xf]  ;;  %v8108_v56 = vld [vmem:[#allocation8 + $0x284] sm:$0xf0] }
 0x219   :  { %4683 = vmatpush.bf16.msrb.mxu2 %v7116_v33  ;;  %v7276_v33 = vor.u32 %v8104_v37, %v7275_v36  ;;  %v3600_v44 = vadd.f32 %v8594_v20, %v631_v28  ;;  %v7323_v20 = vld [vmem:[#allocation8 + $0x2c0] sm:$0xf]  ;;  %v8096_v37 = vld [vmem:[#allocation8 + $0x224] sm:$0xf0] }
 0x21a   :  { %4696 = vmatpush.bf16.msrb.mxu3 %v7180_v41  ;;  %v8102_v41 = vld [vmem:[#allocation8 + $0x254] sm:$0xf0]  ;;  %v8128_v28 = vld [vmem:[#allocation8 + $0x324] sm:$0xf0] }
 0x21b   :  { %4658 = vmatpush.bf16.msrb.mxu0 %v6980_v47  ;;  %v8134_v47 = vld [vmem:[#allocation8 + $0x354] sm:$0xf0] }
 0x21c   :  { %4671 = vmatpush.bf16.msrb.mxu1 %v7044_v50  ;;  %v7268_v50 = vor.u32 %v8102_v41, %v7267_v40  ;;  %v7396_v53 = vor.u32 %v8134_v47, %v7395_v46  ;;  %v7308_v40 = vor.u32 %v8112_v24, %v7307_v16  ;;  %v7372_v41 = vor.u32 %v8128_v28, %v7371_v26  ;;  %v7021_v24 = vld [vmem:[#allocation8 + $0x68] sm:$0xf0]  ;;  %v8055_v26 = vld [vmem:[#allocation8 + $0xe4] sm:$0xf] }
 0x21d   :  { %4684 = vmatpush.bf16.msrb.mxu2 %v7108_v52  ;;  %v7332_v52 = vor.u32 %v8118_v45, %v7331_v51  ;;  %v7235_v51 = vld [vmem:[#allocation8 + $0x210] sm:$0xf]  ;;  %v3574_v46 = vadd.f32 %v8590_v60, %v8584_v34  ;;  %v7085_v28 = vld [vmem:[#allocation8 + $0xe8] sm:$0xf0] }
 0x21e   :  { %4697 = vmatpush.bf16.msrb.mxu3 %v7172_v57  ;;  %v3613_v57 = vadd.f32 %v8596_v62, %v3600_v44  ;;  %v8114_v62 = vld [vmem:[#allocation8 + $0x2b4] sm:$0xf0]  ;;  %v7299_v44 = vld [vmem:[#allocation8 + $0x290] sm:$0xf] }
 0x21f   :  { %4659 = vmatpush.bf16.msrb.mxu0 %v6972_v63  ;;  %v3625_v19 = vpop.f32.mrf.mxu0  ;;  %v7324_v63 = vor.u32 %v8116_v58, %v7323_v20  ;;  %v7316_v36 = vor.u32 %v8114_v62, %v7315_v5  ;;  %v7227_v20 = vld [vmem:[#allocation8 + $0x200] sm:$0xf]  ;;  %v3587_v60 = vadd.f32 %v8592_v15, %v3574_v46  ;;  %v7029_v5 = vld [vmem:[#allocation8 + $0x78] sm:$0xf0]  ;;  %v7292_v15 = vor.u32 %v8108_v56, %v7291_v8  ;;  %v8035_v8 = vld [vmem:[#allocation8 + $0x44] sm:$0xf] }
 0x220   :  { %4672 = vmatpush.bf16.msrb.mxu1 %v7036_v6  ;;  %v3638_v6 = vpop.f32.mrf.mxu1  ;;  %v3626_v54 = vadd.f32 %v3625_v19, %v3613_v57  ;;  %v8092_v57 = vld [vmem:[#allocation8 + $0x204] sm:$0xf0]  ;;  %v7093_v62 = vld [vmem:[#allocation8 + $0xf8] sm:$0xf0]  ;;  %v7005_v56 = vld [vmem:[#allocation8 + $0x48] sm:$0xf0] }
 0x221   :  { %4685 = vmatpush.bf16.msrb.mxu2 %v7100_v21  ;;  %v7452_v21 = vor.u32 %v8148_v25, %v7451_v35  ;;  %v7355_v35 = vld [vmem:[#allocation8 + $0x300] sm:$0xf]  ;;  %v8124_v19 = vld [vmem:[#allocation8 + $0x304] sm:$0xf0]  ;;  %v7013_v46 = vld [vmem:[#allocation8 + $0x58] sm:$0xf0] }
 0x222   :  { %4698 = vmatpush.bf16.msrb.mxu3 %v7164_v11  ;;  %4660 = vmatmul.bf16.vlgmr.msrb.gmra.mxu0 %v8603_v30  ;;  %v8146_v11 = vld [vmem:[#allocation8 + $0x3b4] sm:$0xf0] }
 0x223   :  { %4704 = vmatpush.bf16.msra.mxu0 %v7284_v12  ;;  %4673 = vmatmul.bf16.vlgmr.msrb.gmra.mxu1 %v8605_v31  ;;  %v7252_v12 = vor.u32 %v8098_v3, %v7251_v1  ;;  %v7444_v4 = vor.u32 %v8146_v11, %v7443_v10  ;;  %v8041_v3 = vld [vmem:[#allocation8 + $0x74] sm:$0xf]  ;;  %v3829_v10 = vmax.f32 %v8575_v29, 0.0  ;;  %v7356_v11 = vor.u32 %v8124_v19, %v7355_v35  ;;  %v8071_v29 = vld [vmem:[#allocation8 + $0x164] sm:$0xf] }
 0x224   :  { %4717 = vmatpush.bf16.msra.mxu1 %v7348_v13  ;;  %4686 = vmatmul.bf16.vlgmr.msrb.gmra.mxu2 %v8607_v38  ;;  %v7380_v13 = vor.u32 %v8130_v27, %v7379_v7  ;;  %v8073_v7 = vld [vmem:[#allocation8 + $0x174] sm:$0xf]  ;;  %v7157_v27 = vld [vmem:[#allocation8 + $0x178] sm:$0xf0]  ;;  %v7032_v16 = vor.u32 %v8041_v3, %v7029_v5  ;;  %v8051_v35 = vld [vmem:[#allocation8 + $0xc4] sm:$0xf] }
 0x225   :  { %4730 = vmatpush.bf16.msra.mxu2 %v7412_v14  ;;  %4699 = vmatmul.bf16.vlgmr.msrb.gmra.mxu3 %v8609_v42  ;;  %v7243_v14 = vld [vmem:[#allocation8 + $0x220] sm:$0xf]  ;;  %v8083_v19 = vld [vmem:[#allocation8 + $0x1c4] sm:$0xf] }
 0x226   :  { %4743 = vmatpush.bf16.msra.mxu3 %v7476_v23  ;;  %v3639_v23 = vadd.f32 %v3638_v6, %v3626_v54  ;;  %v8057_v6 = vld [vmem:[#allocation8 + $0xf4] sm:$0xf]  ;;  %v3828_v54 = vmax.f32 %v8565_v2, 0.0 }
 0x227   :  { %4705 = vmatpush.bf16.msra.mxu0 %v7276_v33  ;;  %v3651_v18 = vpop.f32.mrf.mxu2  ;;  %v8144_v33 = vld [vmem:[#allocation8 + $0x3a4] sm:$0xf0] }
 0x228   :  { %4718 = vmatpush.bf16.msra.mxu1 %v7340_v17  ;;  %v3664_v22 = vpop.f32.mrf.mxu3  ;;  %v7244_v17 = vor.u32 %v8096_v37, %v7243_v14  ;;  %v3640_v45 = vpop.f32.mrf.mxu1  ;;  %v7436_v47 = vor.u32 %v8144_v33, %v7435_v59  ;;  %v3652_v48 = vadd.f32 %v3651_v18, %v3639_v23  ;;  %v7096_v18 = vor.u32 %v8057_v6, %v7093_v62  ;;  %v8039_v23 = vld [vmem:[#allocation8 + $0x64] sm:$0xf]  ;;  %v8033_v62 = vld [vmem:[#allocation8 + $0x34] sm:$0xf] }
 0x229   :  { %4731 = vmatpush.bf16.msra.mxu2 %v7404_v39  ;;  %v3627_v39 = vpop.f32.mrf.mxu0  ;;  %v8622_v59 = vpack.c.bf16 %v3828_v54, %v3828_v54  ;;  %v8087_v33 = vld [vmem:[#allocation8 + $0x1e4] sm:$0xf] }
 0x22a   :  { %4744 = vmatpush.bf16.msra.mxu3 %v7468_v43  ;;  %v8094_v43 = vld [vmem:[#allocation8 + $0x214] sm:$0xf0]  ;;  %v3665_v25 = vadd.f32 %v3664_v22, %v3652_v48  ;;  %v7149_v22 = vld [vmem:[#allocation8 + $0x168] sm:$0xf0]  ;;  %v8624_v39 = vpack.c.bf16 %v3829_v10, %v3829_v10  ;;  %v8630_v48 = vld [vmem:[#allocation7 + $0x8] sm:$0x3] }
 0x22b   :  { %4706 = vmatpush.bf16.msra.mxu0 %v7268_v50  ;;  %v7363_v50 = vld [vmem:[#allocation8 + $0x310] sm:$0xf]  ;;  %v7236_v55 = vor.u32 %v8094_v43, %v7235_v51  ;;  %v8037_v51 = vld [vmem:[#allocation8 + $0x54] sm:$0xf]  ;;  %v7152_v45 = vor.u32 %v8071_v29, %v7149_v22  ;;  %v7061_v10 = vld [vmem:[#allocation8 + $0xb8] sm:$0xf0] }
 0x22c   :  { %4719 = vmatpush.bf16.msra.mxu1 %v7332_v52  ;;  %v8126_v52 = vld [vmem:[#allocation8 + $0x314] sm:$0xf0]  ;;  %v3831_v14 = vmax.f32 %v3665_v25, 0.0  ;;  %v8067_v25 = vld [vmem:[#allocation8 + $0x144] sm:$0xf] }
 0x22d   :  { %4732 = vmatpush.bf16.msra.mxu2 %v7396_v53  ;;  %v7427_v53 = vld [vmem:[#allocation8 + $0x390] sm:$0xf]  ;;  %v7364_v58 = vor.u32 %v8126_v52, %v7363_v50  ;;  %v7077_v50 = vld [vmem:[#allocation8 + $0xd8] sm:$0xf0]  ;;  %v8069_v52 = vld [vmem:[#allocation8 + $0x154] sm:$0xf] }
 0x22e   :  { %4745 = vmatpush.bf16.msra.mxu3 %v7460_v9  ;;  %v7300_v9 = vor.u32 %v8110_v49, %v7299_v44  ;;  %v7088_v44 = vor.u32 %v8055_v26, %v7085_v28  ;;  %v7053_v26 = vld [vmem:[#allocation8 + $0xa8] sm:$0xf0]  ;;  %v8079_v22 = vld [vmem:[#allocation8 + $0x1a4] sm:$0xf] }
 0x22f   :  { %4707 = vmatpush.bf16.msra.mxu0 %v7260_v61  ;;  %v3653_v34 = vpop.f32.mrf.mxu2  ;;  %v7428_v61 = vor.u32 %v8142_v32, %v7427_v53  ;;  %v7141_v53 = vld [vmem:[#allocation8 + $0x158] sm:$0xf0]  ;;  %v8085_v32 = vld [vmem:[#allocation8 + $0x1d4] sm:$0xf]  ;;  %v7117_v28 = vld [vmem:[#allocation8 + $0x128] sm:$0xf0] }
 0x230   :  { %4720 = vmatpush.bf16.msra.mxu1 %v7324_v63  ;;  %v7419_v63 = vld [vmem:[#allocation8 + $0x380] sm:$0xf]  ;;  %v3666_v1 = vpop.f32.mrf.mxu3 }
 0x231   :  { %4733 = vmatpush.bf16.msra.mxu2 %v7388_v0  ;;  %v8140_v0 = vld [vmem:[#allocation8 + $0x384] sm:$0xf0]  ;;  %v7008_v1 = vor.u32 %v8035_v8, %v7005_v56  ;;  %v8027_v56 = vld [vmem:[#allocation8 + $0x4] sm:$0xf] }
 0x232   :  { %4746 = vmatpush.bf16.msra.mxu3 %v7452_v21  ;;  %v7228_v21 = vor.u32 %v8092_v57, %v7227_v20  ;;  %v7420_v37 = vor.u32 %v8140_v0, %v7419_v63  ;;  %v7016_v20 = vor.u32 %v8037_v51, %v7013_v46  ;;  %v632_v57 = vperm.slane %v8630_v48, 0  ;;  %v7197_v63 = vld [vmem:[#allocation8 + $0x1c8] sm:$0xf0] }
 0x233   :  { %4708 = vmatpush.bf16.msra.mxu0 %v7252_v12  ;;  %v8089_v12 = vld [vmem:[#allocation8 + $0x1f4] sm:$0xf]  ;;  %v7200_v54 = vor.u32 %v8083_v19, %v7197_v63  ;;  %v8059_v19 = vld [vmem:[#allocation8 + $0x104] sm:$0xf] }
 0x234   :  { %4721 = vmatpush.bf16.msra.mxu1 %v7316_v36  ;;  %v7221_v36 = vld [vmem:[#allocation8 + $0x1f8] sm:$0xf0] }
 0x235   :  { %4734 = vmatpush.bf16.msra.mxu2 %v7380_v13  ;;  %v3830_v13 = vmax.f32 %v3587_v60, 0.0  ;;  %v7224_v2 = vor.u32 %v8089_v12, %v7221_v36  ;;  %v7069_v60 = vld [vmem:[#allocation8 + $0xc8] sm:$0xf0]  ;;  %v8081_v36 = vld [vmem:[#allocation8 + $0x1b4] sm:$0xf] }
 0x236   :  { %4747 = vmatpush.bf16.msra.mxu3 %v7444_v4  ;;  %v7160_v4 = vor.u32 %v8073_v7, %v7157_v27  ;;  %v7072_v6 = vor.u32 %v8051_v35, %v7069_v60  ;;  %v6997_v7 = vld [vmem:[#allocation8 + $0x38] sm:$0xf0]  ;;  %v8049_v27 = vld [vmem:[#allocation8 + $0xb4] sm:$0xf]  ;;  %v6973_v35 = vld [vmem:[#allocation8 + $0x8] sm:$0xf0] }
 0x237   :  { %4709 = vmatpush.bf16.msra.mxu0 %v7244_v17  ;;  %v7213_v17 = vld [vmem:[#allocation8 + $0x1e8] sm:$0xf0]  ;;  %v8628_v43 = vpack.c.bf16 %v3830_v13, %v3830_v13  ;;  %v7189_v13 = vld [vmem:[#allocation8 + $0x1b8] sm:$0xf0] }
 0x238   :  { %4722 = vmatpush.bf16.msra.mxu1 %v7308_v40  ;;  %v8626_v40 = vpack.c.bf16 %v3831_v14, %v3831_v14  ;;  %v7216_v49 = vor.u32 %v8087_v33, %v7213_v17  ;;  %v7000_v14 = vor.u32 %v8033_v62, %v6997_v7  ;;  %v7181_v33 = vld [vmem:[#allocation8 + $0x1a8] sm:$0xf0]  ;;  %v8121_v62 = vld [vmem:[#allocation8 + $0x2f4] sm:$0xf] }
 0x239   :  { %4735 = vmatpush.bf16.msra.mxu2 %v7372_v41  ;;  %v7024_v41 = vor.u32 %v8039_v23, %v7021_v24  ;;  %v8047_v23 = vld [vmem:[#allocation8 + $0xa4] sm:$0xf]  ;;  %v7192_v24 = vor.u32 %v8081_v36, %v7189_v13  ;;  %v8153_v36 = vld [vmem:[#allocation8 + $0x3f4] sm:$0xf]  ;;  %v7477_v13 = vld [vmem:[#allocation8 + $0x3f8] sm:$0xf0] }
 0x23a   :  { %4748 = vmatpush.bf16.msra.mxu3 %v7436_v47  ;;  %v8053_v47 = vld [vmem:[#allocation8 + $0xd4] sm:$0xf]  ;;  %v7056_v46 = vor.u32 %v8047_v23, %v7053_v26  ;;  %v7277_v23 = vld [vmem:[#allocation8 + $0x268] sm:$0xf0]  ;;  %v7480_v26 = vor.u32 %v8153_v36, %v7477_v13  ;;  %v8095_v36 = vld [vmem:[#allocation8 + $0x224] sm:$0xf] }
 0x23b   :  { %4710 = vmatpush.bf16.msra.mxu0 %v7236_v55  ;;  %v7205_v55 = vld [vmem:[#allocation8 + $0x1d8] sm:$0xf0]  ;;  %v7245_v13 = vld [vmem:[#allocation8 + $0x228] sm:$0xf0] }
 0x23c   :  { %4723 = vmatpush.bf16.msra.mxu1 %v7300_v9  ;;  %v7080_v9 = vor.u32 %v8053_v47, %v7077_v50  ;;  %v7208_v34 = vor.u32 %v8085_v32, %v7205_v55  ;;  %v6981_v50 = vld [vmem:[#allocation8 + $0x18] sm:$0xf0]  ;;  %v7184_v32 = vor.u32 %v8079_v22, %v7181_v33  ;;  %v8151_v22 = vld [vmem:[#allocation8 + $0x3e4] sm:$0xf]  ;;  %v7469_v33 = vld [vmem:[#allocation8 + $0x3e8] sm:$0xf0] }
 0x23d   :  { %4736 = vmatpush.bf16.msra.mxu2 %v7364_v58  ;;  %v7144_v58 = vor.u32 %v8069_v52, %v7141_v53  ;;  %v8045_v52 = vld [vmem:[#allocation8 + $0x94] sm:$0xf]  ;;  %v7045_v55 = vld [vmem:[#allocation8 + $0x98] sm:$0xf0] }
 0x23e   :  { %4749 = vmatpush.bf16.msra.mxu3 %v7428_v61  ;;  %v7133_v61 = vld [vmem:[#allocation8 + $0x148] sm:$0xf0] }
 0x23f   :  { %4711 = vmatpush.bf16.msra.mxu0 %v7228_v21  ;;  %v3677_v0 = vpop.f32.mrf.mxu0  ;;  %v7136_v21 = vor.u32 %v8067_v25, %v7133_v61  ;;  %v8043_v25 = vld [vmem:[#allocation8 + $0x84] sm:$0xf]  ;;  %v7037_v61 = vld [vmem:[#allocation8 + $0x88] sm:$0xf0] }
 0x240   :  { %4724 = vmatpush.bf16.msra.mxu1 %v7292_v15  ;;  %v3678_v3 = vadd.f32 %v3677_v0, %v632_v57  ;;  %v3690_v5 = vpop.f32.mrf.mxu1  ;;  %v8065_v15 = vld [vmem:[#allocation8 + $0x134] sm:$0xf]  ;;  %v7109_v57 = vld [vmem:[#allocation8 + $0x118] sm:$0xf0]  ;;  %v7101_v0 = vld [vmem:[#allocation8 + $0x108] sm:$0xf0] }
 0x241   :  { %4737 = vmatpush.bf16.msra.mxu2 %v7356_v11  ;;  %v7125_v11 = vld [vmem:[#allocation8 + $0x138] sm:$0xf0] }
 0x242   :  { %4750 = vmatpush.bf16.msra.mxu3 %v7420_v37  ;;  %4712 = vmatmul.bf16.vlgmr.msra.gmra.mxu0 %v8622_v59  ;;  %v3691_v12 = vadd.f32 %v3690_v5, %v3678_v3  ;;  %v7064_v37 = vor.u32 %v8049_v27, %v7061_v10  ;;  %v7165_v3 = vld [vmem:[#allocation8 + $0x188] sm:$0xf0]  ;;  %v6976_v27 = vor.u32 %v8027_v56, %v6973_v35  ;;  %v8137_v10 = vld [vmem:[#allocation8 + $0x374] sm:$0xf] }
 0x243   :  { %4756 = vmatpush.bf16.msrb.mxu0 %v7032_v16  ;;  %4725 = vmatmul.bf16.vlgmr.msra.gmra.mxu1 %v8624_v39  ;;  %v7128_v16 = vor.u32 %v8065_v15, %v7125_v11  ;;  %v7413_v15 = vld [vmem:[#allocation8 + $0x378] sm:$0xf0]  ;;  %v7040_v11 = vor.u32 %v8043_v25, %v7037_v61  ;;  %v7325_v35 = vld [vmem:[#allocation8 + $0x2c8] sm:$0xf0] }
 0x244   :  { %4769 = vmatpush.bf16.msrb.mxu1 %v7096_v18  ;;  %4738 = vmatmul.bf16.vlgmr.msra.gmra.mxu2 %v8628_v43  ;;  %v8031_v18 = vld [vmem:[#allocation8 + $0x24] sm:$0xf]  ;;  %v7453_v25 = vld [vmem:[#allocation8 + $0x3c8] sm:$0xf0] }
 0x245   :  { %4782 = vmatpush.bf16.msrb.mxu2 %v7160_v4  ;;  %4751 = vmatmul.bf16.vlgmr.msra.gmra.mxu3 %v8626_v40  ;;  %v6989_v4 = vld [vmem:[#allocation8 + $0x28] sm:$0xf0] }
 0x246   :  { %4795 = vmatpush.bf16.msrb.mxu3 %v7224_v2  ;;  %v8063_v2 = vld [vmem:[#allocation8 + $0x124] sm:$0xf] }
 0x247   :  { %4757 = vmatpush.bf16.msrb.mxu0 %v7024_v41  ;;  %v3703_v29 = vpop.f32.mrf.mxu2  ;;  %v3679_v17 = vpop.f32.mrf.mxu0  ;;  %v7120_v47 = vor.u32 %v8063_v2, %v7117_v28  ;;  %v7341_v2 = vld [vmem:[#allocation8 + $0x2e8] sm:$0xf0]  ;;  %v8135_v28 = vld [vmem:[#allocation8 + $0x364] sm:$0xf] }
 0x248   :  { %4770 = vmatpush.bf16.msrb.mxu1 %v7088_v44  ;;  %v3704_v41 = vadd.f32 %v3703_v29, %v3691_v12  ;;  %v3716_v51 = vpop.f32.mrf.mxu3  ;;  %v6992_v44 = vor.u32 %v8031_v18, %v6989_v4  ;;  %v7104_v12 = vor.u32 %v8059_v19, %v7101_v0  ;;  %v7416_v18 = vor.u32 %v8137_v10, %v7413_v15  ;;  %v8103_v4 = vld [vmem:[#allocation8 + $0x264] sm:$0xf]  ;;  %v7405_v29 = vld [vmem:[#allocation8 + $0x368] sm:$0xf0]  ;;  %v7445_v10 = vld [vmem:[#allocation8 + $0x3b8] sm:$0xf0] }
 0x249   :  { %4783 = vmatpush.bf16.msrb.mxu2 %v7152_v45  ;;  %v3692_v45 = vpop.f32.mrf.mxu1  ;;  %v7280_v17 = vor.u32 %v8103_v4, %v7277_v23  ;;  %v7373_v4 = vld [vmem:[#allocation8 + $0x328] sm:$0xf0] }
 0x24a   :  { %4796 = vmatpush.bf16.msrb.mxu3 %v7216_v49  ;;  %v8029_v49 = vld [vmem:[#allocation8 + $0x14] sm:$0xf]  ;;  %v8637_v53 = vadd.f32 %v3716_v51, %v3704_v41  ;;  %v7408_v51 = vor.u32 %v8135_v28, %v7405_v29  ;;  %v7269_v45 = vld [vmem:[#allocation8 + $0x258] sm:$0xf0]  ;;  %v7248_v29 = vor.u32 %v8095_v36, %v7245_v13 }
 0x24b   :  { %4758 = vmatpush.bf16.msrb.mxu0 %v7016_v20  ;;  %v8061_v20 = vld [vmem:[#allocation8 + $0x114] sm:$0xf]  ;;  %v6984_v8 = vor.u32 %v8029_v49, %v6981_v50  ;;  %v7333_v49 = vld [vmem:[#allocation8 + $0x2d8] sm:$0xf0] }
 0x24c   :  { %4771 = vmatpush.bf16.msrb.mxu1 %v7080_v9  ;;  %v8077_v9 = vld [vmem:[#allocation8 + $0x194] sm:$0xf]  ;;  %v7112_v60 = vor.u32 %v8061_v20, %v7109_v57  ;;  %v8158_v13 = vld [vmem:[#allocation11 + $0x18] sm:$0xff] }
 0x24d   :  { %4784 = vmatpush.bf16.msrb.mxu2 %v7144_v58  ;;  %v7173_v58 = vld [vmem:[#allocation8 + $0x198] sm:$0xf0]  ;;  %v8133_v50 = vld [vmem:[#allocation8 + $0x354] sm:$0xf] }
 0x24e   :  { %4797 = vmatpush.bf16.msrb.mxu3 %v7208_v34  ;;  %v7048_v34 = vor.u32 %v8045_v52, %v7045_v55  ;;  %v7176_v63 = vor.u32 %v8077_v9, %v7173_v58  ;;  %v7397_v52 = vld [vmem:[#allocation8 + $0x358] sm:$0xf0]  ;;  %v8099_v58 = vld [vmem:[#allocation8 + $0x244] sm:$0xf] }
 0x24f   :  { %4759 = vmatpush.bf16.msrb.mxu0 %v7008_v1  ;;  %v8075_v1 = vld [vmem:[#allocation8 + $0x184] sm:$0xf]  ;;  %v3705_v5 = vpop.f32.mrf.mxu2  ;;  %v7461_v55 = vld [vmem:[#allocation8 + $0x3d8] sm:$0xf0]  ;;  %v7400_v9 = vor.u32 %v8133_v50, %v7397_v52  ;;  %v8141_v52 = vld [vmem:[#allocation8 + $0x394] sm:$0xf] }
 0x250   :  { %4772 = vmatpush.bf16.msrb.mxu1 %v7072_v6  ;;  %v8105_v6 = vld [vmem:[#allocation8 + $0x274] sm:$0xf]  ;;  %v3718_v7 = vpop.f32.mrf.mxu3  ;;  %v7365_v50 = vld [vmem:[#allocation8 + $0x318] sm:$0xf0] }
 0x251   :  { %4785 = vmatpush.bf16.msrb.mxu2 %v7136_v21  ;;  %v7285_v21 = vld [vmem:[#allocation8 + $0x278] sm:$0xf0]  ;;  %v8113_v5 = vld [vmem:[#allocation8 + $0x2b4] sm:$0xf] }
 0x252   :  { %4798 = vmatpush.bf16.msrb.mxu3 %v7200_v54  ;;  %v7349_v54 = vld [vmem:[#allocation8 + $0x2f8] sm:$0xf0]  ;;  %v8129_v7 = vld [vmem:[#allocation8 + $0x334] sm:$0xf] }
 0x253   :  { %4760 = vmatpush.bf16.msrb.mxu0 %v7000_v14  ;;  %v7168_v14 = vor.u32 %v8075_v1, %v7165_v3  ;;  %v8097_v1 = vld [vmem:[#allocation8 + $0x234] sm:$0xf]  ;;  %v7253_v3 = vld [vmem:[#allocation8 + $0x238] sm:$0xf0] }
 0x254   :  { %4773 = vmatpush.bf16.msrb.mxu1 %v7064_v37  ;;  %v7288_v37 = vor.u32 %v8105_v6, %v7285_v21  ;;  %v7256_v15 = vor.u32 %v8097_v1, %v7253_v3 }
 0x255   :  { %4786 = vmatpush.bf16.msrb.mxu2 %v7128_v16  ;;  %v7352_v16 = vor.u32 %v8121_v62, %v7349_v54  ;;  %v7317_v62 = vld [vmem:[#allocation8 + $0x2b8] sm:$0xf0]  ;;  %v8145_v54 = vld [vmem:[#allocation8 + $0x3b4] sm:$0xf] }
 0x256   :  { %4799 = vmatpush.bf16.msrb.mxu3 %v7192_v24  ;;  %v8119_v24 = vld [vmem:[#allocation8 + $0x2e4] sm:$0xf] }
 0x257   :  { %4761 = vmatpush.bf16.msrb.mxu0 %v6992_v44  ;;  %v7344_v41 = vor.u32 %v8119_v24, %v7341_v2  ;;  %v8101_v44 = vld [vmem:[#allocation8 + $0x254] sm:$0xf]  ;;  %v8143_v24 = vld [vmem:[#allocation8 + $0x3a4] sm:$0xf] }
 0x258   :  { %4774 = vmatpush.bf16.msrb.mxu1 %v7056_v46  ;;  %v8117_v46 = vld [vmem:[#allocation8 + $0x2d4] sm:$0xf]  ;;  %v7272_v20 = vor.u32 %v8101_v44, %v7269_v45 }
 0x259   :  { %4787 = vmatpush.bf16.msrb.mxu2 %v7120_v47  ;;  %v7472_v47 = vor.u32 %v8151_v22, %v7469_v33  ;;  %v7336_v57 = vor.u32 %v8117_v46, %v7333_v49  ;;  %v8109_v44 = vld [vmem:[#allocation8 + $0x294] sm:$0xf] }
 0x25a   :  { %4800 = vmatpush.bf16.msrb.mxu3 %v7184_v32  ;;  %v8149_v32 = vld [vmem:[#allocation8 + $0x3d4] sm:$0xf] }
 0x25b   :  { %4762 = vmatpush.bf16.msrb.mxu0 %v6984_v8  ;;  %v8115_v8 = vld [vmem:[#allocation8 + $0x2c4] sm:$0xf]  ;;  %v7464_v56 = vor.u32 %v8149_v32, %v7461_v55  ;;  %v8125_v49 = vld [vmem:[#allocation8 + $0x314] sm:$0xf]  ;;  %v7429_v32 = vld [vmem:[#allocation8 + $0x398] sm:$0xf0] }
 0x25c   :  { %4775 = vmatpush.bf16.msrb.mxu1 %v7048_v34  ;;  %v8131_v34 = vld [vmem:[#allocation8 + $0x344] sm:$0xf] }
 0x25d   :  { %4788 = vmatpush.bf16.msrb.mxu2 %v7112_v60 }
 0x25e   :  { %4801 = vmatpush.bf16.msrb.mxu3 %v7176_v63  ;;  %v7328_v63 = vor.u32 %v8115_v8, %v7325_v35  ;;  %v7432_v8 = vor.u32 %v8141_v52, %v7429_v32  ;;  %v8123_v35 = vld [vmem:[#allocation8 + $0x304] sm:$0xf] }
 0x25f   :  { %4763 = vmatpush.bf16.msrb.mxu0 %v6976_v27  ;;  %v3729_v60 = vpop.f32.mrf.mxu0  ;;  %v7381_v27 = vld [vmem:[#allocation8 + $0x338] sm:$0xf0] }
 0x260   :  { %4776 = vmatpush.bf16.msrb.mxu1 %v7040_v11  ;;  %v3742_v19 = vpop.f32.mrf.mxu1  ;;  %v7320_v11 = vor.u32 %v8113_v5, %v7317_v62 }
 0x261   :  { %4789 = vmatpush.bf16.msrb.mxu2 %v7104_v12  ;;  %v7384_v12 = vor.u32 %v8129_v7, %v7381_v27 }
 0x262   :  { %4802 = vmatpush.bf16.msrb.mxu3 %v7168_v14  ;;  %4764 = vmatmul.bf16.vlgmr.msrb.gmra.mxu0 %v8603_v30  ;;  %v7261_v30 = vld [vmem:[#allocation8 + $0x248] sm:$0xf0]  ;;  %v8111_v14 = vld [vmem:[#allocation8 + $0x2a4] sm:$0xf] }
 0x263   :  { %4808 = vmatpush.bf16.msra.mxu0 %v7288_v37  ;;  %4777 = vmatmul.bf16.vlgmr.msrb.gmra.mxu1 %v8605_v31  ;;  %v7389_v31 = vld [vmem:[#allocation8 + $0x348] sm:$0xf0]  ;;  %v7264_v61 = vor.u32 %v8099_v58, %v7261_v30  ;;  %v7448_v37 = vor.u32 %v8145_v54, %v7445_v10  ;;  %v8107_v30 = vld [vmem:[#allocation8 + $0x284] sm:$0xf] }
 0x264   :  { %4821 = vmatpush.bf16.msra.mxu1 %v7352_v16  ;;  %4790 = vmatmul.bf16.vlgmr.msrb.gmra.mxu2 %v8607_v38  ;;  %v8147_v38 = vld [vmem:[#allocation8 + $0x3c4] sm:$0xf]  ;;  %v7392_v0 = vor.u32 %v8131_v34, %v7389_v31  ;;  %v7309_v16 = vld [vmem:[#allocation8 + $0x2a8] sm:$0xf0] }
 0x265   :  { %4834 = vmatpush.bf16.msra.mxu2 %v7416_v18  ;;  %4803 = vmatmul.bf16.vlgmr.msrb.gmra.mxu3 %v8609_v42  ;;  %v3730_v42 = vadd.f32 %v3729_v60, %v8637_v53  ;;  %v7456_v6 = vor.u32 %v8147_v38, %v7453_v25  ;;  %v633_v53 = vperm.slane %v8630_v48, 1  ;;  %v8127_v18 = vld [vmem:[#allocation8 + $0x324] sm:$0xf]  ;;  %v7312_v33 = vor.u32 %v8111_v14, %v7309_v16  ;;  %v7229_v58 = vld [vmem:[#allocation8 + $0x208] sm:$0xf0] }
 0x266   :  { %4847 = vmatpush.bf16.msra.mxu3 %v7480_v26  ;;  %v7437_v26 = vld [vmem:[#allocation8 + $0x3a8] sm:$0xf0]  ;;  %v8139_v60 = vld [vmem:[#allocation8 + $0x384] sm:$0xf] }
 0x267   :  { %4809 = vmatpush.bf16.msra.mxu0 %v7280_v17  ;;  %v8644_v21 = vadd.f32 %v3742_v19, %v3730_v42  ;;  %v3755_v23 = vpop.f32.mrf.mxu2  ;;  %v3731_v48 = vpop.f32.mrf.mxu0  ;;  %v7376_v17 = vor.u32 %v8127_v18, %v7373_v4  ;;  %v7440_v46 = vor.u32 %v8143_v24, %v7437_v26  ;;  %v7357_v34 = vld [vmem:[#allocation8 + $0x308] sm:$0xf0] }
 0x268   :  { %4822 = vmatpush.bf16.msra.mxu1 %v7344_v41  ;;  %v3756_v2 = vadd.f32 %v3755_v23, %v633_v53  ;;  %v3768_v28 = vpop.f32.mrf.mxu3  ;;  %v3744_v22 = vpop.f32.mrf.mxu1  ;;  %v8093_v41 = vld [vmem:[#allocation8 + $0x214] sm:$0xf]  ;;  %v7421_v38 = vld [vmem:[#allocation8 + $0x388] sm:$0xf0]  ;;  %v7360_v19 = vor.u32 %v8123_v35, %v7357_v34 }
 0x269   :  { %4835 = vmatpush.bf16.msra.mxu2 %v7408_v51  ;;  %v7237_v51 = vld [vmem:[#allocation8 + $0x218] sm:$0xf0]  ;;  %v8156_v26 = vld [vmem:[#allocation11 + $0x8] sm:$0xff] }
 0x26a   :  { %4848 = vmatpush.bf16.msra.mxu3 %v7472_v47  ;;  %v3769_v45 = vadd.f32 %v3768_v28, %v3756_v2  ;;  %v7301_v47 = vld [vmem:[#allocation8 + $0x298] sm:$0xf0]  ;;  %v7240_v55 = vor.u32 %v8093_v41, %v7237_v51  ;;  %v8155_v2 = vld [vmem:[#allocation11] sm:$0xff] }
 0x26b   :  { %4810 = vmatpush.bf16.msra.mxu0 %v7272_v20  ;;  %v7304_v20 = vor.u32 %v8109_v44, %v7301_v47 }
 0x26c   :  { %4823 = vmatpush.bf16.msra.mxu1 %v7336_v57  ;;  %v7368_v57 = vor.u32 %v8125_v49, %v7365_v50 }
 0x26d   :  { %4836 = vmatpush.bf16.msra.mxu2 %v7400_v9  ;;  %v8091_v9 = vld [vmem:[#allocation8 + $0x204] sm:$0xf] }
 0x26e   :  { %4849 = vmatpush.bf16.msra.mxu3 %v7464_v56  ;;  %v7293_v56 = vld [vmem:[#allocation8 + $0x288] sm:$0xf0]  ;;  %v7232_v42 = vor.u32 %v8091_v9, %v7229_v58 }
 0x26f   :  { %4811 = vmatpush.bf16.msra.mxu0 %v7264_v61  ;;  %v3757_v31 = vpop.f32.mrf.mxu2  ;;  %v7296_v61 = vor.u32 %v8107_v30, %v7293_v56 }
 0x270   :  { %4824 = vmatpush.bf16.msra.mxu1 %v7328_v63  ;;  %v3770_v25 = vpop.f32.mrf.mxu3  ;;  %v7424_v63 = vor.u32 %v8139_v60, %v7421_v38 }
 0x271   :  { %4837 = vmatpush.bf16.msra.mxu2 %v7392_v0  ;;  %v8170_v25 = vld [vmem:[#allocation11 + $0x78] sm:$0xff] }
 0x272   :  { %4850 = vmatpush.bf16.msra.mxu3 %v7456_v6 }
 0x273   :  { %4812 = vmatpush.bf16.msra.mxu0 %v7256_v15  ;;  %v8162_v15 = vld [vmem:[#allocation11 + $0x38] sm:$0xff] }
 0x274   :  { %4825 = vmatpush.bf16.msra.mxu1 %v7320_v11  ;;  %v8159_v11 = vld [vmem:[#allocation11 + $0x20] sm:$0xff] }
 0x275   :  { %4838 = vmatpush.bf16.msra.mxu2 %v7384_v12 }
 0x276   :  { %4851 = vmatpush.bf16.msra.mxu3 %v7448_v37  ;;  %v8157_v37 = vld [vmem:[#allocation11 + $0x10] sm:$0xff] }
 0x277   :  { %4813 = vmatpush.bf16.msra.mxu0 %v7248_v29 }
 0x278   :  { %4826 = vmatpush.bf16.msra.mxu1 %v7312_v33 }
 0x279   :  { %4839 = vmatpush.bf16.msra.mxu2 %v7376_v17 }
 0x27a   :  { %4852 = vmatpush.bf16.msra.mxu3 %v7440_v46 }
 0x27b   :  { %4814 = vmatpush.bf16.msra.mxu0 %v7240_v55 }
 0x27c   :  { %4827 = vmatpush.bf16.msra.mxu1 %v7304_v20 }
 0x27d   :  { %4840 = vmatpush.bf16.msra.mxu2 %v7368_v57 }
 0x27e   :  { %4853 = vmatpush.bf16.msra.mxu3 %v7432_v8 }
 0x27f   :  { %4815 = vmatpush.bf16.msra.mxu0 %v7232_v42  ;;  %v3781_v0 = vpop.f32.mrf.mxu0 }
 0x280   :  { %4828 = vmatpush.bf16.msra.mxu1 %v7296_v61  ;;  %v3782_v1 = vadd.f32 %v3781_v0, %v3769_v45  ;;  %v3794_v3 = vpop.f32.mrf.mxu1 }
 0x281   :  { %4841 = vmatpush.bf16.msra.mxu2 %v7360_v19  ;;  %v8169_v19 = vld [vmem:[#allocation11 + $0x70] sm:$0xff] }
 0x282   :  { %4854 = vmatpush.bf16.msra.mxu3 %v7424_v63  ;;  %4816 = vmatmul.bf16.vlgmr.msra.gmra.mxu0 %v8622_v59  ;;  %v3795_v5 = vadd.f32 %v3794_v3, %v3782_v1  ;;  %v8168_v1 = vld [vmem:[#allocation11 + $0x68] sm:$0xff] }
 0x283   :  { %4829 = vmatmul.bf16.vlgmr.msra.gmra.mxu1 %v8624_v39  ;;  %5000 = vmatpush.bf16.msrb.mxu0 %v8162_v15  ;;  %v8161_v39 = vld [vmem:[#allocation11 + $0x30] sm:$0xff] }
 0x284   :  { %4842 = vmatmul.bf16.vlgmr.msra.gmra.mxu2 %v8628_v43  ;;  %v8160_v43 = vld [vmem:[#allocation11 + $0x28] sm:$0xff]  ;;  %5013 = vmatpush.bf16.msrb.mxu1 %v8170_v25 }
 0x285   :  { %4855 = vmatmul.bf16.vlgmr.msra.gmra.mxu3 %v8626_v40  ;;  %v6967_v40 = vmul.f32 -1.442695, %v8644_v21  ;;  %v8654_v21 = vld [vmem:[#allocation10] sm:$0x3] }
 0x286   :  { %v4008_v48 = vperm.slane %v8654_v21, 0 }
 0x287   :  { %v3807_v6 = vpop.f32.mrf.mxu2  ;;  %v3783_v54 = vpop.f32.mrf.mxu0  ;;  %5001 = vmatpush.bf16.msrb.mxu0 %v8161_v39  ;;  %8186 = vpow2.f32 %v6967_v40 }
 0x288   :  { %v3808_v62 = vadd.f32 %v3807_v6, %v3795_v5  ;;  %v3820_v7 = vpop.f32.mrf.mxu3  ;;  %v3796_v10 = vpop.f32.mrf.mxu1  ;;  %5014 = vmatpush.bf16.msrb.mxu1 %v8169_v19  ;;  %v8167_v5 = vld [vmem:[#allocation11 + $0x60] sm:$0xff]  ;;  %v8166_v6 = vld [vmem:[#allocation11 + $0x58] sm:$0xff] }
 0x289   :  { %v8165_v10 = vld [vmem:[#allocation11 + $0x50] sm:$0xff] }
 0x28a   :  { %v8651_v27 = vadd.f32 %v3820_v7, %v3808_v62 }
 0x28b   :  { %5002 = vmatpush.bf16.msrb.mxu0 %v8160_v43 }
 0x28c   :  { %v6968_v3 = vmul.f32 -1.442695, %v8651_v27  ;;  %5015 = vmatpush.bf16.msrb.mxu1 %v8168_v1  ;;  %v8163_v27 = vld [vmem:[#allocation11 + $0x40] sm:$0xff] }
 0x28d   :  { %v8187_v14 = vpop.eup %8186 }
 0x28e   :  { %v3838_v16 = vadd.f32 1.0, %v8187_v14 }
 0x28f   :  { %v3809_v53 = vpop.f32.mrf.mxu2  ;;  %5003 = vmatpush.bf16.msrb.mxu0 %v8159_v11  ;;  %v4009_v11 = vperm.slane %v8654_v21, 1 }
 0x290   :  { %v3822_v59 = vpop.f32.mrf.mxu3  ;;  %8188 = vrcp.f32 %v3838_v16  ;;  %vm3845_vm0 = vweird.f32 %v3838_v16  ;;  %v3851_v32 = vand.u32 2147483648, %v3838_v16  ;;  %v3849_v55 = vand.u32 2147483647, %v3838_v16  ;;  %5016 = vmatpush.bf16.msrb.mxu1 %v8167_v5 }
 0x291   :  { %8190 = vpow2.f32 %v6968_v3  ;;  %v8164_v59 = vld [vmem:[#allocation11 + $0x48] sm:$0xff] }
 0x292   :  { %v3852_v58 = vor.u32 1.1754944e-38, %v3851_v32  ;;  %vm3850_vm3 = vcmp.eq.f32.partialorder %v3849_v55, 8.507059e+37 }
 0x293   :  { %5004 = vmatpush.bf16.msrb.mxu0 %v8158_v13 }
 0x294   :  { %5017 = vmatpush.bf16.msrb.mxu1 %v8166_v6 }
 0x296   :  { %v8189_v22 = vpop.eup %8188 }
 0x297   :  { %5005 = vmatpush.bf16.msrb.mxu0 %v8157_v37  ;;  %v3841_v33 = vmul.f32 %v8189_v22, %v3838_v16  ;;  %vm3846_vm1 = vweird.f32 %v8189_v22  ;;  %v8191_v54 = vpop.eup %8190 }
 0x298   :  { %vm3847_vm2 = vmor %vm3845_vm0, %vm3846_vm1  ;;  %5018 = vmatpush.bf16.msrb.mxu1 %v8165_v10  ;;  %v3839_v53 = vadd.f32 1.0, %v8191_v54 }
 0x299   :  { %v3842_v51 = vsub.f32 1.0, %v3841_v33 }
 0x29a   :  { %8192 = vrcp.f32 %v3839_v53  ;;  %vm3860_vm4 = vweird.f32 %v3839_v53 }
 0x29b   :  { %5006 = vmatpush.bf16.msrb.mxu0 %v8156_v26  ;;  %v3843_v45 = vmul.f32 %v8189_v22, %v3842_v51 }
 0x29c   :  { %5019 = vmatpush.bf16.msrb.mxu1 %v8164_v59 }
 0x29d   :  { %v3844_v52 = vadd.f32 %v8189_v22, %v3843_v45 }
 0x29f   :  { %v4661_v12 = vpop.f32.mrf.mxu0  ;;  %5007 = vmatpush.bf16.msrb.mxu0 %v8155_v2  ;;  %v3848_v57 = vsel %vm3847_vm2, %v8189_v22, %v3844_v52  ;;  %v3864_v22 = vand.u32 2147483647, %v3839_v53 }
 0x2a0   :  { %v4674_v36 = vpop.f32.mrf.mxu1  ;;  %v4662_v17 = vadd.f32 %v4661_v12, %v4008_v48  ;;  %v3853_v35 = vsel %vm3850_vm3, %v3852_v58, %v3848_v57  ;;  %5020 = vmatpush.bf16.msrb.mxu1 %v8163_v27 }
 0x2a1   :  { %v7481_v38 = vadd.f32 -0.5, %v3853_v35  ;;  %vm3865_vm7 = vcmp.eq.f32.partialorder %v3864_v22, 8.507059e+37 }
 0x2a2   :  { %v4675_v41 = vadd.f32 %v4674_v36, %v4662_v17  ;;  %v8193_v36 = vpop.eup %8192 }
 0x2a3   :  { %v3856_v14 = vmul.f32 %v8193_v36, %v3839_v53  ;;  %vm3861_vm5 = vweird.f32 %v8193_v36 }
 0x2a4   :  { %vm3862_vm6 = vmor %vm3860_vm4, %vm3861_vm5 }
 0x2a7   :  { %v4687_v18 = vpop.f32.mrf.mxu2  ;;  %v4663_v23 = vpop.f32.mrf.mxu0 }
 0x2a8   :  { %v4700_v4 = vpop.f32.mrf.mxu3  ;;  %v4676_v24 = vpop.f32.mrf.mxu1  ;;  %v4688_v44 = vadd.f32 %v4687_v18, %v4675_v41  ;;  %v3857_v18 = vsub.f32 1.0, %v3856_v14 }
 0x2aa   :  { %v4701_v46 = vadd.f32 %v4700_v4, %v4688_v44  ;;  %v3858_v23 = vmul.f32 %v8193_v36, %v3857_v18 }
 0x2ac   :  { %v3859_v48 = vadd.f32 %v8193_v36, %v3858_v23 }
 0x2ae   :  { %v3863_v33 = vsel %vm3862_vm6, %v8193_v36, %v3859_v48 }
 0x2af   :  { %v4689_v28 = vpop.f32.mrf.mxu2 }
 0x2b0   :  { %v4702_v29 = vpop.f32.mrf.mxu3 }
 0x2b1   :  { %v3866_v29 = vand.u32 2147483648, %v3839_v53 }
 0x2b3   :  { %v3867_v41 = vor.u32 1.1754944e-38, %v3866_v29 }
 0x2bf   :  { %v4713_v47 = vpop.f32.mrf.mxu0 }
 0x2c0   :  { %v4726_v49 = vpop.f32.mrf.mxu1  ;;  %v4714_v50 = vadd.f32 %v4713_v47, %v4701_v46  ;;  %v3868_v46 = vsel %vm3865_vm7, %v3867_v41, %v3863_v33 }
 0x2c1   :  { %v7482_v52 = vadd.f32 -0.5, %v3868_v46 }
 0x2c2   :  { %v4727_v20 = vadd.f32 %v4726_v49, %v4714_v50 }
 0x2c7   :  { %v4739_v9 = vpop.f32.mrf.mxu2  ;;  %v4715_v56 = vpop.f32.mrf.mxu0 }
 0x2c8   :  { %v4740_v30 = vadd.f32 %v4739_v9, %v4727_v20  ;;  %v4752_v8 = vpop.f32.mrf.mxu3  ;;  %v4728_v34 = vpop.f32.mrf.mxu1 }
 0x2ca   :  { %v4753_v31 = vadd.f32 %v4752_v8, %v4740_v30  ;;  %v8185_v30 = vld [vmem:[#allocation13] ss:$0 sm:$0xff] }
 0x2cc   :  { %v4860_v60 = vmax.f32 %v4753_v31, 0.0 }
 0x2ce   :  { %v4864_v42 = vmul.f32 %v7481_v38, %v4860_v60 }
 0x2cf   :  { %v4741_v61 = vpop.f32.mrf.mxu2 }
 0x2d0   :  { %v4866_v63 = vpack.c.bf16 %v4864_v42, %v4864_v42  ;;  %v4754_v0 = vpop.f32.mrf.mxu3 }
 0x2d2   :  { %5008 = vmatmul.bf16.vlgmr.msrb.gmra.mxu0 %v4866_v63 }
 0x2df   :  { %v4765_v62 = vpop.f32.mrf.mxu0 }
 0x2e0   :  { %v4778_v7 = vpop.f32.mrf.mxu1  ;;  %v4766_v37 = vadd.f32 %v4765_v62, %v4009_v11 }
 0x2e2   :  { %v4779_v16 = vadd.f32 %v4778_v7, %v4766_v37 }
 0x2e7   :  { %v4791_v15 = vpop.f32.mrf.mxu2  ;;  %v4767_v43 = vpop.f32.mrf.mxu0 }
 0x2e8   :  { %v4804_v39 = vpop.f32.mrf.mxu3  ;;  %v4780_v40 = vpop.f32.mrf.mxu1  ;;  %v4792_v4 = vadd.f32 %v4791_v15, %v4779_v16 }
 0x2ea   :  { %v4805_v24 = vadd.f32 %v4804_v39, %v4792_v4 }
 0x2ef   :  { %v4793_v12 = vpop.f32.mrf.mxu2 }
 0x2f0   :  { %v4806_v13 = vpop.f32.mrf.mxu3 }
 0x2ff   :  { %v4817_v26 = vpop.f32.mrf.mxu0 }
 0x300   :  { %v4830_v2 = vpop.f32.mrf.mxu1  ;;  %v4818_v28 = vadd.f32 %v4817_v26, %v4805_v24 }
 0x302   :  { %v4831_v21 = vadd.f32 %v4830_v2, %v4818_v28 }
 0x307   :  { %v4843_v17 = vpop.f32.mrf.mxu2  ;;  %v4819_v45 = vpop.f32.mrf.mxu0 }
 0x308   :  { %v4844_v51 = vadd.f32 %v4843_v17, %v4831_v21  ;;  %v4856_v44 = vpop.f32.mrf.mxu3  ;;  %v4832_v47 = vpop.f32.mrf.mxu1 }
 0x30a   :  { %v4857_v49 = vadd.f32 %v4856_v44, %v4844_v51 }
 0x30c   :  { %v4861_v50 = vmax.f32 %v4857_v49, 0.0 }
 0x30e   :  { %v4865_v32 = vmul.f32 %v7482_v52, %v4861_v50 }
 0x30f   :  { %v4845_v55 = vpop.f32.mrf.mxu2 }
 0x310   :  { %v4867_v20 = vpack.c.bf16 %v4865_v32, %v4865_v32  ;;  %v4858_v57 = vpop.f32.mrf.mxu3 }
 0x312   :  { %5021 = vmatmul.bf16.vlgmr.msrb.gmra.mxu1 %v4867_v20 }
 0x34f   :  { %v5009_v9 = vpop.f32.mrf.mxu0 }
 0x350   :  { %v5010_v8 = vadd.f32 %v8185_v30, %v5009_v9 }
 0x357   :  { %v5011_v58 = vpop.f32.mrf.mxu0 }
 0x38f   :  { %v5022_v56 = vpop.f32.mrf.mxu1 }
 0x390   :  { %v5023_v35 = vadd.f32 %v5022_v56, %v5010_v8 }
 0x392   :  { %5026 = vst [vmem:[#allocation14] sm:$0xff] %v5023_v35 }
 0x393   :  { %5037 = dma.vmem_to_hbm [thread:$0]  %s5033_s6, 128, %s5035_s15, [#allocation4]  }
 0x397   :  { %v5024_v34 = vpop.f32.mrf.mxu1 }
 0x398   :  { %8396 = dma.done.wait [#allocation4], 128  }
 0x399   :  { %8397 = vsyncadd [#allocation4], 4294967168 }
 0x39a   :  { %5042 = vsyncpa [#allocation3], 1 }
 0x39b   :  { %5043 = vsyncpa [#allocation6], 1 }
 0x39c   :  { %5044 = vsyncpa [#allocation9], 1 }
 0x39d   :  { %5045 = vsyncpa [#allocation12], 1 }
 0x39e   :  { %5046 = vsyncpa [#allocation4], 1 }

</bundles_post_ra>
